<compile_context>
chip_gen: v7x
topology: tpu7x:2x2x1
jax: 0.10.0
libtpu: 0.0.40
codegen_flags: <defaults>
</compile_context>

<pallas_src>
import math

import jax
import jax.numpy as jnp
from jax import lax
from jax.experimental import pallas as pl
from jax.experimental.pallas import tpu as pltpu

LANE = 128   # vreg / MXU lane width
KTAPS = 9    # 3x3 conv taps


def _round_up(x, m):
    return ((x + m - 1) // m) * m


def _conv3x3_relu_layer(xpad_ref, patch_ref, src, w_ref, b_ref):
    """One Conv2d(3x3, stride=1, pad=1) + bias + ReLU on a single image.

    src       : (H, W, Cin) f32 value (unpadded activation).
    xpad_ref  : (H+2, W+16, Cin) f32 scratch.  Image interior at
                [1:H+1, 8:8+W, :] (sublane-aligned store); only the halo the
                taps read (rows 0/H+1, cols 7/W+8) is re-zeroed each step.
    patch_ref : (H, W, K) f32 scratch, K = round_up(9*Cin, 128).  Tap t lives
                at lanes [t*Cin, (t+1)*Cin) (compact packing); only the
                K - 9*Cin padded lanes are re-zeroed each step.
    w_ref     : (K, Npad) packed weights (zero rows/cols in padding).
    b_ref     : (1, Npad) f32 bias (zero in padding).
    returns   : (H*W, Npad) f32 = relu(im2col(src) @ w + b).
    """
    H, W, cin = src.shape
    K = patch_ref.shape[-1]

    # Interior store, sublane offset 8 -> aligned.
    xpad_ref[1:H + 1, 8:8 + W, :] = src

    # Zero only the halo that the taps actually read (O(H+W) elements).
    # Redone every grid step so per-core scratch never needs a separate init
    # pass (safe under "parallel" megacore sharding of the batch axis).
    zrow = jnp.zeros((1, W + 2, cin), xpad_ref.dtype)
    xpad_ref[0:1, 7:W + 9, :] = zrow
    xpad_ref[H + 1:H + 2, 7:W + 9, :] = zrow
    zcol = jnp.zeros((H, 1, cin), xpad_ref.dtype)
    xpad_ref[1:H + 1, 7:8, :] = zcol
    xpad_ref[1:H + 1, W + 8:W + 9, :] = zcol

    # im2col: taps stored 3-D (no per-tap reshape copy), compact lane packing.
    for t in range(KTAPS):
        ky, kx = t // 3, t % 3
        patch_ref[:, :, t * cin:(t + 1) * cin] = (
            xpad_ref[ky:ky + H, 7 + kx:7 + kx + W, :])
    if K > KTAPS * cin:
        # Padded lanes must be exactly zero (stale VMEM could hold NaNs even
        # though the matching weight rows are zero).  Small slice, every step.
        patch_ref[:, :, KTAPS * cin:] = jnp.zeros(
            (H, W, K - KTAPS * cin), patch_ref.dtype)

    # One MXU matmul per layer; operands optionally bf16, accumulation f32.
    lhs = patch_ref[...].reshape(H * W, K).astype(w_ref.dtype)
    acc = jnp.dot(lhs, w_ref[...], preferred_element_type=jnp.float32)
    # Bias add + ReLU kept in f32 (v5e has no bf16 VPU).
    return jnp.maximum(acc + b_ref[...], 0.0)


def _fused_block_kernel(x_ref, w1_ref, b1_ref, w2_ref, b2_ref, o_ref,
                        xp1, patch1, xp2, patch2):
    # x_ref : (1, H, W, Cin)      o_ref : (1, H*W, Cout_pad)
    H, W = x_ref.shape[1], x_ref.shape[2]
    cmid = xp2.shape[-1]                      # real intermediate channel count

    h1 = _conv3x3_relu_layer(xp1, patch1, x_ref[0].astype(jnp.float32),
                             w1_ref, b1_ref)              # (H*W, Cmid_pad) f32
    # Intermediate never leaves VMEM; real channels are lanes [0, cmid).
    h2 = _conv3x3_relu_layer(xp2, patch2,
                             h1[:, :cmid].reshape(H, W, cmid),
                             w2_ref, b2_ref)              # (H*W, Cout_pad) f32
    o_ref[0] = h2.astype(o_ref.dtype)         # lane-dense, unmasked store


def _pack_weight_im2col(w_hwio, n_pad, mxu_dtype):
    """(3,3,Cin,Cout) HWIO -> (round_up(9*Cin,128), n_pad).

    Row order matches the patch lane order (tap-major, channel-minor); padded
    rows / columns are zero so the padded matmul is exact."""
    kh, kw, cin, cout = w_hwio.shape
    k_real = kh * kw * cin
    k_pad = _round_up(k_real, LANE)
    w = w_hwio.reshape(k_real, cout)
    w = jnp.pad(w, ((0, k_pad - k_real), (0, n_pad - cout)))
    return w.astype(mxu_dtype)


def init_conv_params(key, cin, cout, k=3, dtype=jnp.float32):
    """kaiming_normal_(mode='fan_out', nonlinearity='relu') on weight,
    PyTorch-default uniform on bias. Weight stored as HWIO."""
    kw, kb = jax.random.split(key)
    fan_out = cout * k * k
    std = math.sqrt(2.0 / fan_out)
    w = std * jax.random.normal(kw, (k, k, cin, cout), dtype=dtype)
    fan_in = cin * k * k
    bound = 1.0 / math.sqrt(fan_in)
    b = jax.random.uniform(kb, (cout,), dtype=dtype, minval=-bound, maxval=bound)
    return w, b


def sliced_block_forward(x_nchw, params, mxu_dtype=jnp.float32):
    """SlicedBlock.forward: x = self.layers(x).  NCHW in, NCHW out.

    mxu_dtype=jnp.bfloat16 casts only the MXU operands (im2col patch and packed
    weights) to bf16 -- recommended on all TPU generations including v5e
    (bf16-native MXU); accumulation and the bias+ReLU epilogue stay f32.
    """
    (w1, b1), (w2, b2) = params
    N, cin, H, W = x_nchw.shape
    cmid, cout = w1.shape[-1], w2.shape[-1]
    assert W % 8 == 0, "kernel assumes W is a multiple of 8 (sublane tiling)"

    K1 = _round_up(KTAPS * cin, LANE)            # compact im2col K, layer 1
    K2 = _round_up(KTAPS * cmid, LANE)           # compact im2col K, layer 2
    cmid_pad = _round_up(cmid, LANE)             # lane-dense matmul N, layer 1
    cout_pad = _round_up(cout, LANE)             # lane-dense output store

    w1p = _pack_weight_im2col(w1, cmid_pad, mxu_dtype)    # (K1, cmid_pad)
    w2p = _pack_weight_im2col(w2, cout_pad, mxu_dtype)    # (K2, cout_pad)
    b1r = jnp.pad(b1.astype(jnp.float32), (0, cmid_pad - cmid)).reshape(1, cmid_pad)
    b2r = jnp.pad(b2.astype(jnp.float32), (0, cout_pad - cout)).reshape(1, cout_pad)
    x_nhwc = jnp.transpose(x_nchw, (0, 2, 3, 1))  # NCHW -> NHWC (channels on lanes)

    # VMEM budget from actual scratch + (double-buffered) block sizes,
    # capped at v7x's 64 MiB physical VMEM.
    itemsize = jnp.dtype(x_nchw.dtype).itemsize
    mxu_itemsize = jnp.dtype(mxu_dtype).itemsize
    scratch_bytes = 4 * ((H + 2) * (W + 16) * (cin + cmid) + H * W * (K1 + K2))
    block_bytes = (itemsize * H * W * cin
                   + mxu_itemsize * (K1 * cmid_pad + K2 * cout_pad)
                   + 4 * (cmid_pad + cout_pad)
                   + itemsize * H * W * cout_pad)
    vmem_limit = min(max(scratch_bytes + 2 * block_bytes + (4 << 20),
                         16 << 20), 64 << 20)

    out_flat = pl.pallas_call(
        _fused_block_kernel,
        out_shape=jax.ShapeDtypeStruct((N, H * W, cout_pad), x_nchw.dtype),
        grid_spec=pltpu.PrefetchScalarGridSpec(
            num_scalar_prefetch=0,
            grid=(N,),
            in_specs=[
                pl.BlockSpec((1, H, W, cin), lambda n: (n, 0, 0, 0)),
                pl.BlockSpec((K1, cmid_pad), lambda n: (0, 0)),
                pl.BlockSpec((1, cmid_pad), lambda n: (0, 0)),
                pl.BlockSpec((K2, cout_pad), lambda n: (0, 0)),
                pl.BlockSpec((1, cout_pad), lambda n: (0, 0)),
            ],
            out_specs=pl.BlockSpec((1, H * W, cout_pad), lambda n: (n, 0, 0)),
            scratch_shapes=[
                pltpu.VMEM((H + 2, W + 16, cin), jnp.float32),   # padded act, L1
                pltpu.VMEM((H, W, K1), jnp.float32),             # im2col patch, L1
                pltpu.VMEM((H + 2, W + 16, cmid), jnp.float32),  # padded act, L2
                pltpu.VMEM((H, W, K2), jnp.float32),             # im2col patch, L2
            ],
        ),
        compiler_params=pltpu.CompilerParams(
            dimension_semantics=("parallel",),
            vmem_limit_bytes=int(vmem_limit),
        ),
    )(x_nhwc, w1p, b1r, w2p, b2r)

    out_nhwc = out_flat[:, :, :cout].reshape(N, H, W, cout)   # drop lane padding
    return jnp.transpose(out_nhwc, (0, 3, 1, 2))              # NHWC -> NCHW


def _reference_forward(x_nchw, params):
    x = jnp.transpose(x_nchw, (0, 2, 3, 1))
    for (w, b) in params:
        x = lax.conv_general_dilated(
            x, w, window_strides=(1, 1), padding="SAME",
            dimension_numbers=("NHWC", "HWIO", "NHWC"))
        x = jnp.maximum(x + b[None, None, None, :], 0.0)
    return jnp.transpose(x, (0, 3, 1, 2))


if __name__ == "__main__":
    key = jax.random.PRNGKey(0)
    k_x, k_l1, k_l2 = jax.random.split(key, 3)

    N, Cin, H, W = 2, 4, 16, 16
    Cmid, Cout = 8, 4

    x = jax.random.normal(k_x, (N, Cin, H, W), dtype=jnp.float32)
    params = [
        init_conv_params(k_l1, Cin, Cmid),
        init_conv_params(k_l2, Cmid, Cout),
    ]

    ref = jax.block_until_ready(_reference_forward(x, params))

    # f32 MXU path (strict check).
    out = jax.block_until_ready(sliced_block_forward(x, params))
    assert out.shape == (N, Cout, H, W)
    assert jnp.allclose(out, ref, atol=1e-3, rtol=1e-3), "f32 mismatch vs reference"

    # bf16 MXU-operand path (operands rounded to bf16 -> looser tolerance).
    out_bf16 = jax.block_until_ready(
        sliced_block_forward(x, params, mxu_dtype=jnp.bfloat16))
    assert out_bf16.shape == (N, Cout, H, W)
    assert jnp.allclose(out_bf16, ref, atol=5e-2, rtol=5e-2), "bf16 mismatch vs reference"

    print("KERNEL_OK")
</pallas_src>

<mosaic_0001>
module attributes {stable_mosaic.version = 11 : i64} {
  func.func @_fused_block_kernel(%arg0: i32, %arg1: memref<1x16x16x4xf32, #tpu.memory_space<vmem>>, %arg2: memref<128x128xf32, #tpu.memory_space<vmem>>, %arg3: memref<1x128xf32, #tpu.memory_space<vmem>>, %arg4: memref<128x128xf32, #tpu.memory_space<vmem>>, %arg5: memref<1x128xf32, #tpu.memory_space<vmem>>, %arg6: memref<1x256x128xf32, #tpu.memory_space<vmem>>, %arg7: memref<18x32x4xf32, #tpu.memory_space<vmem>>, %arg8: memref<16x16x128xf32, #tpu.memory_space<vmem>>, %arg9: memref<18x32x8xf32, #tpu.memory_space<vmem>>, %arg10: memref<16x16x128xf32, #tpu.memory_space<vmem>>) attributes {dimension_semantics = [#tpu.dimension_semantics<parallel>], iteration_bounds = array<i64: 2>, scalar_prefetch = 0 : i64, scratch_operands = 4 : i64, tpu.core_type = #tpu.core_type<tc>, window_params = [{transform_indices = @transform_0, window_bounds = array<i64: 1, 16, 16, 4>}, {pipeline_mode = #tpu.pipeline_mode<synchronous>, transform_indices = @transform_1, window_bounds = array<i64: 128, 128>}, {pipeline_mode = #tpu.pipeline_mode<synchronous>, transform_indices = @transform_2, window_bounds = array<i64: 1, 128>}, {pipeline_mode = #tpu.pipeline_mode<synchronous>, transform_indices = @transform_3, window_bounds = array<i64: 128, 128>}, {pipeline_mode = #tpu.pipeline_mode<synchronous>, transform_indices = @transform_4, window_bounds = array<i64: 1, 128>}, {transform_indices = @transform_5, window_bounds = array<i64: 1, 256, 128>}]} {
    %c0 = arith.constant 0 : index
    %c0_0 = arith.constant 0 : index
    %c0_1 = arith.constant 0 : index
    %c0_2 = arith.constant 0 : index
    %0 = vector.load %arg1[%c0, %c0_0, %c0_1, %c0_2] : memref<1x16x16x4xf32, #tpu.memory_space<vmem>>, vector<1x16x16x4xf32>
    %1 = vector.shape_cast %0 : vector<1x16x16x4xf32> to vector<16x16x4xf32>
    %c1 = arith.constant 1 : index
    %c8 = arith.constant 8 : index
    %c0_3 = arith.constant 0 : index
    %2 = vector.load %arg7[%c1, %c8, %c0_3] : memref<18x32x4xf32, #tpu.memory_space<vmem>>, vector<16x16x4xf32>
    tpu.vector_store %arg7[%c1, %c8, %c0_3], %1 {strides = array<i32>} : memref<18x32x4xf32, #tpu.memory_space<vmem>>, vector<16x16x4xf32>,
    %cst = arith.constant 0.000000e+00 : f32
    %3 = vector.broadcast %cst : f32 to vector<1x18x4xf32>
    %c0_4 = arith.constant 0 : index
    %c7 = arith.constant 7 : index
    %c0_5 = arith.constant 0 : index
    %4 = vector.load %arg7[%c0_4, %c7, %c0_5] : memref<18x32x4xf32, #tpu.memory_space<vmem>>, vector<1x18x4xf32>
    tpu.vector_store %arg7[%c0_4, %c7, %c0_5], %3 {strides = array<i32>} : memref<18x32x4xf32, #tpu.memory_space<vmem>>, vector<1x18x4xf32>,
    %c17 = arith.constant 17 : index
    %c7_6 = arith.constant 7 : index
    %c0_7 = arith.constant 0 : index
    %5 = vector.load %arg7[%c17, %c7_6, %c0_7] : memref<18x32x4xf32, #tpu.memory_space<vmem>>, vector<1x18x4xf32>
    tpu.vector_store %arg7[%c17, %c7_6, %c0_7], %3 {strides = array<i32>} : memref<18x32x4xf32, #tpu.memory_space<vmem>>, vector<1x18x4xf32>,
    %cst_8 = arith.constant 0.000000e+00 : f32
    %6 = vector.broadcast %cst_8 : f32 to vector<16x1x4xf32>
    %c1_9 = arith.constant 1 : index
    %c7_10 = arith.constant 7 : index
    %c0_11 = arith.constant 0 : index
    %7 = vector.load %arg7[%c1_9, %c7_10, %c0_11] : memref<18x32x4xf32, #tpu.memory_space<vmem>>, vector<16x1x4xf32>
    tpu.vector_store %arg7[%c1_9, %c7_10, %c0_11], %6 {strides = array<i32>} : memref<18x32x4xf32, #tpu.memory_space<vmem>>, vector<16x1x4xf32>,
    %c1_12 = arith.constant 1 : index
    %c24 = arith.constant 24 : index
    %c0_13 = arith.constant 0 : index
    %8 = vector.load %arg7[%c1_12, %c24, %c0_13] : memref<18x32x4xf32, #tpu.memory_space<vmem>>, vector<16x1x4xf32>
    tpu.vector_store %arg7[%c1_12, %c24, %c0_13], %6 {strides = array<i32>} : memref<18x32x4xf32, #tpu.memory_space<vmem>>, vector<16x1x4xf32>,
    %c0_14 = arith.constant 0 : index
    %c7_15 = arith.constant 7 : index
    %c0_16 = arith.constant 0 : index
    %9 = vector.load %arg7[%c0_14, %c7_15, %c0_16] : memref<18x32x4xf32, #tpu.memory_space<vmem>>, vector<16x16x4xf32>
    %c0_17 = arith.constant 0 : index
    %c0_18 = arith.constant 0 : index
    %c0_19 = arith.constant 0 : index
    %10 = vector.load %arg8[%c0_17, %c0_18, %c0_19] : memref<16x16x128xf32, #tpu.memory_space<vmem>>, vector<16x16x4xf32>
    tpu.vector_store %arg8[%c0_17, %c0_18, %c0_19], %9 {strides = array<i32>} : memref<16x16x128xf32, #tpu.memory_space<vmem>>, vector<16x16x4xf32>,
    %c0_20 = arith.constant 0 : index
    %c8_21 = arith.constant 8 : index
    %c0_22 = arith.constant 0 : index
    %11 = vector.load %arg7[%c0_20, %c8_21, %c0_22] : memref<18x32x4xf32, #tpu.memory_space<vmem>>, vector<16x16x4xf32>
    %c0_23 = arith.constant 0 : index
    %c0_24 = arith.constant 0 : index
    %c4 = arith.constant 4 : index
    %12 = vector.load %arg8[%c0_23, %c0_24, %c4] : memref<16x16x128xf32, #tpu.memory_space<vmem>>, vector<16x16x4xf32>
    tpu.vector_store %arg8[%c0_23, %c0_24, %c4], %11 {strides = array<i32>} : memref<16x16x128xf32, #tpu.memory_space<vmem>>, vector<16x16x4xf32>,
    %c0_25 = arith.constant 0 : index
    %c9 = arith.constant 9 : index
    %c0_26 = arith.constant 0 : index
    %13 = vector.load %arg7[%c0_25, %c9, %c0_26] : memref<18x32x4xf32, #tpu.memory_space<vmem>>, vector<16x16x4xf32>
    %c0_27 = arith.constant 0 : index
    %c0_28 = arith.constant 0 : index
    %c8_29 = arith.constant 8 : index
    %14 = vector.load %arg8[%c0_27, %c0_28, %c8_29] : memref<16x16x128xf32, #tpu.memory_space<vmem>>, vector<16x16x4xf32>
    tpu.vector_store %arg8[%c0_27, %c0_28, %c8_29], %13 {strides = array<i32>} : memref<16x16x128xf32, #tpu.memory_space<vmem>>, vector<16x16x4xf32>,
    %c1_30 = arith.constant 1 : index
    %c7_31 = arith.constant 7 : index
    %c0_32 = arith.constant 0 : index
    %15 = vector.load %arg7[%c1_30, %c7_31, %c0_32] : memref<18x32x4xf32, #tpu.memory_space<vmem>>, vector<16x16x4xf32>
    %c0_33 = arith.constant 0 : index
    %c0_34 = arith.constant 0 : index
    %c12 = arith.constant 12 : index
    %16 = vector.load %arg8[%c0_33, %c0_34, %c12] : memref<16x16x128xf32, #tpu.memory_space<vmem>>, vector<16x16x4xf32>
    tpu.vector_store %arg8[%c0_33, %c0_34, %c12], %15 {strides = array<i32>} : memref<16x16x128xf32, #tpu.memory_space<vmem>>, vector<16x16x4xf32>,
    %c1_35 = arith.constant 1 : index
    %c8_36 = arith.constant 8 : index
    %c0_37 = arith.constant 0 : index
    %17 = vector.load %arg7[%c1_35, %c8_36, %c0_37] : memref<18x32x4xf32, #tpu.memory_space<vmem>>, vector<16x16x4xf32>
    %c0_38 = arith.constant 0 : index
    %c0_39 = arith.constant 0 : index
    %c16 = arith.constant 16 : index
    %18 = vector.load %arg8[%c0_38, %c0_39, %c16] : memref<16x16x128xf32, #tpu.memory_space<vmem>>, vector<16x16x4xf32>
    tpu.vector_store %arg8[%c0_38, %c0_39, %c16], %17 {strides = array<i32>} : memref<16x16x128xf32, #tpu.memory_space<vmem>>, vector<16x16x4xf32>,
    %c1_40 = arith.constant 1 : index
    %c9_41 = arith.constant 9 : index
    %c0_42 = arith.constant 0 : index
    %19 = vector.load %arg7[%c1_40, %c9_41, %c0_42] : memref<18x32x4xf32, #tpu.memory_space<vmem>>, vector<16x16x4xf32>
    %c0_43 = arith.constant 0 : index
    %c0_44 = arith.constant 0 : index
    %c20 = arith.constant 20 : index
    %20 = vector.load %arg8[%c0_43, %c0_44, %c20] : memref<16x16x128xf32, #tpu.memory_space<vmem>>, vector<16x16x4xf32>
    tpu.vector_store %arg8[%c0_43, %c0_44, %c20], %19 {strides = array<i32>} : memref<16x16x128xf32, #tpu.memory_space<vmem>>, vector<16x16x4xf32>,
    %c2 = arith.constant 2 : index
    %c7_45 = arith.constant 7 : index
    %c0_46 = arith.constant 0 : index
    %21 = vector.load %arg7[%c2, %c7_45, %c0_46] : memref<18x32x4xf32, #tpu.memory_space<vmem>>, vector<16x16x4xf32>
    %c0_47 = arith.constant 0 : index
    %c0_48 = arith.constant 0 : index
    %c24_49 = arith.constant 24 : index
    %22 = vector.load %arg8[%c0_47, %c0_48, %c24_49] : memref<16x16x128xf32, #tpu.memory_space<vmem>>, vector<16x16x4xf32>
    tpu.vector_store %arg8[%c0_47, %c0_48, %c24_49], %21 {strides = array<i32>} : memref<16x16x128xf32, #tpu.memory_space<vmem>>, vector<16x16x4xf32>,
    %c2_50 = arith.constant 2 : index
    %c8_51 = arith.constant 8 : index
    %c0_52 = arith.constant 0 : index
    %23 = vector.load %arg7[%c2_50, %c8_51, %c0_52] : memref<18x32x4xf32, #tpu.memory_space<vmem>>, vector<16x16x4xf32>
    %c0_53 = arith.constant 0 : index
    %c0_54 = arith.constant 0 : index
    %c28 = arith.constant 28 : index
    %24 = vector.load %arg8[%c0_53, %c0_54, %c28] : memref<16x16x128xf32, #tpu.memory_space<vmem>>, vector<16x16x4xf32>
    tpu.vector_store %arg8[%c0_53, %c0_54, %c28], %23 {strides = array<i32>} : memref<16x16x128xf32, #tpu.memory_space<vmem>>, vector<16x16x4xf32>,
    %c2_55 = arith.constant 2 : index
    %c9_56 = arith.constant 9 : index
    %c0_57 = arith.constant 0 : index
    %25 = vector.load %arg7[%c2_55, %c9_56, %c0_57] : memref<18x32x4xf32, #tpu.memory_space<vmem>>, vector<16x16x4xf32>
    %c0_58 = arith.constant 0 : index
    %c0_59 = arith.constant 0 : index
    %c32 = arith.constant 32 : index
    %26 = vector.load %arg8[%c0_58, %c0_59, %c32] : memref<16x16x128xf32, #tpu.memory_space<vmem>>, vector<16x16x4xf32>
    tpu.vector_store %arg8[%c0_58, %c0_59, %c32], %25 {strides = array<i32>} : memref<16x16x128xf32, #tpu.memory_space<vmem>>, vector<16x16x4xf32>,
    %cst_60 = arith.constant 0.000000e+00 : f32
    %27 = vector.broadcast %cst_60 : f32 to vector<16x16x92xf32>
    %c0_61 = arith.constant 0 : index
    %c0_62 = arith.constant 0 : index
    %c36 = arith.constant 36 : index
    %28 = vector.load %arg8[%c0_61, %c0_62, %c36] : memref<16x16x128xf32, #tpu.memory_space<vmem>>, vector<16x16x92xf32>
    tpu.vector_store %arg8[%c0_61, %c0_62, %c36], %27 {strides = array<i32>} : memref<16x16x128xf32, #tpu.memory_space<vmem>>, vector<16x16x92xf32>,
    %c0_63 = arith.constant 0 : index
    %c0_64 = arith.constant 0 : index
    %c0_65 = arith.constant 0 : index
    %29 = vector.load %arg8[%c0_63, %c0_64, %c0_65] : memref<16x16x128xf32, #tpu.memory_space<vmem>>, vector<16x16x128xf32>
    %30 = vector.shape_cast %29 : vector<16x16x128xf32> to vector<256x128xf32>
    %c0_66 = arith.constant 0 : index
    %c0_67 = arith.constant 0 : index
    %31 = vector.load %arg2[%c0_66, %c0_67] : memref<128x128xf32, #tpu.memory_space<vmem>>, vector<128x128xf32>
    %cst_68 = arith.constant dense<0.000000e+00> : vector<256x128xf32>
    %32 = tpu.matmul %30, %31, %cst_68 {dimension_numbers = #tpu.dot_dimension_numbers<[1], [0], [0], [1], [0, 0, 1, 1], [], []>} : vector<256x128xf32>, vector<128x128xf32>, vector<256x128xf32> -> vector<256x128xf32>
    %c0_69 = arith.constant 0 : index
    %c0_70 = arith.constant 0 : index
    %33 = vector.load %arg3[%c0_69, %c0_70] : memref<1x128xf32, #tpu.memory_space<vmem>>, vector<1x128xf32>
    %34 = vector.broadcast %33 : vector<1x128xf32> to vector<256x128xf32>
    %35 = arith.addf %32, %34 : vector<256x128xf32>
    %cst_71 = arith.constant 0.000000e+00 : f32
    %36 = vector.broadcast %cst_71 : f32 to vector<256x128xf32>
    %37 = arith.maximumf %35, %36 : vector<256x128xf32>
    %38 = vector.extract_strided_slice %37 {offsets = [0, 0], sizes = [256, 8], strides = [1, 1]} : vector<256x128xf32> to vector<256x8xf32>
    %39 = vector.shape_cast %38 : vector<256x8xf32> to vector<16x16x8xf32>
    %c1_72 = arith.constant 1 : index
    %c8_73 = arith.constant 8 : index
    %c0_74 = arith.constant 0 : index
    %40 = vector.load %arg9[%c1_72, %c8_73, %c0_74] : memref<18x32x8xf32, #tpu.memory_space<vmem>>, vector<16x16x8xf32>
    tpu.vector_store %arg9[%c1_72, %c8_73, %c0_74], %39 {strides = array<i32>} : memref<18x32x8xf32, #tpu.memory_space<vmem>>, vector<16x16x8xf32>,
    %cst_75 = arith.constant 0.000000e+00 : f32
    %41 = vector.broadcast %cst_75 : f32 to vector<1x18x8xf32>
    %c0_76 = arith.constant 0 : index
    %c7_77 = arith.constant 7 : index
    %c0_78 = arith.constant 0 : index
    %42 = vector.load %arg9[%c0_76, %c7_77, %c0_78] : memref<18x32x8xf32, #tpu.memory_space<vmem>>, vector<1x18x8xf32>
    tpu.vector_store %arg9[%c0_76, %c7_77, %c0_78], %41 {strides = array<i32>} : memref<18x32x8xf32, #tpu.memory_space<vmem>>, vector<1x18x8xf32>,
    %c17_79 = arith.constant 17 : index
    %c7_80 = arith.constant 7 : index
    %c0_81 = arith.constant 0 : index
    %43 = vector.load %arg9[%c17_79, %c7_80, %c0_81] : memref<18x32x8xf32, #tpu.memory_space<vmem>>, vector<1x18x8xf32>
    tpu.vector_store %arg9[%c17_79, %c7_80, %c0_81], %41 {strides = array<i32>} : memref<18x32x8xf32, #tpu.memory_space<vmem>>, vector<1x18x8xf32>,
    %cst_82 = arith.constant 0.000000e+00 : f32
    %44 = vector.broadcast %cst_82 : f32 to vector<16x1x8xf32>
    %c1_83 = arith.constant 1 : index
    %c7_84 = arith.constant 7 : index
    %c0_85 = arith.constant 0 : index
    %45 = vector.load %arg9[%c1_83, %c7_84, %c0_85] : memref<18x32x8xf32, #tpu.memory_space<vmem>>, vector<16x1x8xf32>
    tpu.vector_store %arg9[%c1_83, %c7_84, %c0_85], %44 {strides = array<i32>} : memref<18x32x8xf32, #tpu.memory_space<vmem>>, vector<16x1x8xf32>,
    %c1_86 = arith.constant 1 : index
    %c24_87 = arith.constant 24 : index
    %c0_88 = arith.constant 0 : index
    %46 = vector.load %arg9[%c1_86, %c24_87, %c0_88] : memref<18x32x8xf32, #tpu.memory_space<vmem>>, vector<16x1x8xf32>
    tpu.vector_store %arg9[%c1_86, %c24_87, %c0_88], %44 {strides = array<i32>} : memref<18x32x8xf32, #tpu.memory_space<vmem>>, vector<16x1x8xf32>,
    %c0_89 = arith.constant 0 : index
    %c7_90 = arith.constant 7 : index
    %c0_91 = arith.constant 0 : index
    %47 = vector.load %arg9[%c0_89, %c7_90, %c0_91] : memref<18x32x8xf32, #tpu.memory_space<vmem>>, vector<16x16x8xf32>
    %c0_92 = arith.constant 0 : index
    %c0_93 = arith.constant 0 : index
    %c0_94 = arith.constant 0 : index
    %48 = vector.load %arg10[%c0_92, %c0_93, %c0_94] : memref<16x16x128xf32, #tpu.memory_space<vmem>>, vector<16x16x8xf32>
    tpu.vector_store %arg10[%c0_92, %c0_93, %c0_94], %47 {strides = array<i32>} : memref<16x16x128xf32, #tpu.memory_space<vmem>>, vector<16x16x8xf32>,
    %c0_95 = arith.constant 0 : index
    %c8_96 = arith.constant 8 : index
    %c0_97 = arith.constant 0 : index
    %49 = vector.load %arg9[%c0_95, %c8_96, %c0_97] : memref<18x32x8xf32, #tpu.memory_space<vmem>>, vector<16x16x8xf32>
    %c0_98 = arith.constant 0 : index
    %c0_99 = arith.constant 0 : index
    %c8_100 = arith.constant 8 : index
    %50 = vector.load %arg10[%c0_98, %c0_99, %c8_100] : memref<16x16x128xf32, #tpu.memory_space<vmem>>, vector<16x16x8xf32>
    tpu.vector_store %arg10[%c0_98, %c0_99, %c8_100], %49 {strides = array<i32>} : memref<16x16x128xf32, #tpu.memory_space<vmem>>, vector<16x16x8xf32>,
    %c0_101 = arith.constant 0 : index
    %c9_102 = arith.constant 9 : index
    %c0_103 = arith.constant 0 : index
    %51 = vector.load %arg9[%c0_101, %c9_102, %c0_103] : memref<18x32x8xf32, #tpu.memory_space<vmem>>, vector<16x16x8xf32>
    %c0_104 = arith.constant 0 : index
    %c0_105 = arith.constant 0 : index
    %c16_106 = arith.constant 16 : index
    %52 = vector.load %arg10[%c0_104, %c0_105, %c16_106] : memref<16x16x128xf32, #tpu.memory_space<vmem>>, vector<16x16x8xf32>
    tpu.vector_store %arg10[%c0_104, %c0_105, %c16_106], %51 {strides = array<i32>} : memref<16x16x128xf32, #tpu.memory_space<vmem>>, vector<16x16x8xf32>,
    %c1_107 = arith.constant 1 : index
    %c7_108 = arith.constant 7 : index
    %c0_109 = arith.constant 0 : index
    %53 = vector.load %arg9[%c1_107, %c7_108, %c0_109] : memref<18x32x8xf32, #tpu.memory_space<vmem>>, vector<16x16x8xf32>
    %c0_110 = arith.constant 0 : index
    %c0_111 = arith.constant 0 : index
    %c24_112 = arith.constant 24 : index
    %54 = vector.load %arg10[%c0_110, %c0_111, %c24_112] : memref<16x16x128xf32, #tpu.memory_space<vmem>>, vector<16x16x8xf32>
    tpu.vector_store %arg10[%c0_110, %c0_111, %c24_112], %53 {strides = array<i32>} : memref<16x16x128xf32, #tpu.memory_space<vmem>>, vector<16x16x8xf32>,
    %c1_113 = arith.constant 1 : index
    %c8_114 = arith.constant 8 : index
    %c0_115 = arith.constant 0 : index
    %55 = vector.load %arg9[%c1_113, %c8_114, %c0_115] : memref<18x32x8xf32, #tpu.memory_space<vmem>>, vector<16x16x8xf32>
    %c0_116 = arith.constant 0 : index
    %c0_117 = arith.constant 0 : index
    %c32_118 = arith.constant 32 : index
    %56 = vector.load %arg10[%c0_116, %c0_117, %c32_118] : memref<16x16x128xf32, #tpu.memory_space<vmem>>, vector<16x16x8xf32>
    tpu.vector_store %arg10[%c0_116, %c0_117, %c32_118], %55 {strides = array<i32>} : memref<16x16x128xf32, #tpu.memory_space<vmem>>, vector<16x16x8xf32>,
    %c1_119 = arith.constant 1 : index
    %c9_120 = arith.constant 9 : index
    %c0_121 = arith.constant 0 : index
    %57 = vector.load %arg9[%c1_119, %c9_120, %c0_121] : memref<18x32x8xf32, #tpu.memory_space<vmem>>, vector<16x16x8xf32>
    %c0_122 = arith.constant 0 : index
    %c0_123 = arith.constant 0 : index
    %c40 = arith.constant 40 : index
    %58 = vector.load %arg10[%c0_122, %c0_123, %c40] : memref<16x16x128xf32, #tpu.memory_space<vmem>>, vector<16x16x8xf32>
    tpu.vector_store %arg10[%c0_122, %c0_123, %c40], %57 {strides = array<i32>} : memref<16x16x128xf32, #tpu.memory_space<vmem>>, vector<16x16x8xf32>,
    %c2_124 = arith.constant 2 : index
    %c7_125 = arith.constant 7 : index
    %c0_126 = arith.constant 0 : index
    %59 = vector.load %arg9[%c2_124, %c7_125, %c0_126] : memref<18x32x8xf32, #tpu.memory_space<vmem>>, vector<16x16x8xf32>
    %c0_127 = arith.constant 0 : index
    %c0_128 = arith.constant 0 : index
    %c48 = arith.constant 48 : index
    %60 = vector.load %arg10[%c0_127, %c0_128, %c48] : memref<16x16x128xf32, #tpu.memory_space<vmem>>, vector<16x16x8xf32>
    tpu.vector_store %arg10[%c0_127, %c0_128, %c48], %59 {strides = array<i32>} : memref<16x16x128xf32, #tpu.memory_space<vmem>>, vector<16x16x8xf32>,
    %c2_129 = arith.constant 2 : index
    %c8_130 = arith.constant 8 : index
    %c0_131 = arith.constant 0 : index
    %61 = vector.load %arg9[%c2_129, %c8_130, %c0_131] : memref<18x32x8xf32, #tpu.memory_space<vmem>>, vector<16x16x8xf32>
    %c0_132 = arith.constant 0 : index
    %c0_133 = arith.constant 0 : index
    %c56 = arith.constant 56 : index
    %62 = vector.load %arg10[%c0_132, %c0_133, %c56] : memref<16x16x128xf32, #tpu.memory_space<vmem>>, vector<16x16x8xf32>
    tpu.vector_store %arg10[%c0_132, %c0_133, %c56], %61 {strides = array<i32>} : memref<16x16x128xf32, #tpu.memory_space<vmem>>, vector<16x16x8xf32>,
    %c2_134 = arith.constant 2 : index
    %c9_135 = arith.constant 9 : index
    %c0_136 = arith.constant 0 : index
    %63 = vector.load %arg9[%c2_134, %c9_135, %c0_136] : memref<18x32x8xf32, #tpu.memory_space<vmem>>, vector<16x16x8xf32>
    %c0_137 = arith.constant 0 : index
    %c0_138 = arith.constant 0 : index
    %c64 = arith.constant 64 : index
    %64 = vector.load %arg10[%c0_137, %c0_138, %c64] : memref<16x16x128xf32, #tpu.memory_space<vmem>>, vector<16x16x8xf32>
    tpu.vector_store %arg10[%c0_137, %c0_138, %c64], %63 {strides = array<i32>} : memref<16x16x128xf32, #tpu.memory_space<vmem>>, vector<16x16x8xf32>,
    %cst_139 = arith.constant 0.000000e+00 : f32
    %65 = vector.broadcast %cst_139 : f32 to vector<16x16x56xf32>
    %c0_140 = arith.constant 0 : index
    %c0_141 = arith.constant 0 : index
    %c72 = arith.constant 72 : index
    %66 = vector.load %arg10[%c0_140, %c0_141, %c72] : memref<16x16x128xf32, #tpu.memory_space<vmem>>, vector<16x16x56xf32>
    tpu.vector_store %arg10[%c0_140, %c0_141, %c72], %65 {strides = array<i32>} : memref<16x16x128xf32, #tpu.memory_space<vmem>>, vector<16x16x56xf32>,
    %c0_142 = arith.constant 0 : index
    %c0_143 = arith.constant 0 : index
    %c0_144 = arith.constant 0 : index
    %67 = vector.load %arg10[%c0_142, %c0_143, %c0_144] : memref<16x16x128xf32, #tpu.memory_space<vmem>>, vector<16x16x128xf32>
    %68 = vector.shape_cast %67 : vector<16x16x128xf32> to vector<256x128xf32>
    %c0_145 = arith.constant 0 : index
    %c0_146 = arith.constant 0 : index
    %69 = vector.load %arg4[%c0_145, %c0_146] : memref<128x128xf32, #tpu.memory_space<vmem>>, vector<128x128xf32>
    %cst_147 = arith.constant dense<0.000000e+00> : vector<256x128xf32>
    %70 = tpu.matmul %68, %69, %cst_147 {dimension_numbers = #tpu.dot_dimension_numbers<[1], [0], [0], [1], [0, 0, 1, 1], [], []>} : vector<256x128xf32>, vector<128x128xf32>, vector<256x128xf32> -> vector<256x128xf32>
    %c0_148 = arith.constant 0 : index
    %c0_149 = arith.constant 0 : index
    %71 = vector.load %arg5[%c0_148, %c0_149] : memref<1x128xf32, #tpu.memory_space<vmem>>, vector<1x128xf32>
    %72 = vector.broadcast %71 : vector<1x128xf32> to vector<256x128xf32>
    %73 = arith.addf %70, %72 : vector<256x128xf32>
    %cst_150 = arith.constant 0.000000e+00 : f32
    %74 = vector.broadcast %cst_150 : f32 to vector<256x128xf32>
    %75 = arith.maximumf %73, %74 : vector<256x128xf32>
    %c0_151 = arith.constant 0 : index
    %c0_152 = arith.constant 0 : index
    %c0_153 = arith.constant 0 : index
    %76 = vector.load %arg6[%c0_151, %c0_152, %c0_153] : memref<1x256x128xf32, #tpu.memory_space<vmem>>, vector<1x256x128xf32>
    %77 = vector.shape_cast %76 : vector<1x256x128xf32> to vector<256x128xf32>
    %78 = vector.shape_cast %75 : vector<256x128xf32> to vector<1x256x128xf32>
    tpu.vector_store %arg6[%c0_151, %c0_152, %c0_153], %78 {strides = array<i32>} : memref<1x256x128xf32, #tpu.memory_space<vmem>>, vector<1x256x128xf32>,
    return
  }
  func.func @transform_0(%arg0: i32) -> (i32, i32, i32, i32) {
    %c0_i32 = arith.constant 0 : i32
    %c0_i32_0 = arith.constant 0 : i32
    %c0_i32_1 = arith.constant 0 : i32
    %c0_i32_2 = arith.constant 0 : i32
    return %arg0, %c0_i32, %c0_i32_0, %c0_i32_1 : i32, i32, i32, i32
  }
  func.func @transform_1(%arg0: i32) -> (i32, i32) {
    %c0_i32 = arith.constant 0 : i32
    %c0_i32_0 = arith.constant 0 : i32
    %c0_i32_1 = arith.constant 0 : i32
    return %c0_i32, %c0_i32_0 : i32, i32
  }
  func.func @transform_2(%arg0: i32) -> (i32, i32) {
    %c0_i32 = arith.constant 0 : i32
    %c0_i32_0 = arith.constant 0 : i32
    %c0_i32_1 = arith.constant 0 : i32
    return %c0_i32, %c0_i32_0 : i32, i32
  }
  func.func @transform_3(%arg0: i32) -> (i32, i32) {
    %c0_i32 = arith.constant 0 : i32
    %c0_i32_0 = arith.constant 0 : i32
    %c0_i32_1 = arith.constant 0 : i32
    return %c0_i32, %c0_i32_0 : i32, i32
  }
  func.func @transform_4(%arg0: i32) -> (i32, i32) {
    %c0_i32 = arith.constant 0 : i32
    %c0_i32_0 = arith.constant 0 : i32
    %c0_i32_1 = arith.constant 0 : i32
    return %c0_i32, %c0_i32_0 : i32, i32
  }
  func.func @transform_5(%arg0: i32) -> (i32, i32, i32) {
    %c0_i32 = arith.constant 0 : i32
    %c0_i32_0 = arith.constant 0 : i32
    %c0_i32_1 = arith.constant 0 : i32
    return %arg0, %c0_i32, %c0_i32_0 : i32, i32, i32
  }
}

</mosaic_0001>

<bundles_post_ra>
// kernel: tpu_custom_call.1
= control target key start
LH: loop header
LB: loop body
LE: loop exit
PB: predicated region body
PF: predicated region fallthrough
CT: control target
= control target key end

     0   :  { %10 = vsyncpa [#allocation7], 0  ;;  %s7348_s0 = inlined_call_operand.vmem [shape: f32[2,16,16,4], index: 0, kind: input, shape index: {}]   ;;  %s7349_s1 = inlined_call_operand.vmem [shape: f32[128,128], index: 1, kind: input, shape index: {}]   ;;  %s7350_s2 = inlined_call_operand.vmem [shape: f32[1,128], index: 2, kind: input, shape index: {}]   ;;  %s7351_s3 = inlined_call_operand.vmem [shape: f32[128,128], index: 3, kind: input, shape index: {}]   ;;  %s7352_s4 = inlined_call_operand.vmem [shape: f32[1,128], index: 4, kind: input, shape index: {}]   ;;  %s7353_s5 = inlined_call_operand.hbm [shape: f32[2,256,128], index: 5, kind: output, shape index: {}]  }
   0x1   :  { %12 = vsyncpa [#allocation7 + $0x1], 0  ;;  %s4920_s18 = smov 0   ;;  %s4922_s19 = smov 0  }
   0x2   :  { %s4924_s20 = smov 0   ;;  %s4926_s21 = smov 0  }
   0x3 LB: > { %s4941_s22 = sadd.s32 4294967295, %s4873_s21   ;;  %s4421_s23 = sadd.s32 4294967294, %s4873_s21   ;;  %s4873_s21 = sphi %s4926_s21, %s7452_s21   ;;  %s4869_s20 = sphi %s4924_s20, %s7451_s20   ;;  %s4865_s19 = sphi %s4922_s19, %s7450_s19   ;;  %s4861_s18 = sphi %s4920_s18, %s7449_s18  }
   0x4   : > { %s4945_s24 = sadd.s32 1, %s4873_s21   ;;  %s135_s25 = sadd.s32 1, %s4869_s20 }
   0x5   : > { %s132_s26 = ssub.s32 %s4873_s21, %s4945_s24  ;;  %p145_p0 = scmp.ne.s32.totalorder %s4869_s20, %s4865_s19 }
   0x6   : > { %p133_p1 = scmp.eq.s32.totalorder %s132_s26, 0  ;;  %p146_p2 = scmp.eq.s32.totalorder %s4941_s22, 1 }
   0x7   : > { %p151_p3 = scmp.ne.s32.totalorder %s4865_s19, %s4861_s18  ;;  %p152_p4 = scmp.eq.s32.totalorder %s4421_s23, 1 }
   0x8   : > { %s4956_s27 = scalar_select %p133_p1, %s4869_s20, %s135_s25  }
   0x9   : > { %p4958_p5 = por %p146_p2, %p145_p0  ;;  %p4962_p6 = por %p152_p4, %p151_p3 }
   0xa   : > { %p4424_p7 = scmp.ge.s32.totalorder %s4873_s21, 1  ;;  %p190_p8 = scmp.lt.s32.totalorder %s4873_s21, 3 }
   0xc   : > { %p191_p9 = pnand %p4424_p7, %p190_p8 }
   0xe   : > { %194 = sbr.rel (%p191_p9) target bundleno = 1699 (0x6a3), region = 40 }
  0x15   : > { %vm256_vm0 = vcmask 31744   ;;  %p218_p10 = scmp.lt.s32.totalorder %s4941_s22, 1  ;;  %vm291_vm1 = vcmask 25600   ;;  %vm297_vm2 = vcmask 24576   ;;  %v7354_v0 = vmov 0.0   ;;  %s4876_s10 = smov 4  }
  0x16   : > { %289 = vst.msk [vmem:[#allocation2 + $0x7] sm:$0xff] %vm256_vm0, %v7354_v0  ;;  %290 = vst.msk [vmem:[#allocation2 + $0xf] sm:$0xff] %vm256_vm0, %v7354_v0  ;;  %s4877_s11 = smov 8   ;;  %vm554_vm3 = vcmask 64544   ;;  %s4878_s12 = smov 12   ;;  %vm747_vm4 = vcmask 97344  }
  0x17   : > { %294 = vst.msk [vmem:[#allocation2 + $0x227] sm:$0xff] %vm256_vm0, %v7354_v0  ;;  %295 = vst.msk [vmem:[#allocation2 + $0x22f] sm:$0xff] %vm256_vm0, %v7354_v0  ;;  %s219_s30 = scalar_select %p218_p10, %s4941_s22, 1  ;;  %vm940_vm5 = vcmask 130144   ;;  %vm1133_vm6 = vcmask 162944   ;;  %vm1326_vm7 = vcmask 195744  }
  0x18   : > { %292 = vst.msk [vmem:[#allocation2 + $0x17] sm:$0x3] %vm291_vm1, %v7354_v0  ;;  %296 = vst.msk [vmem:[#allocation2 + $0x237] sm:$0x3] %vm291_vm1, %v7354_v0  ;;  %s4879_s13 = smov 16   ;;  %s4880_s14 = smov 20  }
  0x19   : > { %314 = vst.msk [vmem:[#allocation2 + $0x38] sm:$0x1] %vm297_vm2, %v7354_v0  ;;  %298 = vst.msk [vmem:[#allocation2 + $0x27] sm:$0x1] %vm297_vm2, %v7354_v0  ;;  %s4435_s6 = sshll.u32 %s219_s30, 8  ;;  %s4881_s15 = smov 24  }
  0x1a   : > { %299 = vst.msk [vmem:[#allocation2 + $0x47] sm:$0x1] %vm297_vm2, %v7354_v0  ;;  %300 = vst.msk [vmem:[#allocation2 + $0x67] sm:$0x1] %vm297_vm2, %v7354_v0  ;;  %s5049_s9 = scalar_lea.vmem %s7348_s0, %s4435_s6  ;;  %s4882_s16 = smov 28   ;;  %vm1520_vm8 = vcmask 228544  }
  0x1b   : > { %301 = vst.msk [vmem:[#allocation2 + $0x87] sm:$0x1] %vm297_vm2, %v7354_v0  ;;  %302 = vst.msk [vmem:[#allocation2 + $0xa7] sm:$0x1] %vm297_vm2, %v7354_v0  ;;  %v223_v1 = vld [vmem:[%s5049_s9] sm:$0xff]  ;;  %v224_v2 = vld [vmem:[%s5049_s9 + $0x8] sm:$0xff] }
  0x1c   : > { %303 = vst.msk [vmem:[#allocation2 + $0xc7] sm:$0x1] %vm297_vm2, %v7354_v0  ;;  %304 = vst.msk [vmem:[#allocation2 + $0xe7] sm:$0x1] %vm297_vm2, %v7354_v0  ;;  %v225_v3 = vld [vmem:[%s5049_s9 + $0x10] sm:$0xff]  ;;  %v226_v4 = vld [vmem:[%s5049_s9 + $0x18] sm:$0xff] }
  0x1d   : > { %305 = vst.msk [vmem:[#allocation2 + $0x107] sm:$0x1] %vm297_vm2, %v7354_v0  ;;  %306 = vst.msk [vmem:[#allocation2 + $0x127] sm:$0x1] %vm297_vm2, %v7354_v0  ;;  %v227_v5 = vld [vmem:[%s5049_s9 + $0x20] sm:$0xff]  ;;  %v228_v6 = vld [vmem:[%s5049_s9 + $0x28] sm:$0xff] }
  0x1e   : > { %307 = vst.msk [vmem:[#allocation2 + $0x147] sm:$0x1] %vm297_vm2, %v7354_v0  ;;  %308 = vst.msk [vmem:[#allocation2 + $0x167] sm:$0x1] %vm297_vm2, %v7354_v0  ;;  %v394_v7 = vld [vmem:[#allocation2 + $0x8] sm:$0xff]  ;;  %v229_v9 = vld [vmem:[%s5049_s9 + $0x30] sm:$0xff] }
  0x1f   : > { %309 = vst.msk [vmem:[#allocation2 + $0x187] sm:$0x1] %vm297_vm2, %v7354_v0  ;;  %310 = vst.msk [vmem:[#allocation2 + $0x1a7] sm:$0x1] %vm297_vm2, %v7354_v0  ;;  %v395_v8 = vld [vmem:[#allocation2 + $0x10] sm:$0xff]  ;;  %458 = vrot.lane.b32.xlu0 %v394_v7, %s4876_s10  ;;  %v230_v10 = vld [vmem:[%s5049_s9 + $0x38] sm:$0xff] }
  0x20   : > { %311 = vst.msk [vmem:[#allocation2 + $0x1c7] sm:$0x1] %vm297_vm2, %v7354_v0  ;;  %312 = vst.msk [vmem:[#allocation2 + $0x1e7] sm:$0x1] %vm297_vm2, %v7354_v0  ;;  %v231_v11 = vld [vmem:[%s5049_s9 + $0x40] sm:$0xff]  ;;  %v232_v12 = vld [vmem:[%s5049_s9 + $0x48] sm:$0xff] }
  0x21   : > { %313 = vst.msk [vmem:[#allocation2 + $0x207] sm:$0x1] %vm297_vm2, %v7354_v0  ;;  %315 = vst.msk [vmem:[#allocation2 + $0x58] sm:$0x1] %vm297_vm2, %v7354_v0  ;;  %v233_v13 = vld [vmem:[%s5049_s9 + $0x50] sm:$0xff]  ;;  %v234_v14 = vld [vmem:[%s5049_s9 + $0x58] sm:$0xff] }
  0x22   : > { %316 = vst.msk [vmem:[#allocation2 + $0x78] sm:$0x1] %vm297_vm2, %v7354_v0  ;;  %317 = vst.msk [vmem:[#allocation2 + $0x98] sm:$0x1] %vm297_vm2, %v7354_v0  ;;  %v235_v15 = vld [vmem:[%s5049_s9 + $0x60] sm:$0xff]  ;;  %v236_v16 = vld [vmem:[%s5049_s9 + $0x68] sm:$0xff] }
  0x23   : > { %318 = vst.msk [vmem:[#allocation2 + $0xb8] sm:$0x1] %vm297_vm2, %v7354_v0  ;;  %319 = vst.msk [vmem:[#allocation2 + $0xd8] sm:$0x1] %vm297_vm2, %v7354_v0  ;;  %v237_v17 = vld [vmem:[%s5049_s9 + $0x70] sm:$0xff]  ;;  %v238_v18 = vld [vmem:[%s5049_s9 + $0x78] sm:$0xff]  ;;  %460 = vrot.lane.b32.xlu0 %v395_v8, %s4876_s10 }
  0x24   : > { %320 = vst.msk [vmem:[#allocation2 + $0xf8] sm:$0x1] %vm297_vm2, %v7354_v0  ;;  %321 = vst.msk [vmem:[#allocation2 + $0x118] sm:$0x1] %vm297_vm2, %v7354_v0  ;;  %v239_v19 = vld [vmem:[%s5049_s9 + $0x80] sm:$0xff]  ;;  %v240_v20 = vld [vmem:[%s5049_s9 + $0x88] sm:$0xff] }
  0x25   : > { %322 = vst.msk [vmem:[#allocation2 + $0x138] sm:$0x1] %vm297_vm2, %v7354_v0  ;;  %323 = vst.msk [vmem:[#allocation2 + $0x158] sm:$0x1] %vm297_vm2, %v7354_v0  ;;  %v241_v21 = vld [vmem:[%s5049_s9 + $0x90] sm:$0xff]  ;;  %v242_v22 = vld [vmem:[%s5049_s9 + $0x98] sm:$0xff] }
  0x26   : > { %324 = vst.msk [vmem:[#allocation2 + $0x178] sm:$0x1] %vm297_vm2, %v7354_v0  ;;  %325 = vst.msk [vmem:[#allocation2 + $0x198] sm:$0x1] %vm297_vm2, %v7354_v0  ;;  %v243_v23 = vld [vmem:[%s5049_s9 + $0xa0] sm:$0xff]  ;;  %v244_v24 = vld [vmem:[%s5049_s9 + $0xa8] sm:$0xff] }
  0x27   : > { %326 = vst.msk [vmem:[#allocation2 + $0x1b8] sm:$0x1] %vm297_vm2, %v7354_v0  ;;  %327 = vst.msk [vmem:[#allocation2 + $0x1d8] sm:$0x1] %vm297_vm2, %v7354_v0  ;;  %v245_v28 = vld [vmem:[%s5049_s9 + $0xb0] sm:$0xff]  ;;  %v246_v29 = vld [vmem:[%s5049_s9 + $0xb8] sm:$0xff] }
  0x28   : > { %328 = vst.msk [vmem:[#allocation2 + $0x1f8] sm:$0x1] %vm297_vm2, %v7354_v0  ;;  %329 = vst.msk [vmem:[#allocation2 + $0x218] sm:$0x1] %vm297_vm2, %v7354_v0  ;;  %v247_v33 = vld [vmem:[%s5049_s9 + $0xc0] sm:$0xff]  ;;  %v248_v34 = vld [vmem:[%s5049_s9 + $0xc8] sm:$0xff] }
  0x29   : > { %257 = vst.msk [vmem:[#allocation2 + $0x28] sm:$0xff] %vm256_vm0, %v223_v1  ;;  %258 = vst.msk [vmem:[#allocation2 + $0x30] sm:$0xff] %vm256_vm0, %v224_v2  ;;  %v249_v35 = vld [vmem:[%s5049_s9 + $0xd0] sm:$0xff]  ;;  %v250_v36 = vld [vmem:[%s5049_s9 + $0xd8] sm:$0xff]  ;;  %s4883_s17 = smov 32   ;;  %vm1713_vm9 = vcmask 261344  }
  0x2a   : > { %259 = vst.msk [vmem:[#allocation2 + $0x48] sm:$0xff] %vm256_vm0, %v225_v3  ;;  %260 = vst.msk [vmem:[#allocation2 + $0x50] sm:$0xff] %vm256_vm0, %v226_v4  ;;  %v251_v37 = vld [vmem:[%s5049_s9 + $0xe0] sm:$0xff]  ;;  %v252_v38 = vld [vmem:[%s5049_s9 + $0xe8] sm:$0xff]  ;;  %vm1939_vm10 = vcmask 1047840   ;;  %vm1906_vm11 = vcmask 294144  }
  0x2b   : > { %261 = vst.msk [vmem:[#allocation2 + $0x68] sm:$0xff] %vm256_vm0, %v227_v5  ;;  %262 = vst.msk [vmem:[#allocation2 + $0x70] sm:$0xff] %vm256_vm0, %v228_v6  ;;  %v330_v45 = vld [vmem:[#allocation2 + $0x7] sm:$0xff]  ;;  %v331_v48 = vld [vmem:[#allocation2 + $0xf] sm:$0xff]  ;;  %vm2285_vm12 = vcmask 64512   ;;  %vm2320_vm13 = vcmask 58368  }
  0x2c   : > { %263 = vst.msk [vmem:[#allocation2 + $0x88] sm:$0xff] %vm256_vm0, %v229_v9  ;;  %264 = vst.msk [vmem:[#allocation2 + $0x90] sm:$0xff] %vm256_vm0, %v230_v10  ;;  %vm2326_vm14 = vcmask 57344   ;;  %vm2583_vm15 = vcmask 130112   ;;  %s4885_s23 = smov 48   ;;  %s4886_s25 = smov 56  }
  0x2d   : > { %265 = vst.msk [vmem:[#allocation2 + $0xa8] sm:$0xff] %vm256_vm0, %v231_v11  ;;  %266 = vst.msk [vmem:[#allocation2 + $0xb0] sm:$0xff] %vm256_vm0, %v232_v12  ;;  %s4887_s26 = smov 64   ;;  %vm2969_vm1 = vcmask 261312   ;;  %vm3162_vm2 = vcmask 326912   ;;  %s4888_s8 = smov [#allocation6]  }
  0x2e   : > { %267 = vst.msk [vmem:[#allocation2 + $0xc8] sm:$0xff] %vm256_vm0, %v233_v13  ;;  %268 = vst.msk [vmem:[#allocation2 + $0xd0] sm:$0xff] %vm256_vm0, %v234_v14 }
  0x2f   : > { %269 = vst.msk [vmem:[#allocation2 + $0xe8] sm:$0xff] %vm256_vm0, %v235_v15  ;;  %270 = vst.msk [vmem:[#allocation2 + $0xf0] sm:$0xff] %vm256_vm0, %v236_v16 }
  0x30   : > { %271 = vst.msk [vmem:[#allocation2 + $0x108] sm:$0xff] %vm256_vm0, %v237_v17  ;;  %272 = vst.msk [vmem:[#allocation2 + $0x110] sm:$0xff] %vm256_vm0, %v238_v18  ;;  %v5094_v25 = vld [vmem:[#allocation2 + $0x28] sm:$0xff]  ;;  %v5103_v27 = vld [vmem:[#allocation2 + $0x30] sm:$0xff] }
  0x31   : > { %273 = vst.msk [vmem:[#allocation2 + $0x128] sm:$0xff] %vm256_vm0, %v239_v19  ;;  %274 = vst.msk [vmem:[#allocation2 + $0x130] sm:$0xff] %vm256_vm0, %v240_v20  ;;  %v5096_v26 = vld [vmem:[#allocation2 + $0x48] sm:$0xff]  ;;  %462 = vrot.lane.b32.xlu1 %v5094_v25, %s4876_s10  ;;  %v5115_v31 = vld [vmem:[#allocation2 + $0x50] sm:$0xff] }
  0x32   : > { %275 = vst.msk [vmem:[#allocation2 + $0x148] sm:$0xff] %vm256_vm0, %v241_v21  ;;  %276 = vst.msk [vmem:[#allocation2 + $0x150] sm:$0xff] %vm256_vm0, %v242_v22  ;;  %466 = vrot.lane.b32.xlu0 %v5096_v26, %s4876_s10  ;;  %v5111_v30 = vld [vmem:[#allocation2 + $0x68] sm:$0xff]  ;;  %v5132_v39 = vld [vmem:[#allocation2 + $0x70] sm:$0xff] }
  0x33   : > { %277 = vst.msk [vmem:[#allocation2 + $0x168] sm:$0xff] %vm256_vm0, %v243_v23  ;;  %278 = vst.msk [vmem:[#allocation2 + $0x170] sm:$0xff] %vm256_vm0, %v244_v24  ;;  %v5119_v32 = vld [vmem:[#allocation2 + $0x88] sm:$0xff]  ;;  %v5143_v41 = vld [vmem:[#allocation2 + $0x90] sm:$0xff] }
  0x34   : > { %279 = vst.msk [vmem:[#allocation2 + $0x188] sm:$0xff] %vm256_vm0, %v245_v28  ;;  %280 = vst.msk [vmem:[#allocation2 + $0x190] sm:$0xff] %vm256_vm0, %v246_v29  ;;  %v5139_v40 = vld [vmem:[#allocation2 + $0xa8] sm:$0xff]  ;;  %v5151_v43 = vld [vmem:[#allocation2 + $0xb0] sm:$0xff] }
  0x35   : > { %464 = vrot.lane.b32.xlu1 %v5103_v27, %s4876_s10  ;;  %281 = vst.msk [vmem:[#allocation2 + $0x1a8] sm:$0xff] %vm256_vm0, %v247_v33  ;;  %282 = vst.msk [vmem:[#allocation2 + $0x1b0] sm:$0xff] %vm256_vm0, %v248_v34  ;;  %v5147_v42 = vld [vmem:[#allocation2 + $0xc8] sm:$0xff]  ;;  %v5161_v47 = vld [vmem:[#allocation2 + $0xd0] sm:$0xff] }
  0x36   : > { %470 = vrot.lane.b32.xlu0 %v5111_v30, %s4876_s10  ;;  %283 = vst.msk [vmem:[#allocation2 + $0x1c8] sm:$0xff] %vm256_vm0, %v249_v35  ;;  %284 = vst.msk [vmem:[#allocation2 + $0x1d0] sm:$0xff] %vm256_vm0, %v250_v36  ;;  %v5155_v44 = vld [vmem:[#allocation2 + $0xe8] sm:$0xff]  ;;  %v5181_v53 = vld [vmem:[#allocation2 + $0xf0] sm:$0xff] }
  0x37   : > { %285 = vst.msk [vmem:[#allocation2 + $0x1e8] sm:$0xff] %vm256_vm0, %v251_v37  ;;  %286 = vst.msk [vmem:[#allocation2 + $0x1f0] sm:$0xff] %vm256_vm0, %v252_v38  ;;  %v5159_v46 = vld [vmem:[#allocation2 + $0x27] sm:$0xff]  ;;  %v5169_v49 = vld [vmem:[#allocation2 + $0x2f] sm:$0xff] }
  0x38   : > { %362 = vst.msk [vmem:[#allocation3] sm:$0xff] %vm256_vm0, %v330_v45  ;;  %364 = vst.msk [vmem:[#allocation3 + $0x10] sm:$0xff] %vm256_vm0, %v5159_v46  ;;  %v5171_v50 = vld [vmem:[#allocation2 + $0x108] sm:$0xff]  ;;  %v5217_v63 = vld [vmem:[#allocation2 + $0x110] sm:$0xff] }
  0x39   : > { %468 = vrot.lane.b32.xlu1 %v5115_v31, %s4876_s10  ;;  %363 = vst.msk [vmem:[#allocation3 + $0x8] sm:$0xff] %vm256_vm0, %v331_v48  ;;  %365 = vst.msk [vmem:[#allocation3 + $0x18] sm:$0xff] %vm256_vm0, %v5169_v49  ;;  %v5175_v51 = vld [vmem:[#allocation2 + $0x47] sm:$0xff]  ;;  %v5177_v52 = vld [vmem:[#allocation2 + $0x4f] sm:$0xff] }
  0x3a   : > { %474 = vrot.lane.b32.xlu0 %v5119_v32, %s4876_s10  ;;  %366 = vst.msk [vmem:[#allocation3 + $0x20] sm:$0xff] %vm256_vm0, %v5175_v51  ;;  %367 = vst.msk [vmem:[#allocation3 + $0x28] sm:$0xff] %vm256_vm0, %v5177_v52  ;;  %v5187_v54 = vld [vmem:[#allocation2 + $0x67] sm:$0xff]  ;;  %v5189_v55 = vld [vmem:[#allocation2 + $0x6f] sm:$0xff] }
  0x3b   : > { %v5191_v56 = vld [vmem:[#allocation2 + $0x128] sm:$0xff]  ;;  %368 = vst.msk [vmem:[#allocation3 + $0x30] sm:$0xff] %vm256_vm0, %v5187_v54  ;;  %369 = vst.msk [vmem:[#allocation3 + $0x38] sm:$0xff] %vm256_vm0, %v5189_v55  ;;  %v5277_v14 = vld [vmem:[#allocation2 + $0x130] sm:$0xff] }
  0x3c   : > { %v5197_v57 = vld [vmem:[#allocation2 + $0x87] sm:$0xff]  ;;  %v5199_v58 = vld [vmem:[#allocation2 + $0x8f] sm:$0xff]  ;;  %v254_v37 = vld [vmem:[%s5049_s9 + $0xf8] sm:$0xff] }
  0x3d   : > { %472 = vrot.lane.b32.xlu1 %v5132_v39, %s4876_s10  ;;  %v5201_v59 = vld [vmem:[#allocation2 + $0xa7] sm:$0xff]  ;;  %370 = vst.msk [vmem:[#allocation3 + $0x40] sm:$0xff] %vm256_vm0, %v5197_v57  ;;  %371 = vst.msk [vmem:[#allocation3 + $0x48] sm:$0xff] %vm256_vm0, %v5199_v58  ;;  %v5211_v60 = vld [vmem:[#allocation2 + $0xaf] sm:$0xff] }
  0x3e   : > { %478 = vrot.lane.b32.xlu0 %v5139_v40, %s4876_s10  ;;  %372 = vst.msk [vmem:[#allocation3 + $0x50] sm:$0xff] %vm256_vm0, %v5201_v59  ;;  %v5213_v61 = vld [vmem:[#allocation2 + $0xc7] sm:$0xff]  ;;  %v5215_v62 = vld [vmem:[#allocation2 + $0xcf] sm:$0xff]  ;;  %373 = vst.msk [vmem:[#allocation3 + $0x58] sm:$0xff] %vm256_vm0, %v5211_v60 }
  0x3f   : > { %374 = vst.msk [vmem:[#allocation3 + $0x60] sm:$0xff] %vm256_vm0, %v5213_v61  ;;  %375 = vst.msk [vmem:[#allocation3 + $0x68] sm:$0xff] %vm256_vm0, %v5215_v62  ;;  %v5225_v1 = vld [vmem:[#allocation2 + $0xe7] sm:$0xff]  ;;  %v5227_v2 = vld [vmem:[#allocation2 + $0xef] sm:$0xff] }
  0x40   : > { %v5229_v3 = vld [vmem:[#allocation2 + $0x107] sm:$0xff]  ;;  %376 = vst.msk [vmem:[#allocation3 + $0x70] sm:$0xff] %vm256_vm0, %v5225_v1  ;;  %377 = vst.msk [vmem:[#allocation3 + $0x78] sm:$0xff] %vm256_vm0, %v5227_v2  ;;  %v5239_v4 = vld [vmem:[#allocation2 + $0x10f] sm:$0xff] }
  0x41   : > { %476 = vrot.lane.b32.xlu1 %v5143_v41, %s4876_s10  ;;  %378 = vst.msk [vmem:[#allocation3 + $0x80] sm:$0xff] %vm256_vm0, %v5229_v3  ;;  %v5241_v5 = vld [vmem:[#allocation2 + $0x127] sm:$0xff]  ;;  %v5243_v6 = vld [vmem:[#allocation2 + $0x12f] sm:$0xff]  ;;  %379 = vst.msk [vmem:[#allocation3 + $0x88] sm:$0xff] %vm256_vm0, %v5239_v4 }
  0x42   : > { %482 = vrot.lane.b32.xlu0 %v5147_v42, %s4876_s10  ;;  %380 = vst.msk [vmem:[#allocation3 + $0x90] sm:$0xff] %vm256_vm0, %v5241_v5  ;;  %381 = vst.msk [vmem:[#allocation3 + $0x98] sm:$0xff] %vm256_vm0, %v5243_v6  ;;  %v5251_v7 = vld [vmem:[#allocation2 + $0x147] sm:$0xff]  ;;  %v5253_v8 = vld [vmem:[#allocation2 + $0x14f] sm:$0xff] }
  0x43   : > { %v5255_v9 = vld [vmem:[#allocation2 + $0x167] sm:$0xff]  ;;  %382 = vst.msk [vmem:[#allocation3 + $0xa0] sm:$0xff] %vm256_vm0, %v5251_v7  ;;  %383 = vst.msk [vmem:[#allocation3 + $0xa8] sm:$0xff] %vm256_vm0, %v5253_v8  ;;  %v5265_v10 = vld [vmem:[#allocation2 + $0x16f] sm:$0xff] }
  0x44   : > { %384 = vst.msk [vmem:[#allocation3 + $0xb0] sm:$0xff] %vm256_vm0, %v5255_v9  ;;  %v5267_v11 = vld [vmem:[#allocation2 + $0x148] sm:$0xff]  ;;  %385 = vst.msk [vmem:[#allocation3 + $0xb8] sm:$0xff] %vm256_vm0, %v5265_v10  ;;  %v5293_v18 = vld [vmem:[#allocation2 + $0x150] sm:$0xff] }
  0x45   : > { %480 = vrot.lane.b32.xlu1 %v5151_v43, %s4876_s10  ;;  %v5273_v12 = vld [vmem:[#allocation2 + $0x187] sm:$0xff]  ;;  %v5275_v13 = vld [vmem:[#allocation2 + $0x18f] sm:$0xff]  ;;  %288 = vst.msk [vmem:[#allocation2 + $0x210] sm:$0xff] %vm256_vm0, %v254_v37 }
  0x46   : > { %486 = vrot.lane.b32.xlu0 %v5155_v44, %s4876_s10  ;;  %386 = vst.msk [vmem:[#allocation3 + $0xc0] sm:$0xff] %vm256_vm0, %v5273_v12  ;;  %387 = vst.msk [vmem:[#allocation3 + $0xc8] sm:$0xff] %vm256_vm0, %v5275_v13  ;;  %v5285_v15 = vld [vmem:[#allocation2 + $0x168] sm:$0xff]  ;;  %v5309_v22 = vld [vmem:[#allocation2 + $0x170] sm:$0xff] }
  0x47   : > { %v5289_v16 = vld [vmem:[#allocation2 + $0x1a7] sm:$0xff]  ;;  %v5291_v17 = vld [vmem:[#allocation2 + $0x1af] sm:$0xff] }
  0x48   : > { %388 = vst.msk [vmem:[#allocation3 + $0xd0] sm:$0xff] %vm256_vm0, %v5289_v16  ;;  %389 = vst.msk [vmem:[#allocation3 + $0xd8] sm:$0xff] %vm256_vm0, %v5291_v17  ;;  %v5301_v19 = vld [vmem:[#allocation2 + $0x188] sm:$0xff]  ;;  %v5325_v29 = vld [vmem:[#allocation2 + $0x190] sm:$0xff] }
  0x49   : > { %484 = vrot.lane.b32.xlu1 %v5161_v47, %s4876_s10  ;;  %v5305_v20 = vld [vmem:[#allocation2 + $0x1c7] sm:$0xff]  ;;  %v5307_v21 = vld [vmem:[#allocation2 + $0x1cf] sm:$0xff] }
  0x4a   : > { %490 = vrot.lane.b32.xlu0 %v5171_v50, %s4876_s10  ;;  %390 = vst.msk [vmem:[#allocation3 + $0xe0] sm:$0xff] %vm256_vm0, %v5305_v20  ;;  %391 = vst.msk [vmem:[#allocation3 + $0xe8] sm:$0xff] %vm256_vm0, %v5307_v21  ;;  %v5317_v23 = vld [vmem:[#allocation2 + $0x1a8] sm:$0xff]  ;;  %v5337_v34 = vld [vmem:[#allocation2 + $0x1b0] sm:$0xff] }
  0x4b   : > { %v5321_v24 = vld [vmem:[#allocation2 + $0x1e7] sm:$0xff]  ;;  %v5323_v28 = vld [vmem:[#allocation2 + $0x1ef] sm:$0xff]  ;;  %7388 = vst [vmem:[#allocation9_spill] sm:$0xff] %v5337_v34 }
  0x4c   : > { %392 = vst.msk [vmem:[#allocation3 + $0xf0] sm:$0xff] %vm256_vm0, %v5321_v24  ;;  %393 = vst.msk [vmem:[#allocation3 + $0xf8] sm:$0xff] %vm256_vm0, %v5323_v28  ;;  %v5333_v33 = vld [vmem:[#allocation2 + $0x1c8] sm:$0xff]  ;;  %v253_v35 = vld [vmem:[%s5049_s9 + $0xf0] sm:$0xff]  ;;  %s4815_s9 = sshll.u32 %s4888_s8, 4  ;;  %s4816_s9 = int_to_ptr.vmem [resolvable:$false] %s4815_s9 }
  0x4d   : > { %488 = vrot.lane.b32.xlu1 %v5181_v53, %s4876_s10  ;;  %v5342_v36 = vld [vmem:[#allocation2 + $0x1e8] sm:$0xff]  ;;  %287 = vst.msk [vmem:[#allocation2 + $0x208] sm:$0xff] %vm256_vm0, %v253_v35  ;;  %v5349_v38 = vld [vmem:[#allocation2 + $0x1d0] sm:$0xff]  ;;  %vm2776_vm0 = vcmask 195712  }
  0x4e   : > { %494 = vrot.lane.b32.xlu0 %v5191_v56, %s4876_s10  ;;  %7389 = vst [vmem:[#allocation10_spill] sm:$0xff] %v5342_v36  ;;  %7390 = vst [vmem:[#allocation11_spill] sm:$0xff] %v5349_v38  ;;  %v587_v45 = vld [vmem:[#allocation2 + $0x9] sm:$0xff]  ;;  %v588_v37 = vld [vmem:[#allocation2 + $0x11] sm:$0xff] }
  0x4f   : > { %v5355_v48 = vld [vmem:[#allocation2 + $0x1f0] sm:$0xff] }
  0x50   : > { %7391 = vst [vmem:[#allocation12_spill] sm:$0xff] %v5355_v48  ;;  %v5358_v35 = vld [vmem:[#allocation2 + $0x29] sm:$0xff] }
  0x51   : > { %492 = vrot.lane.b32.xlu1 %v5217_v63, %s4876_s10  ;;  %7392 = vst [vmem:[#allocation13_spill] sm:$0xff] %v5358_v35  ;;  %v5364_v0 = vld [vmem:[#allocation2 + $0x49] sm:$0xff] }
  0x52   : > { %498 = vrot.lane.b32.xlu0 %v5267_v11, %s4876_s10  ;;  %7393 = vst [vmem:[#allocation14_spill] sm:$0xff] %v5364_v0 }
  0x55   : > { %496 = vrot.lane.b32.xlu1 %v5277_v14, %s4876_s10 }
  0x56   : > { %502 = vrot.lane.b32.xlu0 %v5285_v15, %s4876_s10 }
  0x59   : > { %500 = vrot.lane.b32.xlu1 %v5293_v18, %s4876_s10 }
  0x5a   : > { %506 = vrot.lane.b32.xlu0 %v5301_v19, %s4876_s10 }
  0x5d   : > { %504 = vrot.lane.b32.xlu1 %v5309_v22, %s4876_s10 }
  0x5e   : > { %510 = vrot.lane.b32.xlu0 %v5317_v23, %s4876_s10 }
  0x61   : > { %508 = vrot.lane.b32.xlu1 %v5325_v29, %s4876_s10 }
  0x62   : > { %514 = vrot.lane.b32.xlu0 %v5333_v33, %s4876_s10 }
  0x65   : > { %512 = vrot.lane.b32.xlu1 %v5337_v34, %s4876_s10 }
  0x66   : > { %518 = vrot.lane.b32.xlu0 %v5342_v36, %s4876_s10  ;;  %v5367_v36 = vld [vmem:[#allocation2 + $0x31] sm:$0xff] }
  0x67   : > { %7394 = vst [vmem:[#allocation15_spill] sm:$0xff] %v5367_v36 }
  0x69   : > { %516 = vrot.lane.b32.xlu1 %v5349_v38, %s4876_s10  ;;  %v5371_v38 = vld [vmem:[#allocation2 + $0x69] sm:$0xff] }
  0x6a   : > { %651 = vrot.lane.b32.xlu0 %v587_v45, %s4877_s11  ;;  %7395 = vst [vmem:[#allocation16_spill] sm:$0xff] %v5371_v38  ;;  %v5375_v45 = vld [vmem:[#allocation2 + $0x51] sm:$0xff] }
  0x6b   : > { %7396 = vst [vmem:[#allocation17_spill] sm:$0xff] %v5375_v45 }
  0x6d   : > { %520 = vrot.lane.b32.xlu1 %v5355_v48, %s4876_s10  ;;  %v5455_v48 = vld [vmem:[#allocation2 + $0x191] sm:$0xff]  ;;  %s4817_s10 = scalar_lea.vmem %s4816_s9, 8192 }
  0x6e   : > { %655 = vrot.lane.b32.xlu0 %v5358_v35, %s4877_s11  ;;  %v5379_v35 = vld [vmem:[#allocation2 + $0x89] sm:$0xff]  ;;  %7416 = vst [vmem:[#allocation37_spill] sm:$0xff] %v5455_v48 }
  0x6f   : > { %7397 = vst [vmem:[#allocation18_spill] sm:$0xff] %v5379_v35 }
  0x71   : > { %653 = vrot.lane.b32.xlu1 %v588_v37, %s4877_s11  ;;  %v5383_v37 = vld [vmem:[#allocation2 + $0x71] sm:$0xff] }
  0x72   : > { %659 = vrot.lane.b32.xlu0 %v5364_v0, %s4877_s11  ;;  %7398 = vst [vmem:[#allocation19_spill] sm:$0xff] %v5383_v37  ;;  %v5387_v0 = vld [vmem:[#allocation2 + $0xa9] sm:$0xff] }
  0x73   : > { %7399 = vst [vmem:[#allocation20_spill] sm:$0xff] %v5387_v0 }
  0x75   : > { %657 = vrot.lane.b32.xlu1 %v5367_v36, %s4877_s11  ;;  %v5391_v36 = vld [vmem:[#allocation2 + $0x91] sm:$0xff] }
  0x76   : > { %663 = vrot.lane.b32.xlu0 %v5371_v38, %s4877_s11  ;;  %7400 = vst [vmem:[#allocation21_spill] sm:$0xff] %v5391_v36  ;;  %v5395_v38 = vld [vmem:[#allocation2 + $0xc9] sm:$0xff] }
  0x77   : > { %7401 = vst [vmem:[#allocation22_spill] sm:$0xff] %v5395_v38 }
  0x79   : > { %661 = vrot.lane.b32.xlu1 %v5375_v45, %s4877_s11  ;;  %v5399_v45 = vld [vmem:[#allocation2 + $0xb1] sm:$0xff] }
  0x7a   : > { %667 = vrot.lane.b32.xlu0 %v5379_v35, %s4877_s11  ;;  %7402 = vst [vmem:[#allocation23_spill] sm:$0xff] %v5399_v45  ;;  %v5403_v35 = vld [vmem:[#allocation2 + $0xe9] sm:$0xff] }
  0x7b   : > { %7403 = vst [vmem:[#allocation24_spill] sm:$0xff] %v5403_v35 }
  0x7d   : > { %665 = vrot.lane.b32.xlu1 %v5383_v37, %s4877_s11  ;;  %v5407_v37 = vld [vmem:[#allocation2 + $0xd1] sm:$0xff] }
  0x7e   : > { %671 = vrot.lane.b32.xlu0 %v5387_v0, %s4877_s11  ;;  %7404 = vst [vmem:[#allocation25_spill] sm:$0xff] %v5407_v37  ;;  %v5411_v0 = vld [vmem:[#allocation2 + $0x109] sm:$0xff] }
  0x7f   : > { %7405 = vst [vmem:[#allocation26_spill] sm:$0xff] %v5411_v0 }
  0x81   : > { %669 = vrot.lane.b32.xlu1 %v5391_v36, %s4877_s11  ;;  %v5415_v36 = vld [vmem:[#allocation2 + $0xf1] sm:$0xff] }
  0x82   : > { %675 = vrot.lane.b32.xlu0 %v5395_v38, %s4877_s11  ;;  %7406 = vst [vmem:[#allocation27_spill] sm:$0xff] %v5415_v36  ;;  %v5419_v38 = vld [vmem:[#allocation2 + $0x129] sm:$0xff] }
  0x83   : > { %7407 = vst [vmem:[#allocation28_spill] sm:$0xff] %v5419_v38 }
  0x85   : > { %673 = vrot.lane.b32.xlu1 %v5399_v45, %s4877_s11  ;;  %v5423_v45 = vld [vmem:[#allocation2 + $0x111] sm:$0xff] }
  0x86   : > { %679 = vrot.lane.b32.xlu0 %v5403_v35, %s4877_s11  ;;  %7408 = vst [vmem:[#allocation29_spill] sm:$0xff] %v5423_v45  ;;  %v5427_v35 = vld [vmem:[#allocation2 + $0x149] sm:$0xff] }
  0x87   : > { %7409 = vst [vmem:[#allocation30_spill] sm:$0xff] %v5427_v35 }
  0x89   : > { %677 = vrot.lane.b32.xlu1 %v5407_v37, %s4877_s11  ;;  %v5431_v37 = vld [vmem:[#allocation2 + $0x131] sm:$0xff] }
  0x8a   : > { %683 = vrot.lane.b32.xlu0 %v5411_v0, %s4877_s11  ;;  %7410 = vst [vmem:[#allocation31_spill] sm:$0xff] %v5431_v37  ;;  %v5435_v0 = vld [vmem:[#allocation2 + $0x169] sm:$0xff] }
  0x8b   : > { %7411 = vst [vmem:[#allocation32_spill] sm:$0xff] %v5435_v0 }
  0x8d   : > { %681 = vrot.lane.b32.xlu1 %v5415_v36, %s4877_s11  ;;  %v5439_v36 = vld [vmem:[#allocation2 + $0x151] sm:$0xff] }
  0x8e   : > { %687 = vrot.lane.b32.xlu0 %v5419_v38, %s4877_s11  ;;  %7412 = vst [vmem:[#allocation33_spill] sm:$0xff] %v5439_v36  ;;  %v5443_v38 = vld [vmem:[#allocation2 + $0x189] sm:$0xff] }
  0x8f   : > { %7413 = vst [vmem:[#allocation34_spill] sm:$0xff] %v5443_v38 }
  0x91   : > { %685 = vrot.lane.b32.xlu1 %v5423_v45, %s4877_s11  ;;  %v5447_v45 = vld [vmem:[#allocation2 + $0x171] sm:$0xff] }
  0x92   : > { %691 = vrot.lane.b32.xlu0 %v5427_v35, %s4877_s11  ;;  %7414 = vst [vmem:[#allocation35_spill] sm:$0xff] %v5447_v45  ;;  %v5451_v35 = vld [vmem:[#allocation2 + $0x1a9] sm:$0xff] }
  0x93   : > { %7415 = vst [vmem:[#allocation36_spill] sm:$0xff] %v5451_v35 }
  0x95   : > { %689 = vrot.lane.b32.xlu1 %v5431_v37, %s4877_s11  ;;  %v459_v37 = vpop.permute.xlu0 %458 }
  0x96   : > { %695 = vrot.lane.b32.xlu0 %v5435_v0, %s4877_s11  ;;  %555 = vst.msk [vmem:[#allocation3] sm:$0xff] %vm554_vm3, %v459_v37  ;;  %v5464_v0 = vld [vmem:[#allocation2 + $0x1b1] sm:$0xff]  ;;  %v5470_v37 = vld [vmem:[#allocation2 + $0x1e9] sm:$0xff] }
  0x97   : > { %7417 = vst [vmem:[#allocation38_spill] sm:$0xff] %v5464_v0 }
  0x99   : > { %693 = vrot.lane.b32.xlu1 %v5439_v36, %s4877_s11  ;;  %v5460_v36 = vld [vmem:[#allocation2 + $0x1c9] sm:$0xff] }
  0x9a   : > { %699 = vrot.lane.b32.xlu0 %v5443_v38, %s4877_s11  ;;  %v461_v38 = vpop.permute.xlu0 %460 }
  0x9b   : > { %556 = vst.msk [vmem:[#allocation3 + $0x8] sm:$0xff] %vm554_vm3, %v461_v38  ;;  %v5482_v38 = vld [vmem:[#allocation2 + $0x1f1] sm:$0xff] }
  0x9d   : > { %697 = vrot.lane.b32.xlu1 %v5447_v45, %s4877_s11  ;;  %v5474_v45 = vld [vmem:[#allocation2 + $0x1d1] sm:$0xff] }
  0x9e   : > { %703 = vrot.lane.b32.xlu0 %v5451_v35, %s4877_s11 }
  0xa1   : > { %701 = vrot.lane.b32.xlu1 %v5455_v48, %s4877_s11 }
  0xa2   : > { %707 = vrot.lane.b32.xlu0 %v5460_v36, %s4877_s11 }
  0xa3   : > { %v463_v34 = vpop.permute.xlu1 %462 }
  0xa4   : > { %557 = vst.msk [vmem:[#allocation3 + $0x10] sm:$0xff] %vm554_vm3, %v463_v34  ;;  %v467_v35 = vpop.permute.xlu0 %466 }
  0xa5   : > { %705 = vrot.lane.b32.xlu1 %v5464_v0, %s4877_s11  ;;  %559 = vst.msk [vmem:[#allocation3 + $0x20] sm:$0xff] %vm554_vm3, %v467_v35 }
  0xa6   : > { %711 = vrot.lane.b32.xlu0 %v5470_v37, %s4877_s11 }
  0xa7   : > { %v465_v48 = vpop.permute.xlu1 %464 }
  0xa8   : > { %558 = vst.msk [vmem:[#allocation3 + $0x18] sm:$0xff] %vm554_vm3, %v465_v48  ;;  %v471_v34 = vpop.permute.xlu0 %470 }
  0xa9   : > { %709 = vrot.lane.b32.xlu1 %v5474_v45, %s4877_s11  ;;  %561 = vst.msk [vmem:[#allocation3 + $0x30] sm:$0xff] %vm554_vm3, %v471_v34 }
  0xaa   : > { %844 = vrot.lane.b32.xlu0 %v5159_v46, %s4878_s12 }
  0xab   : > { %v469_v0 = vpop.permute.xlu1 %468 }
  0xac   : > { %560 = vst.msk [vmem:[#allocation3 + $0x28] sm:$0xff] %vm554_vm3, %v469_v0  ;;  %v475_v35 = vpop.permute.xlu0 %474 }
  0xad   : > { %713 = vrot.lane.b32.xlu1 %v5482_v38, %s4877_s11  ;;  %563 = vst.msk [vmem:[#allocation3 + $0x40] sm:$0xff] %vm554_vm3, %v475_v35 }
  0xae   : > { %848 = vrot.lane.b32.xlu0 %v5175_v51, %s4878_s12 }
  0xaf   : > { %v473_v48 = vpop.permute.xlu1 %472 }
  0xb0   : > { %562 = vst.msk [vmem:[#allocation3 + $0x38] sm:$0xff] %vm554_vm3, %v473_v48  ;;  %v479_v34 = vpop.permute.xlu0 %478 }
  0xb1   : > { %846 = vrot.lane.b32.xlu1 %v5169_v49, %s4878_s12  ;;  %565 = vst.msk [vmem:[#allocation3 + $0x50] sm:$0xff] %vm554_vm3, %v479_v34 }
  0xb2   : > { %852 = vrot.lane.b32.xlu0 %v5187_v54, %s4878_s12 }
  0xb3   : > { %v477_v46 = vpop.permute.xlu1 %476 }
  0xb4   : > { %564 = vst.msk [vmem:[#allocation3 + $0x48] sm:$0xff] %vm554_vm3, %v477_v46  ;;  %v483_v0 = vpop.permute.xlu0 %482 }
  0xb5   : > { %850 = vrot.lane.b32.xlu1 %v5177_v52, %s4878_s12  ;;  %567 = vst.msk [vmem:[#allocation3 + $0x60] sm:$0xff] %vm554_vm3, %v483_v0 }
  0xb6   : > { %856 = vrot.lane.b32.xlu0 %v5197_v57, %s4878_s12 }
  0xb7   : > { %v481_v35 = vpop.permute.xlu1 %480 }
  0xb8   : > { %566 = vst.msk [vmem:[#allocation3 + $0x58] sm:$0xff] %vm554_vm3, %v481_v35  ;;  %v487_v49 = vpop.permute.xlu0 %486 }
  0xb9   : > { %854 = vrot.lane.b32.xlu1 %v5189_v55, %s4878_s12  ;;  %569 = vst.msk [vmem:[#allocation3 + $0x70] sm:$0xff] %vm554_vm3, %v487_v49 }
  0xba   : > { %860 = vrot.lane.b32.xlu0 %v5201_v59, %s4878_s12 }
  0xbb   : > { %v485_v48 = vpop.permute.xlu1 %484 }
  0xbc   : > { %568 = vst.msk [vmem:[#allocation3 + $0x68] sm:$0xff] %vm554_vm3, %v485_v48  ;;  %v491_v34 = vpop.permute.xlu0 %490 }
  0xbd   : > { %858 = vrot.lane.b32.xlu1 %v5199_v58, %s4878_s12  ;;  %571 = vst.msk [vmem:[#allocation3 + $0x80] sm:$0xff] %vm554_vm3, %v491_v34 }
  0xbe   : > { %864 = vrot.lane.b32.xlu0 %v5213_v61, %s4878_s12 }
  0xbf   : > { %v489_v46 = vpop.permute.xlu1 %488 }
  0xc0   : > { %570 = vst.msk [vmem:[#allocation3 + $0x78] sm:$0xff] %vm554_vm3, %v489_v46  ;;  %v495_v0 = vpop.permute.xlu0 %494 }
  0xc1   : > { %862 = vrot.lane.b32.xlu1 %v5211_v60, %s4878_s12  ;;  %573 = vst.msk [vmem:[#allocation3 + $0x90] sm:$0xff] %vm554_vm3, %v495_v0 }
  0xc2   : > { %868 = vrot.lane.b32.xlu0 %v5225_v1, %s4878_s12 }
  0xc3   : > { %v493_v35 = vpop.permute.xlu1 %492 }
  0xc4   : > { %572 = vst.msk [vmem:[#allocation3 + $0x88] sm:$0xff] %vm554_vm3, %v493_v35  ;;  %v499_v49 = vpop.permute.xlu0 %498 }
  0xc5   : > { %866 = vrot.lane.b32.xlu1 %v5215_v62, %s4878_s12  ;;  %575 = vst.msk [vmem:[#allocation3 + $0xa0] sm:$0xff] %vm554_vm3, %v499_v49 }
  0xc6   : > { %872 = vrot.lane.b32.xlu0 %v5229_v3, %s4878_s12 }
  0xc7   : > { %v497_v48 = vpop.permute.xlu1 %496 }
  0xc8   : > { %574 = vst.msk [vmem:[#allocation3 + $0x98] sm:$0xff] %vm554_vm3, %v497_v48  ;;  %v503_v34 = vpop.permute.xlu0 %502 }
  0xc9   : > { %870 = vrot.lane.b32.xlu1 %v5227_v2, %s4878_s12  ;;  %577 = vst.msk [vmem:[#allocation3 + $0xb0] sm:$0xff] %vm554_vm3, %v503_v34 }
  0xca   : > { %876 = vrot.lane.b32.xlu0 %v5241_v5, %s4878_s12 }
  0xcb   : > { %v501_v46 = vpop.permute.xlu1 %500 }
  0xcc   : > { %576 = vst.msk [vmem:[#allocation3 + $0xa8] sm:$0xff] %vm554_vm3, %v501_v46  ;;  %v507_v0 = vpop.permute.xlu0 %506 }
  0xcd   : > { %874 = vrot.lane.b32.xlu1 %v5239_v4, %s4878_s12  ;;  %579 = vst.msk [vmem:[#allocation3 + $0xc0] sm:$0xff] %vm554_vm3, %v507_v0 }
  0xce   : > { %880 = vrot.lane.b32.xlu0 %v5251_v7, %s4878_s12 }
  0xcf   : > { %v505_v35 = vpop.permute.xlu1 %504 }
  0xd0   : > { %578 = vst.msk [vmem:[#allocation3 + $0xb8] sm:$0xff] %vm554_vm3, %v505_v35  ;;  %v511_v49 = vpop.permute.xlu0 %510 }
  0xd1   : > { %878 = vrot.lane.b32.xlu1 %v5243_v6, %s4878_s12  ;;  %581 = vst.msk [vmem:[#allocation3 + $0xd0] sm:$0xff] %vm554_vm3, %v511_v49 }
  0xd2   : > { %884 = vrot.lane.b32.xlu0 %v5255_v9, %s4878_s12 }
  0xd3   : > { %v509_v48 = vpop.permute.xlu1 %508 }
  0xd4   : > { %580 = vst.msk [vmem:[#allocation3 + $0xc8] sm:$0xff] %vm554_vm3, %v509_v48  ;;  %v515_v34 = vpop.permute.xlu0 %514 }
  0xd5   : > { %882 = vrot.lane.b32.xlu1 %v5253_v8, %s4878_s12  ;;  %583 = vst.msk [vmem:[#allocation3 + $0xe0] sm:$0xff] %vm554_vm3, %v515_v34 }
  0xd6   : > { %888 = vrot.lane.b32.xlu0 %v5273_v12, %s4878_s12 }
  0xd7   : > { %v513_v46 = vpop.permute.xlu1 %512 }
  0xd8   : > { %582 = vst.msk [vmem:[#allocation3 + $0xd8] sm:$0xff] %vm554_vm3, %v513_v46  ;;  %v519_v0 = vpop.permute.xlu0 %518 }
  0xd9   : > { %886 = vrot.lane.b32.xlu1 %v5265_v10, %s4878_s12  ;;  %585 = vst.msk [vmem:[#allocation3 + $0xf0] sm:$0xff] %vm554_vm3, %v519_v0  ;;  %v5572_v0 = vld [vmem:[#allocation2 + $0x207] sm:$0xff] }
  0xda   : > { %892 = vrot.lane.b32.xlu0 %v5289_v16, %s4878_s12 }
  0xdb   : > { %v517_v35 = vpop.permute.xlu1 %516 }
  0xdc   : > { %584 = vst.msk [vmem:[#allocation3 + $0xe8] sm:$0xff] %vm554_vm3, %v517_v35  ;;  %v652_v49 = vpop.permute.xlu0 %651 }
  0xdd   : > { %890 = vrot.lane.b32.xlu1 %v5275_v13, %s4878_s12  ;;  %748 = vst.msk [vmem:[#allocation3] sm:$0xff] %vm747_vm4, %v652_v49 }
  0xde   : > { %896 = vrot.lane.b32.xlu0 %v5305_v20, %s4878_s12 }
  0xdf   : > { %v521_v48 = vpop.permute.xlu1 %520 }
  0xe0   : > { %586 = vst.msk [vmem:[#allocation3 + $0xf8] sm:$0xff] %vm554_vm3, %v521_v48  ;;  %v656_v34 = vpop.permute.xlu0 %655  ;;  %vm3355_vm3 = vcmask 392512  }
  0xe1   : > { %894 = vrot.lane.b32.xlu1 %v5291_v17, %s4878_s12  ;;  %750 = vst.msk [vmem:[#allocation3 + $0x10] sm:$0xff] %vm747_vm4, %v656_v34  ;;  %v811_v34 = vld [vmem:[#allocation2 + $0x20f] sm:$0xff] }
  0xe2   : > { %900 = vrot.lane.b32.xlu0 %v5321_v24, %s4878_s12 }
  0xe3   : > { %v654_v46 = vpop.permute.xlu1 %653 }
  0xe4   : > { %749 = vst.msk [vmem:[#allocation3 + $0x8] sm:$0xff] %vm747_vm4, %v654_v46  ;;  %v660_v35 = vpop.permute.xlu0 %659 }
  0xe5   : > { %898 = vrot.lane.b32.xlu1 %v5307_v21, %s4878_s12  ;;  %752 = vst.msk [vmem:[#allocation3 + $0x20] sm:$0xff] %vm747_vm4, %v660_v35 }
  0xe6   : > { %904 = vrot.lane.b32.xlu0 %v5572_v0, %s4878_s12 }
  0xe7   : > { %v658_v49 = vpop.permute.xlu1 %657 }
  0xe8   : > { %751 = vst.msk [vmem:[#allocation3 + $0x18] sm:$0xff] %vm747_vm4, %v658_v49  ;;  %v664_v48 = vpop.permute.xlu0 %663 }
  0xe9   : > { %902 = vrot.lane.b32.xlu1 %v5323_v28, %s4878_s12  ;;  %754 = vst.msk [vmem:[#allocation3 + $0x30] sm:$0xff] %vm747_vm4, %v664_v48 }
  0xea   : > { %1037 = vrot.lane.b32.xlu0 %v5094_v25, %s4879_s13 }
  0xeb   : > { %v662_v46 = vpop.permute.xlu1 %661 }
  0xec   : > { %753 = vst.msk [vmem:[#allocation3 + $0x28] sm:$0xff] %vm747_vm4, %v662_v46  ;;  %v668_v35 = vpop.permute.xlu0 %667 }
  0xed   : > { %906 = vrot.lane.b32.xlu1 %v811_v34, %s4878_s12  ;;  %756 = vst.msk [vmem:[#allocation3 + $0x40] sm:$0xff] %vm747_vm4, %v668_v35  ;;  %v7419_v35 = vld [vmem:[#allocation10_spill] sm:$0xff] }
  0xee   : > { %1041 = vrot.lane.b32.xlu0 %v5096_v26, %s4879_s13 }
  0xef   : > { %v666_v49 = vpop.permute.xlu1 %665 }
  0xf0   : > { %755 = vst.msk [vmem:[#allocation3 + $0x38] sm:$0xff] %vm747_vm4, %v666_v49  ;;  %v672_v48 = vpop.permute.xlu0 %671  ;;  %v7420_v49 = vld [vmem:[#allocation11_spill] sm:$0xff] }
  0xf1   : > { %1039 = vrot.lane.b32.xlu1 %v5103_v27, %s4879_s13  ;;  %758 = vst.msk [vmem:[#allocation3 + $0x50] sm:$0xff] %vm747_vm4, %v672_v48 }
  0xf2   : > { %1045 = vrot.lane.b32.xlu0 %v5111_v30, %s4879_s13 }
  0xf3   : > { %v670_v25 = vpop.permute.xlu1 %669 }
  0xf4   : > { %757 = vst.msk [vmem:[#allocation3 + $0x48] sm:$0xff] %vm747_vm4, %v670_v25  ;;  %v676_v34 = vpop.permute.xlu0 %675  ;;  %v7421_v25 = vld [vmem:[#allocation12_spill] sm:$0xff] }
  0xf5   : > { %1043 = vrot.lane.b32.xlu1 %v5115_v31, %s4879_s13  ;;  %760 = vst.msk [vmem:[#allocation3 + $0x60] sm:$0xff] %vm747_vm4, %v676_v34 }
  0xf6   : > { %1049 = vrot.lane.b32.xlu0 %v5119_v32, %s4879_s13 }
  0xf7   : > { %v674_v26 = vpop.permute.xlu1 %673 }
  0xf8   : > { %759 = vst.msk [vmem:[#allocation3 + $0x58] sm:$0xff] %vm747_vm4, %v674_v26  ;;  %v680_v27 = vpop.permute.xlu0 %679  ;;  %v5679_v26 = vld [vmem:[#allocation2 + $0x210] sm:$0xff] }
  0xf9   : > { %1047 = vrot.lane.b32.xlu1 %v5132_v39, %s4879_s13  ;;  %762 = vst.msk [vmem:[#allocation3 + $0x70] sm:$0xff] %vm747_vm4, %v680_v27 }
  0xfa   : > { %1053 = vrot.lane.b32.xlu0 %v5139_v40, %s4879_s13 }
  0xfb   : > { %v678_v30 = vpop.permute.xlu1 %677 }
  0xfc   : > { %761 = vst.msk [vmem:[#allocation3 + $0x68] sm:$0xff] %vm747_vm4, %v678_v30  ;;  %v684_v31 = vpop.permute.xlu0 %683  ;;  %v7422_v30 = vld [vmem:[#allocation13_spill] sm:$0xff] }
  0xfd   : > { %1051 = vrot.lane.b32.xlu1 %v5143_v41, %s4879_s13  ;;  %764 = vst.msk [vmem:[#allocation3 + $0x80] sm:$0xff] %vm747_vm4, %v684_v31 }
  0xfe   : > { %1057 = vrot.lane.b32.xlu0 %v5147_v42, %s4879_s13 }
  0xff   : > { %v682_v32 = vpop.permute.xlu1 %681 }
 0x100   : > { %763 = vst.msk [vmem:[#allocation3 + $0x78] sm:$0xff] %vm747_vm4, %v682_v32  ;;  %v688_v39 = vpop.permute.xlu0 %687 }
 0x101   : > { %1055 = vrot.lane.b32.xlu1 %v5151_v43, %s4879_s13  ;;  %766 = vst.msk [vmem:[#allocation3 + $0x90] sm:$0xff] %vm747_vm4, %v688_v39  ;;  %v7423_v39 = vld [vmem:[#allocation14_spill] sm:$0xff] }
 0x102   : > { %1061 = vrot.lane.b32.xlu0 %v5155_v44, %s4879_s13 }
 0x103   : > { %v686_v40 = vpop.permute.xlu1 %685 }
 0x104   : > { %765 = vst.msk [vmem:[#allocation3 + $0x88] sm:$0xff] %vm747_vm4, %v686_v40  ;;  %v692_v41 = vpop.permute.xlu0 %691  ;;  %v7424_v40 = vld [vmem:[#allocation15_spill] sm:$0xff] }
 0x105   : > { %1059 = vrot.lane.b32.xlu1 %v5161_v47, %s4879_s13  ;;  %768 = vst.msk [vmem:[#allocation3 + $0xa0] sm:$0xff] %vm747_vm4, %v692_v41 }
 0x106   : > { %1065 = vrot.lane.b32.xlu0 %v5171_v50, %s4879_s13 }
 0x107   : > { %v690_v42 = vpop.permute.xlu1 %689 }
 0x108   : > { %767 = vst.msk [vmem:[#allocation3 + $0x98] sm:$0xff] %vm747_vm4, %v690_v42  ;;  %v696_v43 = vpop.permute.xlu0 %695 }
 0x109   : > { %1063 = vrot.lane.b32.xlu1 %v5181_v53, %s4879_s13  ;;  %770 = vst.msk [vmem:[#allocation3 + $0xb0] sm:$0xff] %vm747_vm4, %v696_v43  ;;  %v7425_v43 = vld [vmem:[#allocation16_spill] sm:$0xff] }
 0x10a   : > { %1069 = vrot.lane.b32.xlu0 %v5191_v56, %s4879_s13 }
 0x10b   : > { %v694_v44 = vpop.permute.xlu1 %693 }
 0x10c   : > { %769 = vst.msk [vmem:[#allocation3 + $0xa8] sm:$0xff] %vm747_vm4, %v694_v44  ;;  %v700_v47 = vpop.permute.xlu0 %699  ;;  %v7426_v44 = vld [vmem:[#allocation17_spill] sm:$0xff] }
 0x10d   : > { %1067 = vrot.lane.b32.xlu1 %v5217_v63, %s4879_s13  ;;  %772 = vst.msk [vmem:[#allocation3 + $0xc0] sm:$0xff] %vm747_vm4, %v700_v47 }
 0x10e   : > { %1073 = vrot.lane.b32.xlu0 %v5267_v11, %s4879_s13 }
 0x10f   : > { %v698_v50 = vpop.permute.xlu1 %697 }
 0x110   : > { %771 = vst.msk [vmem:[#allocation3 + $0xb8] sm:$0xff] %vm747_vm4, %v698_v50  ;;  %v704_v53 = vpop.permute.xlu0 %703 }
 0x111   : > { %1071 = vrot.lane.b32.xlu1 %v5277_v14, %s4879_s13  ;;  %774 = vst.msk [vmem:[#allocation3 + $0xd0] sm:$0xff] %vm747_vm4, %v704_v53  ;;  %v7427_v53 = vld [vmem:[#allocation18_spill] sm:$0xff] }
 0x112   : > { %1077 = vrot.lane.b32.xlu0 %v5285_v15, %s4879_s13 }
 0x113   : > { %v702_v56 = vpop.permute.xlu1 %701 }
 0x114   : > { %773 = vst.msk [vmem:[#allocation3 + $0xc8] sm:$0xff] %vm747_vm4, %v702_v56  ;;  %v708_v63 = vpop.permute.xlu0 %707  ;;  %v7428_v56 = vld [vmem:[#allocation19_spill] sm:$0xff] }
 0x115   : > { %1075 = vrot.lane.b32.xlu1 %v5293_v18, %s4879_s13  ;;  %776 = vst.msk [vmem:[#allocation3 + $0xe0] sm:$0xff] %vm747_vm4, %v708_v63 }
 0x116   : > { %1081 = vrot.lane.b32.xlu0 %v5301_v19, %s4879_s13 }
 0x117   : > { %v706_v11 = vpop.permute.xlu1 %705 }
 0x118   : > { %775 = vst.msk [vmem:[#allocation3 + $0xd8] sm:$0xff] %vm747_vm4, %v706_v11  ;;  %v712_v14 = vpop.permute.xlu0 %711 }
 0x119   : > { %1079 = vrot.lane.b32.xlu1 %v5309_v22, %s4879_s13  ;;  %778 = vst.msk [vmem:[#allocation3 + $0xf0] sm:$0xff] %vm747_vm4, %v712_v14  ;;  %v7418_v22 = vld [vmem:[#allocation9_spill] sm:$0xff]  ;;  %v7429_v14 = vld [vmem:[#allocation20_spill] sm:$0xff] }
 0x11a   : > { %1085 = vrot.lane.b32.xlu0 %v5317_v23, %s4879_s13 }
 0x11b   : > { %v710_v15 = vpop.permute.xlu1 %709 }
 0x11c   : > { %777 = vst.msk [vmem:[#allocation3 + $0xe8] sm:$0xff] %vm747_vm4, %v710_v15  ;;  %v845_v18 = vpop.permute.xlu0 %844  ;;  %v7430_v15 = vld [vmem:[#allocation21_spill] sm:$0xff] }
 0x11d   : > { %1083 = vrot.lane.b32.xlu1 %v5325_v29, %s4879_s13  ;;  %941 = vst.msk [vmem:[#allocation3] sm:$0xff] %vm940_vm5, %v845_v18  ;;  %v5669_v29 = vld [vmem:[#allocation2 + $0x208] sm:$0xff] }
 0x11e   : > { %1089 = vrot.lane.b32.xlu0 %v5333_v33, %s4879_s13 }
 0x11f   : > { %v714_v19 = vpop.permute.xlu1 %713 }
 0x120   : > { %779 = vst.msk [vmem:[#allocation3 + $0xf8] sm:$0xff] %vm747_vm4, %v714_v19  ;;  %v849_v46 = vpop.permute.xlu0 %848  ;;  %vm3549_vm4 = vcmask 458112  }
 0x121   : > { %1087 = vrot.lane.b32.xlu1 %v7418_v22, %s4879_s13  ;;  %943 = vst.msk [vmem:[#allocation3 + $0x10] sm:$0xff] %vm940_vm5, %v849_v46  ;;  %v7431_v22 = vld [vmem:[#allocation22_spill] sm:$0xff]  ;;  %v7432_v46 = vld [vmem:[#allocation23_spill] sm:$0xff] }
 0x122   : > { %1093 = vrot.lane.b32.xlu0 %v7419_v35, %s4879_s13 }
 0x123   : > { %v847_v23 = vpop.permute.xlu1 %846 }
 0x124   : > { %942 = vst.msk [vmem:[#allocation3 + $0x8] sm:$0xff] %vm940_vm5, %v847_v23  ;;  %v853_v33 = vpop.permute.xlu0 %852 }
 0x125   : > { %1091 = vrot.lane.b32.xlu1 %v7420_v49, %s4879_s13  ;;  %945 = vst.msk [vmem:[#allocation3 + $0x20] sm:$0xff] %vm940_vm5, %v853_v33  ;;  %v7433_v49 = vld [vmem:[#allocation24_spill] sm:$0xff]  ;;  %v7434_v33 = vld [vmem:[#allocation25_spill] sm:$0xff] }
 0x126   : > { %1097 = vrot.lane.b32.xlu0 %v5669_v29, %s4879_s13 }
 0x127   : > { %v851_v48 = vpop.permute.xlu1 %850 }
 0x128   : > { %944 = vst.msk [vmem:[#allocation3 + $0x18] sm:$0xff] %vm940_vm5, %v851_v48  ;;  %v857_v34 = vpop.permute.xlu0 %856 }
 0x129   : > { %1095 = vrot.lane.b32.xlu1 %v7421_v25, %s4879_s13  ;;  %947 = vst.msk [vmem:[#allocation3 + $0x30] sm:$0xff] %vm940_vm5, %v857_v34  ;;  %v7435_v34 = vld [vmem:[#allocation26_spill] sm:$0xff] }
 0x12a   : > { %1230 = vrot.lane.b32.xlu0 %v7422_v30, %s4880_s14 }
 0x12b   : > { %v855_v27 = vpop.permute.xlu1 %854 }
 0x12c   : > { %946 = vst.msk [vmem:[#allocation3 + $0x28] sm:$0xff] %vm940_vm5, %v855_v27  ;;  %v861_v31 = vpop.permute.xlu0 %860  ;;  %v7436_v27 = vld [vmem:[#allocation27_spill] sm:$0xff] }
 0x12d   : > { %1099 = vrot.lane.b32.xlu1 %v5679_v26, %s4879_s13  ;;  %949 = vst.msk [vmem:[#allocation3 + $0x40] sm:$0xff] %vm940_vm5, %v861_v31 }
 0x12e   : > { %1234 = vrot.lane.b32.xlu0 %v7423_v39, %s4880_s14  ;;  %v7438_v39 = vld [vmem:[#allocation29_spill] sm:$0xff] }
 0x12f   : > { %v859_v32 = vpop.permute.xlu1 %858 }
 0x130   : > { %948 = vst.msk [vmem:[#allocation3 + $0x38] sm:$0xff] %vm940_vm5, %v859_v32  ;;  %v865_v41 = vpop.permute.xlu0 %864  ;;  %v7437_v32 = vld [vmem:[#allocation28_spill] sm:$0xff] }
 0x131   : > { %1232 = vrot.lane.b32.xlu1 %v7424_v40, %s4880_s14  ;;  %951 = vst.msk [vmem:[#allocation3 + $0x50] sm:$0xff] %vm940_vm5, %v865_v41 }
 0x132   : > { %1238 = vrot.lane.b32.xlu0 %v7425_v43, %s4880_s14  ;;  %v7440_v43 = vld [vmem:[#allocation31_spill] sm:$0xff] }
 0x133   : > { %v863_v42 = vpop.permute.xlu1 %862 }
 0x134   : > { %950 = vst.msk [vmem:[#allocation3 + $0x48] sm:$0xff] %vm940_vm5, %v863_v42  ;;  %v869_v47 = vpop.permute.xlu0 %868  ;;  %v7439_v42 = vld [vmem:[#allocation30_spill] sm:$0xff] }
 0x135   : > { %1236 = vrot.lane.b32.xlu1 %v7426_v44, %s4880_s14  ;;  %953 = vst.msk [vmem:[#allocation3 + $0x60] sm:$0xff] %vm940_vm5, %v869_v47 }
 0x136   : > { %1242 = vrot.lane.b32.xlu0 %v7427_v53, %s4880_s14  ;;  %v7442_v53 = vld [vmem:[#allocation33_spill] sm:$0xff] }
 0x137   : > { %v867_v50 = vpop.permute.xlu1 %866 }
 0x138   : > { %952 = vst.msk [vmem:[#allocation3 + $0x58] sm:$0xff] %vm940_vm5, %v867_v50  ;;  %v873_v63 = vpop.permute.xlu0 %872  ;;  %v7441_v50 = vld [vmem:[#allocation32_spill] sm:$0xff] }
 0x139   : > { %1240 = vrot.lane.b32.xlu1 %v7428_v56, %s4880_s14  ;;  %955 = vst.msk [vmem:[#allocation3 + $0x70] sm:$0xff] %vm940_vm5, %v873_v63 }
 0x13a   : > { %1246 = vrot.lane.b32.xlu0 %v7429_v14, %s4880_s14  ;;  %v7444_v14 = vld [vmem:[#allocation35_spill] sm:$0xff] }
 0x13b   : > { %v871_v11 = vpop.permute.xlu1 %870 }
 0x13c   : > { %954 = vst.msk [vmem:[#allocation3 + $0x68] sm:$0xff] %vm940_vm5, %v871_v11  ;;  %v877_v18 = vpop.permute.xlu0 %876  ;;  %v7443_v11 = vld [vmem:[#allocation34_spill] sm:$0xff] }
 0x13d   : > { %1244 = vrot.lane.b32.xlu1 %v7430_v15, %s4880_s14  ;;  %957 = vst.msk [vmem:[#allocation3 + $0x80] sm:$0xff] %vm940_vm5, %v877_v18 }
 0x13e   : > { %1250 = vrot.lane.b32.xlu0 %v7431_v22, %s4880_s14  ;;  %v7446_v22 = vld [vmem:[#allocation37_spill] sm:$0xff] }
 0x13f   : > { %v875_v19 = vpop.permute.xlu1 %874 }
 0x140   : > { %956 = vst.msk [vmem:[#allocation3 + $0x78] sm:$0xff] %vm940_vm5, %v875_v19  ;;  %v881_v23 = vpop.permute.xlu0 %880  ;;  %v7445_v19 = vld [vmem:[#allocation36_spill] sm:$0xff] }
 0x141   : > { %1248 = vrot.lane.b32.xlu1 %v7432_v46, %s4880_s14  ;;  %959 = vst.msk [vmem:[#allocation3 + $0x90] sm:$0xff] %vm940_vm5, %v881_v23 }
 0x142   : > { %1254 = vrot.lane.b32.xlu0 %v7433_v49, %s4880_s14 }
 0x143   : > { %v879_v35 = vpop.permute.xlu1 %878 }
 0x144   : > { %958 = vst.msk [vmem:[#allocation3 + $0x88] sm:$0xff] %vm940_vm5, %v879_v35  ;;  %v885_v48 = vpop.permute.xlu0 %884  ;;  %v7447_v35 = vld [vmem:[#allocation38_spill] sm:$0xff] }
 0x145   : > { %1252 = vrot.lane.b32.xlu1 %v7434_v33, %s4880_s14  ;;  %961 = vst.msk [vmem:[#allocation3 + $0xa0] sm:$0xff] %vm940_vm5, %v885_v48  ;;  %v5769_v48 = vld [vmem:[#allocation2 + $0x209] sm:$0xff] }
 0x146   : > { %1258 = vrot.lane.b32.xlu0 %v7435_v34, %s4880_s14  ;;  %v5779_v34 = vld [vmem:[#allocation2 + $0x211] sm:$0xff] }
 0x147   : > { %v883_v25 = vpop.permute.xlu1 %882 }
 0x148   : > { %960 = vst.msk [vmem:[#allocation3 + $0x98] sm:$0xff] %vm940_vm5, %v883_v25  ;;  %v889_v30 = vpop.permute.xlu0 %888 }
 0x149   : > { %1256 = vrot.lane.b32.xlu1 %v7436_v27, %s4880_s14  ;;  %963 = vst.msk [vmem:[#allocation3 + $0xb0] sm:$0xff] %vm940_vm5, %v889_v30 }
 0x14a   : > { %1262 = vrot.lane.b32.xlu0 %v7437_v32, %s4880_s14 }
 0x14b   : > { %v887_v31 = vpop.permute.xlu1 %886 }
 0x14c   : > { %962 = vst.msk [vmem:[#allocation3 + $0xa8] sm:$0xff] %vm940_vm5, %v887_v31  ;;  %v893_v40 = vpop.permute.xlu0 %892 }
 0x14d   : > { %1260 = vrot.lane.b32.xlu1 %v7438_v39, %s4880_s14  ;;  %965 = vst.msk [vmem:[#allocation3 + $0xc0] sm:$0xff] %vm940_vm5, %v893_v40  ;;  %v1746_v40 = vld [vmem:[#allocation2 + $0x49] sm:$0xff] }
 0x14e   : > { %1266 = vrot.lane.b32.xlu0 %v7439_v42, %s4880_s14 }
 0x14f   : > { %v891_v41 = vpop.permute.xlu1 %890 }
 0x150   : > { %964 = vst.msk [vmem:[#allocation3 + $0xb8] sm:$0xff] %vm940_vm5, %v891_v41  ;;  %v897_v44 = vpop.permute.xlu0 %896 }
 0x151   : > { %1264 = vrot.lane.b32.xlu1 %v7440_v43, %s4880_s14  ;;  %967 = vst.msk [vmem:[#allocation3 + $0xd0] sm:$0xff] %vm940_vm5, %v897_v44  ;;  %v1555_v43 = vld [vmem:[#allocation2 + $0x68] sm:$0xff] }
 0x152   : > { %1270 = vrot.lane.b32.xlu0 %v7441_v50, %s4880_s14 }
 0x153   : > { %v895_v47 = vpop.permute.xlu1 %894 }
 0x154   : > { %966 = vst.msk [vmem:[#allocation3 + $0xc8] sm:$0xff] %vm940_vm5, %v895_v47  ;;  %v901_v56 = vpop.permute.xlu0 %900  ;;  %v1749_v47 = vld [vmem:[#allocation2 + $0x71] sm:$0xff] }
 0x155   : > { %1268 = vrot.lane.b32.xlu1 %v7442_v53, %s4880_s14  ;;  %969 = vst.msk [vmem:[#allocation3 + $0xe0] sm:$0xff] %vm940_vm5, %v901_v56  ;;  %v1748_v53 = vld [vmem:[#allocation2 + $0x69] sm:$0xff] }
 0x156   : > { %1274 = vrot.lane.b32.xlu0 %v7443_v11, %s4880_s14 }
 0x157   : > { %v899_v63 = vpop.permute.xlu1 %898 }
 0x158   : > { %968 = vst.msk [vmem:[#allocation3 + $0xd8] sm:$0xff] %vm940_vm5, %v899_v63  ;;  %v905_v15 = vpop.permute.xlu0 %904  ;;  %v1558_v63 = vld [vmem:[#allocation2 + $0x90] sm:$0xff] }
 0x159   : > { %1272 = vrot.lane.b32.xlu1 %v7444_v14, %s4880_s14  ;;  %971 = vst.msk [vmem:[#allocation3 + $0xf0] sm:$0xff] %vm940_vm5, %v905_v15  ;;  %v1557_v14 = vld [vmem:[#allocation2 + $0x88] sm:$0xff] }
 0x15a   : > { %1278 = vrot.lane.b32.xlu0 %v7445_v19, %s4880_s14 }
 0x15b   : > { %v903_v18 = vpop.permute.xlu1 %902 }
 0x15c   : > { %970 = vst.msk [vmem:[#allocation3 + $0xe8] sm:$0xff] %vm940_vm5, %v903_v18  ;;  %v1038_v46 = vpop.permute.xlu0 %1037  ;;  %v1751_v18 = vld [vmem:[#allocation2 + $0x91] sm:$0xff] }
 0x15d   : > { %1276 = vrot.lane.b32.xlu1 %v7446_v22, %s4880_s14  ;;  %1134 = vst.msk [vmem:[#allocation3] sm:$0xff] %vm1133_vm6, %v1038_v46  ;;  %v1750_v22 = vld [vmem:[#allocation2 + $0x89] sm:$0xff] }
 0x15e   : > { %1282 = vrot.lane.b32.xlu0 %v5460_v36, %s4880_s14 }
 0x15f   : > { %v907_v23 = vpop.permute.xlu1 %906 }
 0x160   : > { %972 = vst.msk [vmem:[#allocation3 + $0xf8] sm:$0xff] %vm940_vm5, %v907_v23  ;;  %v1042_v49 = vpop.permute.xlu0 %1041  ;;  %v1560_v23 = vld [vmem:[#allocation2 + $0xb0] sm:$0xff]  ;;  %vm3742_vm5 = vcmask 523712  }
 0x161   : > { %1280 = vrot.lane.b32.xlu1 %v7447_v35, %s4880_s14  ;;  %1136 = vst.msk [vmem:[#allocation3 + $0x10] sm:$0xff] %vm1133_vm6, %v1042_v49  ;;  %v1559_v49 = vld [vmem:[#allocation2 + $0xa8] sm:$0xff] }
 0x162   : > { %1286 = vrot.lane.b32.xlu0 %v5470_v37, %s4880_s14 }
 0x163   : > { %v1040_v33 = vpop.permute.xlu1 %1039 }
 0x164   : > { %1135 = vst.msk [vmem:[#allocation3 + $0x8] sm:$0xff] %vm1133_vm6, %v1040_v33  ;;  %v1046_v36 = vpop.permute.xlu0 %1045 }
 0x165   : > { %1284 = vrot.lane.b32.xlu1 %v5474_v45, %s4880_s14  ;;  %1138 = vst.msk [vmem:[#allocation3 + $0x20] sm:$0xff] %vm1133_vm6, %v1046_v36  ;;  %v1753_v36 = vld [vmem:[#allocation2 + $0xb1] sm:$0xff] }
 0x166   : > { %1290 = vrot.lane.b32.xlu0 %v5769_v48, %s4880_s14 }
 0x167   : > { %v1044_v25 = vpop.permute.xlu1 %1043 }
 0x168   : > { %1137 = vst.msk [vmem:[#allocation3 + $0x18] sm:$0xff] %vm1133_vm6, %v1044_v25  ;;  %v1050_v37 = vpop.permute.xlu0 %1049 }
 0x169   : > { %1288 = vrot.lane.b32.xlu1 %v5482_v38, %s4880_s14  ;;  %1140 = vst.msk [vmem:[#allocation3 + $0x30] sm:$0xff] %vm1133_vm6, %v1050_v37  ;;  %v2004_v37 = vld [vmem:[%s7349_s1] sm:$0xff] }
 0x16a   : > { %1424 = vrot.lane.b32.xlu0 %v5175_v51, %s4881_s15 }
 0x16b   : > { %v1048_v27 = vpop.permute.xlu1 %1047 }
 0x16c   : > { %1139 = vst.msk [vmem:[#allocation3 + $0x28] sm:$0xff] %vm1133_vm6, %v1048_v27  ;;  %v1054_v45 = vpop.permute.xlu0 %1053  ;;  %v2005_v27 = vld [vmem:[%s7349_s1 + $0x8] sm:$0xff] }
 0x16d   : > { %1292 = vrot.lane.b32.xlu1 %v5779_v34, %s4880_s14  ;;  %1142 = vst.msk [vmem:[#allocation3 + $0x40] sm:$0xff] %vm1133_vm6, %v1054_v45  ;;  %v1752_v45 = vld [vmem:[#allocation2 + $0xa9] sm:$0xff] }
 0x16e   : > { %1428 = vrot.lane.b32.xlu0 %v5187_v54, %s4881_s15 }
 0x16f   : > { %v1052_v30 = vpop.permute.xlu1 %1051 }
 0x170   : > { %1141 = vst.msk [vmem:[#allocation3 + $0x38] sm:$0xff] %vm1133_vm6, %v1052_v30  ;;  %v1058_v38 = vpop.permute.xlu0 %1057  ;;  %v4693_v30 = vpack.c.bf16 %v2005_v27, %v2004_v37  ;;  %v1569_v37 = vld [vmem:[#allocation2 + $0x148] sm:$0xff] }
 0x171   : > { %1426 = vrot.lane.b32.xlu1 %v5177_v52, %s4881_s15  ;;  %1144 = vst.msk [vmem:[#allocation3 + $0x50] sm:$0xff] %vm1133_vm6, %v1058_v38 }
 0x172   : > { %1432 = vrot.lane.b32.xlu0 %v5197_v57, %s4881_s15  ;;  %4694 = vmatprep.subr.bf16.mxu0 %v4693_v30 }
 0x173   : > { %v1056_v51 = vpop.permute.xlu1 %1055  ;;  %4696 = vmatpush3.bf16.msra.mxu0 %v4693_v30 }
 0x174   : > { %1143 = vst.msk [vmem:[#allocation3 + $0x48] sm:$0xff] %vm1133_vm6, %v1056_v51  ;;  %v1062_v31 = vpop.permute.xlu0 %1061  ;;  %v1562_v51 = vld [vmem:[#allocation2 + $0xd0] sm:$0xff] }
 0x175   : > { %1430 = vrot.lane.b32.xlu1 %v5189_v55, %s4881_s15  ;;  %1146 = vst.msk [vmem:[#allocation3 + $0x60] sm:$0xff] %vm1133_vm6, %v1062_v31 }
 0x176   : > { %1436 = vrot.lane.b32.xlu0 %v5201_v59, %s4881_s15 }
 0x177   : > { %v1060_v54 = vpop.permute.xlu1 %1059 }
 0x178   : > { %1145 = vst.msk [vmem:[#allocation3 + $0x58] sm:$0xff] %vm1133_vm6, %v1060_v54  ;;  %v1066_v52 = vpop.permute.xlu0 %1065  ;;  %v2006_v54 = vld [vmem:[%s7349_s1 + $0x10] sm:$0xff] }
 0x179   : > { %1434 = vrot.lane.b32.xlu1 %v5199_v58, %s4881_s15  ;;  %1148 = vst.msk [vmem:[#allocation3 + $0x70] sm:$0xff] %vm1133_vm6, %v1066_v52  ;;  %v2007_v52 = vld [vmem:[%s7349_s1 + $0x18] sm:$0xff] }
 0x17a   : > { %1440 = vrot.lane.b32.xlu0 %v5213_v61, %s4881_s15 }
 0x17b   : > { %v1064_v57 = vpop.permute.xlu1 %1063 }
 0x17c   : > { %1147 = vst.msk [vmem:[#allocation3 + $0x68] sm:$0xff] %vm1133_vm6, %v1064_v57  ;;  %v1070_v55 = vpop.permute.xlu0 %1069  ;;  %v1561_v57 = vld [vmem:[#allocation2 + $0xc8] sm:$0xff] }
 0x17d   : > { %1438 = vrot.lane.b32.xlu1 %v5211_v60, %s4881_s15  ;;  %1150 = vst.msk [vmem:[#allocation3 + $0x80] sm:$0xff] %vm1133_vm6, %v1070_v55  ;;  %v4697_v55 = vpack.c.bf16 %v2007_v52, %v2006_v54  ;;  %v1571_v52 = vld [vmem:[#allocation2 + $0x168] sm:$0xff] }
 0x17e   : > { %1444 = vrot.lane.b32.xlu0 %v5225_v1, %s4881_s15 }
 0x17f   : > { %v1068_v59 = vpop.permute.xlu1 %1067  ;;  %4698 = vmatprep.subr.bf16.mxu0 %v4697_v55 }
 0x180   : > { %1149 = vst.msk [vmem:[#allocation3 + $0x78] sm:$0xff] %vm1133_vm6, %v1068_v59  ;;  %v1074_v58 = vpop.permute.xlu0 %1073  ;;  %4700 = vmatpush3.bf16.msra.mxu0 %v4697_v55  ;;  %v1765_v55 = vld [vmem:[#allocation2 + $0x171] sm:$0xff] }
 0x181   : > { %1442 = vrot.lane.b32.xlu1 %v5215_v62, %s4881_s15  ;;  %1152 = vst.msk [vmem:[#allocation3 + $0x90] sm:$0xff] %vm1133_vm6, %v1074_v58  ;;  %v1755_v58 = vld [vmem:[#allocation2 + $0xd1] sm:$0xff] }
 0x182   : > { %1448 = vrot.lane.b32.xlu0 %v5229_v3, %s4881_s15 }
 0x183   : > { %v1072_v61 = vpop.permute.xlu1 %1071 }
 0x184   : > { %1151 = vst.msk [vmem:[#allocation3 + $0x88] sm:$0xff] %vm1133_vm6, %v1072_v61  ;;  %v1078_v60 = vpop.permute.xlu0 %1077 }
 0x185   : > { %1446 = vrot.lane.b32.xlu1 %v5227_v2, %s4881_s15  ;;  %1154 = vst.msk [vmem:[#allocation3 + $0xa0] sm:$0xff] %vm1133_vm6, %v1078_v60  ;;  %v2008_v60 = vld [vmem:[%s7349_s1 + $0x20] sm:$0xff] }
 0x186   : > { %1452 = vrot.lane.b32.xlu0 %v5241_v5, %s4881_s15 }
 0x187   : > { %v1076_v1 = vpop.permute.xlu1 %1075 }
 0x188   : > { %1153 = vst.msk [vmem:[#allocation3 + $0x98] sm:$0xff] %vm1133_vm6, %v1076_v1  ;;  %v1082_v62 = vpop.permute.xlu0 %1081  ;;  %v2009_v1 = vld [vmem:[%s7349_s1 + $0x28] sm:$0xff] }
 0x189   : > { %1450 = vrot.lane.b32.xlu1 %v5239_v4, %s4881_s15  ;;  %1156 = vst.msk [vmem:[#allocation3 + $0xb0] sm:$0xff] %vm1133_vm6, %v1082_v62  ;;  %v1754_v62 = vld [vmem:[#allocation2 + $0xc9] sm:$0xff] }
 0x18a   : > { %1456 = vrot.lane.b32.xlu0 %v5251_v7, %s4881_s15 }
 0x18b   : > { %v1080_v3 = vpop.permute.xlu1 %1079 }
 0x18c   : > { %1155 = vst.msk [vmem:[#allocation3 + $0xa8] sm:$0xff] %vm1133_vm6, %v1080_v3  ;;  %v1086_v2 = vpop.permute.xlu0 %1085  ;;  %v4701_v3 = vpack.c.bf16 %v2009_v1, %v2008_v60  ;;  %v1574_v60 = vld [vmem:[#allocation2 + $0x190] sm:$0xff] }
 0x18d   : > { %1454 = vrot.lane.b32.xlu1 %v5243_v6, %s4881_s15  ;;  %1158 = vst.msk [vmem:[#allocation3 + $0xc0] sm:$0xff] %vm1133_vm6, %v1086_v2 }
 0x18e   : > { %1460 = vrot.lane.b32.xlu0 %v5255_v9, %s4881_s15  ;;  %4702 = vmatprep.subr.bf16.mxu0 %v4701_v3 }
 0x18f   : > { %v1084_v5 = vpop.permute.xlu1 %1083  ;;  %4704 = vmatpush3.bf16.msra.mxu0 %v4701_v3 }
 0x190   : > { %1157 = vst.msk [vmem:[#allocation3 + $0xb8] sm:$0xff] %vm1133_vm6, %v1084_v5  ;;  %v1090_v4 = vpop.permute.xlu0 %1089  ;;  %v1564_v5 = vld [vmem:[#allocation2 + $0xf0] sm:$0xff] }
 0x191   : > { %1458 = vrot.lane.b32.xlu1 %v5253_v8, %s4881_s15  ;;  %1160 = vst.msk [vmem:[#allocation3 + $0xd0] sm:$0xff] %vm1133_vm6, %v1090_v4 }
 0x192   : > { %1464 = vrot.lane.b32.xlu0 %v5273_v12, %s4881_s15 }
 0x193   : > { %v1088_v7 = vpop.permute.xlu1 %1087 }
 0x194   : > { %1159 = vst.msk [vmem:[#allocation3 + $0xc8] sm:$0xff] %vm1133_vm6, %v1088_v7  ;;  %v1094_v6 = vpop.permute.xlu0 %1093  ;;  %v2010_v7 = vld [vmem:[%s7349_s1 + $0x30] sm:$0xff] }
 0x195   : > { %1462 = vrot.lane.b32.xlu1 %v5265_v10, %s4881_s15  ;;  %1162 = vst.msk [vmem:[#allocation3 + $0xe0] sm:$0xff] %vm1133_vm6, %v1094_v6  ;;  %v2011_v6 = vld [vmem:[%s7349_s1 + $0x38] sm:$0xff] }
 0x196   : > { %1468 = vrot.lane.b32.xlu0 %v5289_v16, %s4881_s15 }
 0x197   : > { %v1092_v9 = vpop.permute.xlu1 %1091 }
 0x198   : > { %1161 = vst.msk [vmem:[#allocation3 + $0xd8] sm:$0xff] %vm1133_vm6, %v1092_v9  ;;  %v1098_v8 = vpop.permute.xlu0 %1097  ;;  %v1563_v9 = vld [vmem:[#allocation2 + $0xe8] sm:$0xff] }
 0x199   : > { %1466 = vrot.lane.b32.xlu1 %v5275_v13, %s4881_s15  ;;  %1164 = vst.msk [vmem:[#allocation3 + $0xf0] sm:$0xff] %vm1133_vm6, %v1098_v8  ;;  %v4705_v8 = vpack.c.bf16 %v2011_v6, %v2010_v7  ;;  %v1576_v6 = vld [vmem:[#allocation2 + $0x1b0] sm:$0xff] }
 0x19a   : > { %1472 = vrot.lane.b32.xlu0 %v5305_v20, %s4881_s15 }
 0x19b   : > { %v1096_v12 = vpop.permute.xlu1 %1095  ;;  %4706 = vmatprep.subr.bf16.mxu0 %v4705_v8 }
 0x19c   : > { %1163 = vst.msk [vmem:[#allocation3 + $0xe8] sm:$0xff] %vm1133_vm6, %v1096_v12  ;;  %v1231_v10 = vpop.permute.xlu0 %1230  ;;  %4708 = vmatpush3.bf16.msra.mxu0 %v4705_v8  ;;  %v1575_v8 = vld [vmem:[#allocation2 + $0x1a8] sm:$0xff] }
 0x19d   : > { %1470 = vrot.lane.b32.xlu1 %v5291_v17, %s4881_s15  ;;  %1327 = vst.msk [vmem:[#allocation3] sm:$0xff] %vm1326_vm7, %v1231_v10  ;;  %v1554_v17 = vld [vmem:[#allocation2 + $0x50] sm:$0xff] }
 0x19e   : > { %1476 = vrot.lane.b32.xlu0 %v5321_v24, %s4881_s15  ;;  %v1553_v24 = vld [vmem:[#allocation2 + $0x48] sm:$0xff]  ;;  %v1757_v10 = vld [vmem:[#allocation2 + $0xf1] sm:$0xff] }
 0x19f   : > { %v1100_v16 = vpop.permute.xlu1 %1099 }
 0x1a0   : > { %1165 = vst.msk [vmem:[#allocation3 + $0xf8] sm:$0xff] %vm1133_vm6, %v1100_v16  ;;  %v1235_v13 = vpop.permute.xlu0 %1234  ;;  %vm3935_vm6 = vcmask 589312  }
 0x1a1   : > { %1474 = vrot.lane.b32.xlu1 %v5307_v21, %s4881_s15  ;;  %1329 = vst.msk [vmem:[#allocation3 + $0x10] sm:$0xff] %vm1326_vm7, %v1235_v13  ;;  %v1747_v21 = vld [vmem:[#allocation2 + $0x51] sm:$0xff]  ;;  %v2012_v13 = vld [vmem:[%s7349_s1 + $0x40] sm:$0xff] }
 0x1a2   : > { %1480 = vrot.lane.b32.xlu0 %v5572_v0, %s4881_s15 }
 0x1a3   : > { %v1233_v20 = vpop.permute.xlu1 %1232 }
 0x1a4   : > { %1328 = vst.msk [vmem:[#allocation3 + $0x8] sm:$0xff] %vm1326_vm7, %v1233_v20  ;;  %v1239_v32 = vpop.permute.xlu0 %1238  ;;  %v2013_v20 = vld [vmem:[%s7349_s1 + $0x48] sm:$0xff] }
 0x1a5   : > { %1478 = vrot.lane.b32.xlu1 %v5323_v28, %s4881_s15  ;;  %1331 = vst.msk [vmem:[#allocation3 + $0x20] sm:$0xff] %vm1326_vm7, %v1239_v32  ;;  %v1556_v28 = vld [vmem:[#allocation2 + $0x70] sm:$0xff]  ;;  %v4709_v32 = vpack.c.bf16 %v2013_v20, %v2012_v13 }
 0x1a6   : > { %1619 = vrot.lane.b32.xlu0 %v1554_v17, %s4882_s16  ;;  %v1756_v17 = vld [vmem:[#allocation2 + $0xe9] sm:$0xff] }
 0x1a7   : > { %v1237_v39 = vpop.permute.xlu1 %1236  ;;  %4710 = vmatprep.subr.bf16.mxu0 %v4709_v32  ;;  %v1768_v13 = vld [vmem:[#allocation2 + $0x1a9] sm:$0xff] }
 0x1a8   : > { %1330 = vst.msk [vmem:[#allocation3 + $0x18] sm:$0xff] %vm1326_vm7, %v1237_v39  ;;  %v1243_v0 = vpop.permute.xlu0 %1242  ;;  %v1566_v39 = vld [vmem:[#allocation2 + $0x110] sm:$0xff]  ;;  %4712 = vmatpush3.bf16.msra.mxu0 %v4709_v32 }
 0x1a9   : > { %1617 = vrot.lane.b32.xlu1 %v1553_v24, %s4882_s16  ;;  %1333 = vst.msk [vmem:[#allocation3 + $0x30] sm:$0xff] %vm1326_vm7, %v1243_v0  ;;  %v2014_v0 = vld [vmem:[%s7349_s1 + $0x50] sm:$0xff] }
 0x1aa   : > { %1812 = vrot.lane.b32.xlu0 %v1747_v21, %s4883_s17 }
 0x1ab   : > { %v1241_v41 = vpop.permute.xlu1 %1240 }
 0x1ac   : > { %1332 = vst.msk [vmem:[#allocation3 + $0x28] sm:$0xff] %vm1326_vm7, %v1241_v41  ;;  %v1247_v42 = vpop.permute.xlu0 %1246  ;;  %v1565_v41 = vld [vmem:[#allocation2 + $0x108] sm:$0xff] }
 0x1ad   : > { %1810 = vrot.lane.b32.xlu1 %v1746_v40, %s4883_s17  ;;  %1335 = vst.msk [vmem:[#allocation3 + $0x40] sm:$0xff] %vm1326_vm7, %v1247_v42  ;;  %v2015_v40 = vld [vmem:[%s7349_s1 + $0x58] sm:$0xff] }
 0x1ae   : > { %1623 = vrot.lane.b32.xlu0 %v1556_v28, %s4882_s16  ;;  %v4713_v28 = vpack.c.bf16 %v2015_v40, %v2014_v0  ;;  %v1770_v40 = vld [vmem:[#allocation2 + $0x1c9] sm:$0xff] }
 0x1af   : > { %v1245_v44 = vpop.permute.xlu1 %1244 }
 0x1b0   : > { %1334 = vst.msk [vmem:[#allocation3 + $0x38] sm:$0xff] %vm1326_vm7, %v1245_v44  ;;  %v1251_v50 = vpop.permute.xlu0 %1250  ;;  %4714 = vmatprep.subr.bf16.mxu0 %v4713_v28 }
 0x1b1   : > { %1621 = vrot.lane.b32.xlu1 %v1555_v43, %s4882_s16  ;;  %1337 = vst.msk [vmem:[#allocation3 + $0x50] sm:$0xff] %vm1326_vm7, %v1251_v50  ;;  %v1759_v43 = vld [vmem:[#allocation2 + $0x111] sm:$0xff]  ;;  %4716 = vmatpush3.bf16.msra.mxu0 %v4713_v28  ;;  %v2017_v50 = vld [vmem:[%s7349_s1 + $0x68] sm:$0xff] }
 0x1b2   : > { %1816 = vrot.lane.b32.xlu0 %v1749_v47, %s4883_s17  ;;  %v2016_v47 = vld [vmem:[%s7349_s1 + $0x60] sm:$0xff]  ;;  %v1580_v28 = vld [vmem:[#allocation2 + $0x1f0] sm:$0xff] }
 0x1b3   : > { %v1249_v56 = vpop.permute.xlu1 %1248 }
 0x1b4   : > { %1336 = vst.msk [vmem:[#allocation3 + $0x48] sm:$0xff] %vm1326_vm7, %v1249_v56  ;;  %v1255_v11 = vpop.permute.xlu0 %1254  ;;  %v4717_v56 = vpack.c.bf16 %v2017_v50, %v2016_v47  ;;  %v1773_v47 = vld [vmem:[#allocation2 + $0x1f1] sm:$0xff] }
 0x1b5   : > { %1814 = vrot.lane.b32.xlu1 %v1748_v53, %s4883_s17  ;;  %1339 = vst.msk [vmem:[#allocation3 + $0x60] sm:$0xff] %vm1326_vm7, %v1255_v11  ;;  %v1758_v53 = vld [vmem:[#allocation2 + $0x109] sm:$0xff] }
 0x1b6   : > { %1627 = vrot.lane.b32.xlu0 %v1558_v63, %s4882_s16  ;;  %v1568_v11 = vld [vmem:[#allocation2 + $0x130] sm:$0xff]  ;;  %4718 = vmatprep.subr.bf16.mxu0 %v4717_v56 }
 0x1b7   : > { %v1253_v15 = vpop.permute.xlu1 %1252  ;;  %4720 = vmatpush3.bf16.msra.mxu0 %v4717_v56 }
 0x1b8   : > { %1338 = vst.msk [vmem:[#allocation3 + $0x58] sm:$0xff] %vm1326_vm7, %v1253_v15  ;;  %v1259_v19 = vpop.permute.xlu0 %1258  ;;  %v2018_v15 = vld [vmem:[%s7349_s1 + $0x70] sm:$0xff] }
 0x1b9   : > { %1625 = vrot.lane.b32.xlu1 %v1557_v14, %s4882_s16  ;;  %1341 = vst.msk [vmem:[#allocation3 + $0x70] sm:$0xff] %vm1326_vm7, %v1259_v19  ;;  %v1567_v19 = vld [vmem:[#allocation2 + $0x128] sm:$0xff] }
 0x1ba   : > { %1820 = vrot.lane.b32.xlu0 %v1751_v18, %s4883_s17  ;;  %v2019_v18 = vld [vmem:[%s7349_s1 + $0x78] sm:$0xff] }
 0x1bb   : > { %v1257_v46 = vpop.permute.xlu1 %1256 }
 0x1bc   : > { %1340 = vst.msk [vmem:[#allocation3 + $0x68] sm:$0xff] %vm1326_vm7, %v1257_v46  ;;  %v1263_v35 = vpop.permute.xlu0 %1262 }
 0x1bd   : > { %1818 = vrot.lane.b32.xlu1 %v1750_v22, %s4883_s17  ;;  %1343 = vst.msk [vmem:[#allocation3 + $0x80] sm:$0xff] %vm1326_vm7, %v1263_v35  ;;  %v4721_v22 = vpack.c.bf16 %v2019_v18, %v2018_v15 }
 0x1be   : > { %1631 = vrot.lane.b32.xlu0 %v1560_v23, %s4882_s16  ;;  %v1761_v23 = vld [vmem:[#allocation2 + $0x131] sm:$0xff] }
 0x1bf   : > { %v1261_v33 = vpop.permute.xlu1 %1260  ;;  %4722 = vmatprep.subr.bf16.mxu0 %v4721_v22 }
 0x1c0   : > { %1342 = vst.msk [vmem:[#allocation3 + $0x78] sm:$0xff] %vm1326_vm7, %v1261_v33  ;;  %v1267_v25 = vpop.permute.xlu0 %1266  ;;  %4724 = vmatpush3.bf16.msra.mxu0 %v4721_v22 }
 0x1c1   : > { %1629 = vrot.lane.b32.xlu1 %v1559_v49, %s4882_s16  ;;  %1345 = vst.msk [vmem:[#allocation3 + $0x90] sm:$0xff] %vm1326_vm7, %v1267_v25  ;;  %v1760_v49 = vld [vmem:[#allocation2 + $0x129] sm:$0xff] }
 0x1c2   : > { %1824 = vrot.lane.b32.xlu0 %v1753_v36, %s4883_s17  ;;  %v1570_v36 = vld [vmem:[#allocation2 + $0x150] sm:$0xff] }
 0x1c3   : > { %v1265_v38 = vpop.permute.xlu1 %1264 }
 0x1c4   : > { %1344 = vst.msk [vmem:[#allocation3 + $0x88] sm:$0xff] %vm1326_vm7, %v1265_v38  ;;  %v1271_v31 = vpop.permute.xlu0 %1270  ;;  %v1762_v38 = vld [vmem:[#allocation2 + $0x149] sm:$0xff] }
 0x1c5   : > { %1822 = vrot.lane.b32.xlu1 %v1752_v45, %s4883_s17  ;;  %1347 = vst.msk [vmem:[#allocation3 + $0xa0] sm:$0xff] %vm1326_vm7, %v1271_v31  ;;  %v1763_v45 = vld [vmem:[#allocation2 + $0x151] sm:$0xff] }
 0x1c6   : > { %1635 = vrot.lane.b32.xlu0 %v1562_v51, %s4882_s16  ;;  %v1572_v31 = vld [vmem:[#allocation2 + $0x170] sm:$0xff] }
 0x1c7   : > { %v1269_v59 = vpop.permute.xlu1 %1268 }
 0x1c8   : > { %1346 = vst.msk [vmem:[#allocation3 + $0x98] sm:$0xff] %vm1326_vm7, %v1269_v59  ;;  %v1275_v61 = vpop.permute.xlu0 %1274 }
 0x1c9   : > { %1633 = vrot.lane.b32.xlu1 %v1561_v57, %s4882_s16  ;;  %1349 = vst.msk [vmem:[#allocation3 + $0xb0] sm:$0xff] %vm1326_vm7, %v1275_v61 }
 0x1ca   : > { %1828 = vrot.lane.b32.xlu0 %v1755_v58, %s4883_s17  ;;  %v1764_v58 = vld [vmem:[#allocation2 + $0x169] sm:$0xff] }
 0x1cb   : > { %v1273_v2 = vpop.permute.xlu1 %1272 }
 0x1cc   : > { %1348 = vst.msk [vmem:[#allocation3 + $0xa8] sm:$0xff] %vm1326_vm7, %v1273_v2  ;;  %v1279_v4 = vpop.permute.xlu0 %1278  ;;  %v1767_v2 = vld [vmem:[#allocation2 + $0x191] sm:$0xff] }
 0x1cd   : > { %1826 = vrot.lane.b32.xlu1 %v1754_v62, %s4883_s17  ;;  %1351 = vst.msk [vmem:[#allocation3 + $0xc0] sm:$0xff] %vm1326_vm7, %v1279_v4  ;;  %v1573_v62 = vld [vmem:[#allocation2 + $0x188] sm:$0xff] }
 0x1ce   : > { %1639 = vrot.lane.b32.xlu0 %v1564_v5, %s4882_s16  ;;  %v1766_v4 = vld [vmem:[#allocation2 + $0x189] sm:$0xff] }
 0x1cf   : > { %v1277_v12 = vpop.permute.xlu1 %1276 }
 0x1d0   : > { %1350 = vst.msk [vmem:[#allocation3 + $0xb8] sm:$0xff] %vm1326_vm7, %v1277_v12  ;;  %v1283_v16 = vpop.permute.xlu0 %1282 }
 0x1d1   : > { %1637 = vrot.lane.b32.xlu1 %v1563_v9, %s4882_s16  ;;  %1353 = vst.msk [vmem:[#allocation3 + $0xd0] sm:$0xff] %vm1326_vm7, %v1283_v16 }
 0x1d2   : > { %1832 = vrot.lane.b32.xlu0 %v1757_v10, %s4883_s17  ;;  %v1769_v10 = vld [vmem:[#allocation2 + $0x1b1] sm:$0xff] }
 0x1d3   : > { %v1281_v24 = vpop.permute.xlu1 %1280 }
 0x1d4   : > { %1352 = vst.msk [vmem:[#allocation3 + $0xc8] sm:$0xff] %vm1326_vm7, %v1281_v24  ;;  %v1287_v21 = vpop.permute.xlu0 %1286  ;;  %v1577_v24 = vld [vmem:[#allocation2 + $0x1c8] sm:$0xff] }
 0x1d5   : > { %1830 = vrot.lane.b32.xlu1 %v1756_v17, %s4883_s17  ;;  %1355 = vst.msk [vmem:[#allocation3 + $0xe0] sm:$0xff] %vm1326_vm7, %v1287_v21  ;;  %v1578_v17 = vld [vmem:[#allocation2 + $0x1d0] sm:$0xff] }
 0x1d6   : > { %1643 = vrot.lane.b32.xlu0 %v1566_v39, %s4882_s16  ;;  %v1771_v21 = vld [vmem:[#allocation2 + $0x1d1] sm:$0xff] }
 0x1d7   : > { %v1285_v42 = vpop.permute.xlu1 %1284 }
 0x1d8   : > { %1354 = vst.msk [vmem:[#allocation3 + $0xd8] sm:$0xff] %vm1326_vm7, %v1285_v42  ;;  %v1291_v44 = vpop.permute.xlu0 %1290 }
 0x1d9   : > { %1641 = vrot.lane.b32.xlu1 %v1565_v41, %s4882_s16  ;;  %1357 = vst.msk [vmem:[#allocation3 + $0xf0] sm:$0xff] %vm1326_vm7, %v1291_v44 }
 0x1da   : > { %1836 = vrot.lane.b32.xlu0 %v1759_v43, %s4883_s17  ;;  %v1579_v43 = vld [vmem:[#allocation2 + $0x1e8] sm:$0xff] }
 0x1db   : > { %v1289_v63 = vpop.permute.xlu1 %1288 }
 0x1dc   : > { %1356 = vst.msk [vmem:[#allocation3 + $0xe8] sm:$0xff] %vm1326_vm7, %v1289_v63  ;;  %v1425_v14 = vpop.permute.xlu0 %1424 }
 0x1dd   : > { %1834 = vrot.lane.b32.xlu1 %v1758_v53, %s4883_s17  ;;  %1521 = vst.msk [vmem:[#allocation3] sm:$0xff] %vm1520_vm8, %v1425_v14  ;;  %v1772_v53 = vld [vmem:[#allocation2 + $0x1e9] sm:$0xff] }
 0x1de   : > { %1647 = vrot.lane.b32.xlu0 %v1568_v11, %s4882_s16  ;;  %v1389_v11 = vld [vmem:[#allocation2 + $0x20f] sm:$0xff] }
 0x1df   : > { %v1293_v46 = vpop.permute.xlu1 %1292 }
 0x1e0   : > { %1358 = vst.msk [vmem:[#allocation3 + $0xf8] sm:$0xff] %vm1326_vm7, %v1293_v46  ;;  %v1429_v35 = vpop.permute.xlu0 %1428  ;;  %v7448_v46 = vmov 0.0   ;;  %vm3968_vm7 = vcmask 1048128  }
 0x1e1   : > { %1645 = vrot.lane.b32.xlu1 %v1567_v19, %s4882_s16  ;;  %1523 = vst.msk [vmem:[#allocation3 + $0x10] sm:$0xff] %vm1520_vm8, %v1429_v35  ;;  %v1390_v19 = vld [vmem:[#allocation2 + $0x227] sm:$0xff] }
 0x1e2   : > { %1840 = vrot.lane.b32.xlu0 %v1761_v23, %s4883_s17  ;;  %2318 = vst.msk [vmem:[#allocation4 + $0x7] sm:$0xff] %vm2285_vm12, %v7448_v46  ;;  %2319 = vst.msk [vmem:[#allocation4 + $0xf] sm:$0xff] %vm2285_vm12, %v7448_v46 }
 0x1e3   : > { %v1427_v33 = vpop.permute.xlu1 %1426  ;;  %2323 = vst.msk [vmem:[#allocation4 + $0x227] sm:$0xff] %vm2285_vm12, %v7448_v46  ;;  %2324 = vst.msk [vmem:[#allocation4 + $0x22f] sm:$0xff] %vm2285_vm12, %v7448_v46 }
 0x1e4   : > { %1522 = vst.msk [vmem:[#allocation3 + $0x8] sm:$0xff] %vm1520_vm8, %v1427_v33  ;;  %v1433_v25 = vpop.permute.xlu0 %1432 }
 0x1e5   : > { %1838 = vrot.lane.b32.xlu1 %v1760_v49, %s4883_s17  ;;  %1525 = vst.msk [vmem:[#allocation3 + $0x20] sm:$0xff] %vm1520_vm8, %v1433_v25 }
 0x1e6   : > { %1651 = vrot.lane.b32.xlu0 %v1570_v36, %s4882_s16  ;;  %2321 = vst.msk [vmem:[#allocation4 + $0x17] sm:$0x3] %vm2320_vm13, %v7448_v46  ;;  %2325 = vst.msk [vmem:[#allocation4 + $0x237] sm:$0x3] %vm2320_vm13, %v7448_v46 }
 0x1e7   : > { %v1431_v27 = vpop.permute.xlu1 %1430  ;;  %2343 = vst.msk [vmem:[#allocation4 + $0x38] sm:$0x1] %vm2326_vm14, %v7448_v46  ;;  %2327 = vst.msk [vmem:[#allocation4 + $0x27] sm:$0x1] %vm2326_vm14, %v7448_v46 }
 0x1e8   : > { %1524 = vst.msk [vmem:[#allocation3 + $0x18] sm:$0xff] %vm1520_vm8, %v1431_v27  ;;  %v1437_v30 = vpop.permute.xlu0 %1436 }
 0x1e9   : > { %1649 = vrot.lane.b32.xlu1 %v1569_v37, %s4882_s16  ;;  %1527 = vst.msk [vmem:[#allocation3 + $0x30] sm:$0xff] %vm1520_vm8, %v1437_v30 }
 0x1ea   : > { %1844 = vrot.lane.b32.xlu0 %v1763_v45, %s4883_s17  ;;  %2328 = vst.msk [vmem:[#allocation4 + $0x47] sm:$0x1] %vm2326_vm14, %v7448_v46  ;;  %2329 = vst.msk [vmem:[#allocation4 + $0x67] sm:$0x1] %vm2326_vm14, %v7448_v46 }
 0x1eb   : > { %v1435_v51 = vpop.permute.xlu1 %1434  ;;  %2330 = vst.msk [vmem:[#allocation4 + $0x87] sm:$0x1] %vm2326_vm14, %v7448_v46  ;;  %2331 = vst.msk [vmem:[#allocation4 + $0xa7] sm:$0x1] %vm2326_vm14, %v7448_v46 }
 0x1ec   : > { %1526 = vst.msk [vmem:[#allocation3 + $0x28] sm:$0xff] %vm1520_vm8, %v1435_v51  ;;  %v1441_v54 = vpop.permute.xlu0 %1440 }
 0x1ed   : > { %1842 = vrot.lane.b32.xlu1 %v1762_v38, %s4883_s17  ;;  %1529 = vst.msk [vmem:[#allocation3 + $0x40] sm:$0xff] %vm1520_vm8, %v1441_v54 }
 0x1ee   : > { %1655 = vrot.lane.b32.xlu0 %v1572_v31, %s4882_s16  ;;  %2332 = vst.msk [vmem:[#allocation4 + $0xc7] sm:$0x1] %vm2326_vm14, %v7448_v46  ;;  %2333 = vst.msk [vmem:[#allocation4 + $0xe7] sm:$0x1] %vm2326_vm14, %v7448_v46 }
 0x1ef   : > { %v1439_v57 = vpop.permute.xlu1 %1438  ;;  %2334 = vst.msk [vmem:[#allocation4 + $0x107] sm:$0x1] %vm2326_vm14, %v7448_v46  ;;  %2335 = vst.msk [vmem:[#allocation4 + $0x127] sm:$0x1] %vm2326_vm14, %v7448_v46 }
 0x1f0   : > { %1528 = vst.msk [vmem:[#allocation3 + $0x38] sm:$0xff] %vm1520_vm8, %v1439_v57  ;;  %v1445_v59 = vpop.permute.xlu0 %1444 }
 0x1f1   : > { %1653 = vrot.lane.b32.xlu1 %v1571_v52, %s4882_s16  ;;  %1531 = vst.msk [vmem:[#allocation3 + $0x50] sm:$0xff] %vm1520_vm8, %v1445_v59 }
 0x1f2   : > { %1848 = vrot.lane.b32.xlu0 %v1765_v55, %s4883_s17  ;;  %2336 = vst.msk [vmem:[#allocation4 + $0x147] sm:$0x1] %vm2326_vm14, %v7448_v46  ;;  %2337 = vst.msk [vmem:[#allocation4 + $0x167] sm:$0x1] %vm2326_vm14, %v7448_v46 }
 0x1f3   : > { %v1443_v61 = vpop.permute.xlu1 %1442  ;;  %2338 = vst.msk [vmem:[#allocation4 + $0x187] sm:$0x1] %vm2326_vm14, %v7448_v46  ;;  %2339 = vst.msk [vmem:[#allocation4 + $0x1a7] sm:$0x1] %vm2326_vm14, %v7448_v46 }
 0x1f4   : > { %1530 = vst.msk [vmem:[#allocation3 + $0x48] sm:$0xff] %vm1520_vm8, %v1443_v61  ;;  %v1449_v1 = vpop.permute.xlu0 %1448 }
 0x1f5   : > { %1846 = vrot.lane.b32.xlu1 %v1764_v58, %s4883_s17  ;;  %1533 = vst.msk [vmem:[#allocation3 + $0x60] sm:$0xff] %vm1520_vm8, %v1449_v1 }
 0x1f6   : > { %1659 = vrot.lane.b32.xlu0 %v1574_v60, %s4882_s16  ;;  %2340 = vst.msk [vmem:[#allocation4 + $0x1c7] sm:$0x1] %vm2326_vm14, %v7448_v46  ;;  %2341 = vst.msk [vmem:[#allocation4 + $0x1e7] sm:$0x1] %vm2326_vm14, %v7448_v46 }
 0x1f7   : > { %v1447_v3 = vpop.permute.xlu1 %1446  ;;  %2342 = vst.msk [vmem:[#allocation4 + $0x207] sm:$0x1] %vm2326_vm14, %v7448_v46  ;;  %2344 = vst.msk [vmem:[#allocation4 + $0x58] sm:$0x1] %vm2326_vm14, %v7448_v46 }
 0x1f8   : > { %1532 = vst.msk [vmem:[#allocation3 + $0x58] sm:$0xff] %vm1520_vm8, %v1447_v3  ;;  %v1453_v5 = vpop.permute.xlu0 %1452 }
 0x1f9   : > { %1657 = vrot.lane.b32.xlu1 %v1573_v62, %s4882_s16  ;;  %1535 = vst.msk [vmem:[#allocation3 + $0x70] sm:$0xff] %vm1520_vm8, %v1453_v5 }
 0x1fa   : > { %1852 = vrot.lane.b32.xlu0 %v1767_v2, %s4883_s17  ;;  %2345 = vst.msk [vmem:[#allocation4 + $0x78] sm:$0x1] %vm2326_vm14, %v7448_v46  ;;  %2346 = vst.msk [vmem:[#allocation4 + $0x98] sm:$0x1] %vm2326_vm14, %v7448_v46 }
 0x1fb   : > { %v1451_v7 = vpop.permute.xlu1 %1450  ;;  %2347 = vst.msk [vmem:[#allocation4 + $0xb8] sm:$0x1] %vm2326_vm14, %v7448_v46  ;;  %2348 = vst.msk [vmem:[#allocation4 + $0xd8] sm:$0x1] %vm2326_vm14, %v7448_v46 }
 0x1fc   : > { %1534 = vst.msk [vmem:[#allocation3 + $0x68] sm:$0xff] %vm1520_vm8, %v1451_v7  ;;  %v1457_v9 = vpop.permute.xlu0 %1456 }
 0x1fd   : > { %1850 = vrot.lane.b32.xlu1 %v1766_v4, %s4883_s17  ;;  %1537 = vst.msk [vmem:[#allocation3 + $0x80] sm:$0xff] %vm1520_vm8, %v1457_v9 }
 0x1fe   : > { %1663 = vrot.lane.b32.xlu0 %v1576_v6, %s4882_s16  ;;  %2349 = vst.msk [vmem:[#allocation4 + $0xf8] sm:$0x1] %vm2326_vm14, %v7448_v46  ;;  %2350 = vst.msk [vmem:[#allocation4 + $0x118] sm:$0x1] %vm2326_vm14, %v7448_v46 }
 0x1ff   : > { %v1455_v12 = vpop.permute.xlu1 %1454  ;;  %2351 = vst.msk [vmem:[#allocation4 + $0x138] sm:$0x1] %vm2326_vm14, %v7448_v46  ;;  %2352 = vst.msk [vmem:[#allocation4 + $0x158] sm:$0x1] %vm2326_vm14, %v7448_v46 }
 0x200   : > { %1536 = vst.msk [vmem:[#allocation3 + $0x78] sm:$0xff] %vm1520_vm8, %v1455_v12  ;;  %v1461_v16 = vpop.permute.xlu0 %1460 }
 0x201   : > { %1661 = vrot.lane.b32.xlu1 %v1575_v8, %s4882_s16  ;;  %1539 = vst.msk [vmem:[#allocation3 + $0x90] sm:$0xff] %vm1520_vm8, %v1461_v16 }
 0x202   : > { %1856 = vrot.lane.b32.xlu0 %v1769_v10, %s4883_s17  ;;  %2353 = vst.msk [vmem:[#allocation4 + $0x178] sm:$0x1] %vm2326_vm14, %v7448_v46  ;;  %2354 = vst.msk [vmem:[#allocation4 + $0x198] sm:$0x1] %vm2326_vm14, %v7448_v46 }
 0x203   : > { %v1459_v20 = vpop.permute.xlu1 %1458  ;;  %2355 = vst.msk [vmem:[#allocation4 + $0x1b8] sm:$0x1] %vm2326_vm14, %v7448_v46  ;;  %2356 = vst.msk [vmem:[#allocation4 + $0x1d8] sm:$0x1] %vm2326_vm14, %v7448_v46 }
 0x204   : > { %1538 = vst.msk [vmem:[#allocation3 + $0x88] sm:$0xff] %vm1520_vm8, %v1459_v20  ;;  %v1465_v32 = vpop.permute.xlu0 %1464 }
 0x205   : > { %1854 = vrot.lane.b32.xlu1 %v1768_v13, %s4883_s17  ;;  %1541 = vst.msk [vmem:[#allocation3 + $0xa0] sm:$0xff] %vm1520_vm8, %v1465_v32 }
 0x206   : > { %1667 = vrot.lane.b32.xlu0 %v1578_v17, %s4882_s16  ;;  %2357 = vst.msk [vmem:[#allocation4 + $0x1f8] sm:$0x1] %vm2326_vm14, %v7448_v46  ;;  %2358 = vst.msk [vmem:[#allocation4 + $0x218] sm:$0x1] %vm2326_vm14, %v7448_v46 }
 0x207   : > { %v1463_v39 = vpop.permute.xlu1 %1462 }
 0x208   : > { %1540 = vst.msk [vmem:[#allocation3 + $0x98] sm:$0xff] %vm1520_vm8, %v1463_v39  ;;  %v1469_v0 = vpop.permute.xlu0 %1468 }
 0x209   : > { %1665 = vrot.lane.b32.xlu1 %v1577_v24, %s4882_s16  ;;  %1543 = vst.msk [vmem:[#allocation3 + $0xb0] sm:$0xff] %vm1520_vm8, %v1469_v0 }
 0x20a   : > { %1860 = vrot.lane.b32.xlu0 %v1771_v21, %s4883_s17 }
 0x20b   : > { %v1467_v41 = vpop.permute.xlu1 %1466 }
 0x20c   : > { %1542 = vst.msk [vmem:[#allocation3 + $0xa8] sm:$0xff] %vm1520_vm8, %v1467_v41  ;;  %v1473_v42 = vpop.permute.xlu0 %1472 }
 0x20d   : > { %1858 = vrot.lane.b32.xlu1 %v1770_v40, %s4883_s17  ;;  %1545 = vst.msk [vmem:[#allocation3 + $0xc0] sm:$0xff] %vm1520_vm8, %v1473_v42 }
 0x20e   : > { %1671 = vrot.lane.b32.xlu0 %v1580_v28, %s4882_s16 }
 0x20f   : > { %v1471_v44 = vpop.permute.xlu1 %1470 }
 0x210   : > { %1544 = vst.msk [vmem:[#allocation3 + $0xb8] sm:$0xff] %vm1520_vm8, %v1471_v44  ;;  %v1477_v50 = vpop.permute.xlu0 %1476 }
 0x211   : > { %1669 = vrot.lane.b32.xlu1 %v1579_v43, %s4882_s16  ;;  %1547 = vst.msk [vmem:[#allocation3 + $0xd0] sm:$0xff] %vm1520_vm8, %v1477_v50 }
 0x212   : > { %1864 = vrot.lane.b32.xlu0 %v1773_v47, %s4883_s17 }
 0x213   : > { %v1475_v56 = vpop.permute.xlu1 %1474 }
 0x214   : > { %1546 = vst.msk [vmem:[#allocation3 + $0xc8] sm:$0xff] %vm1520_vm8, %v1475_v56  ;;  %v1481_v63 = vpop.permute.xlu0 %1480 }
 0x215   : > { %1862 = vrot.lane.b32.xlu1 %v1772_v53, %s4883_s17  ;;  %1549 = vst.msk [vmem:[#allocation3 + $0xe0] sm:$0xff] %vm1520_vm8, %v1481_v63 }
 0x216   : > { %1673 = vrot.lane.b32.xlu0 %v5669_v29, %s4882_s16 }
 0x217   : > { %v1479_v14 = vpop.permute.xlu1 %1478 }
 0x218   : > { %1548 = vst.msk [vmem:[#allocation3 + $0xd8] sm:$0xff] %vm1520_vm8, %v1479_v14  ;;  %v1620_v15 = vpop.permute.xlu0 %1619 }
 0x219   : > { %1482 = vrot.lane.b32.xlu1 %v1389_v11, %s4881_s15  ;;  %1715 = vst.msk [vmem:[#allocation3 + $0x8] sm:$0xff] %vm1713_vm9, %v1620_v15 }
 0x21a   : > { %1866 = vrot.lane.b32.xlu0 %v5769_v48, %s4883_s17  ;;  %v1391_v48 = vld [vmem:[#allocation2 + $0x22f] sm:$0xff] }
 0x21b   : > { %v1618_v18 = vpop.permute.xlu1 %1617 }
 0x21c   : > { %1714 = vst.msk [vmem:[#allocation3] sm:$0xff] %vm1713_vm9, %v1618_v18  ;;  %v1813_v29 = vpop.permute.xlu0 %1812 }
 0x21d   : > { %1675 = vrot.lane.b32.xlu1 %v5679_v26, %s4882_s16  ;;  %1908 = vst.msk [vmem:[#allocation3 + $0x8] sm:$0xff] %vm1906_vm11, %v1813_v29 }
 0x21e   : > { %1941 = vst.msk [vmem:[#allocation3 + $0x8] sm:$0xff] %vm1939_vm10, %v7448_v46  ;;  %1484 = vrot.lane.b32.xlu0 %v1390_v19, %s4881_s15 }
 0x21f   : > { %v1811_v22 = vpop.permute.xlu1 %1810 }
 0x220   : > { %1907 = vst.msk [vmem:[#allocation3] sm:$0xff] %vm1906_vm11, %v1811_v22  ;;  %v1624_v26 = vpop.permute.xlu0 %1623 }
 0x221   : > { %1940 = vst.msk [vmem:[#allocation3] sm:$0xff] %vm1939_vm10, %v7448_v46  ;;  %1868 = vrot.lane.b32.xlu1 %v5779_v34, %s4883_s17 }
 0x222   : > { %1717 = vst.msk [vmem:[#allocation3 + $0x18] sm:$0xff] %vm1713_vm9, %v1624_v26 }
 0x223   : > { %v1622_v23 = vpop.permute.xlu1 %1621 }
 0x224   : > { %1716 = vst.msk [vmem:[#allocation3 + $0x10] sm:$0xff] %vm1713_vm9, %v1622_v23  ;;  %v1817_v35 = vpop.permute.xlu0 %1816 }
 0x225   : > { %1486 = vrot.lane.b32.xlu1 %v1391_v48, %s4881_s15  ;;  %1910 = vst.msk [vmem:[#allocation3 + $0x18] sm:$0xff] %vm1906_vm11, %v1817_v35  ;;  %v1973_v33 = vld [vmem:[#allocation3 + $0x8] sm:$0xff] }
 0x226   : > { %1943 = vst.msk [vmem:[#allocation3 + $0x18] sm:$0xff] %vm1939_vm10, %v7448_v46 }
 0x227   : > { %v1815_v49 = vpop.permute.xlu1 %1814 }
 0x228   : > { %1909 = vst.msk [vmem:[#allocation3 + $0x10] sm:$0xff] %vm1906_vm11, %v1815_v49  ;;  %v1972_v34 = vld [vmem:[#allocation3] sm:$0xff]  ;;  %v1628_v36 = vpop.permute.xlu0 %1627 }
 0x229   : > { %1942 = vst.msk [vmem:[#allocation3 + $0x10] sm:$0xff] %vm1939_vm10, %v7448_v46  ;;  %4565 = vmatprep.mubr.f32.mxu0 %v1972_v34 }
 0x22a   : > { %1719 = vst.msk [vmem:[#allocation3 + $0x28] sm:$0xff] %vm1713_vm9, %v1628_v36  ;;  %4566 = vmatmul.mubr.f32.vlgmr.msra.gmra.mrb[0].mxu0 %v1973_v33 }
 0x22b   : > { %v1626_v25 = vpop.permute.xlu1 %1625 }
 0x22c   : > { %1718 = vst.msk [vmem:[#allocation3 + $0x20] sm:$0xff] %vm1713_vm9, %v1626_v25  ;;  %v1821_v37 = vpop.permute.xlu0 %1820 }
 0x22d   : > { %1912 = vst.msk [vmem:[#allocation3 + $0x28] sm:$0xff] %vm1906_vm11, %v1821_v37  ;;  %v1975_v45 = vld [vmem:[#allocation3 + $0x18] sm:$0xff] }
 0x22e   : > { %1945 = vst.msk [vmem:[#allocation3 + $0x28] sm:$0xff] %vm1939_vm10, %v7448_v46 }
 0x22f   : > { %v1819_v27 = vpop.permute.xlu1 %1818 }
 0x230   : > { %1911 = vst.msk [vmem:[#allocation3 + $0x20] sm:$0xff] %vm1906_vm11, %v1819_v27  ;;  %v1974_v30 = vld [vmem:[#allocation3 + $0x10] sm:$0xff]  ;;  %v1632_v38 = vpop.permute.xlu0 %1631 }
 0x231   : > { %1944 = vst.msk [vmem:[#allocation3 + $0x20] sm:$0xff] %vm1939_vm10, %v7448_v46  ;;  %4568 = vmatprep.mubr.f32.mxu0 %v1974_v30  ;;  %v1583_v30 = vld [vmem:[#allocation2 + $0x228] sm:$0xff] }
 0x232   : > { %1721 = vst.msk [vmem:[#allocation3 + $0x38] sm:$0xff] %vm1713_vm9, %v1632_v38  ;;  %4569 = vmatmul.mubr.f32.gmra.mrb[2].mxu0 %v1975_v45  ;;  %v1584_v38 = vld [vmem:[#allocation2 + $0x230] sm:$0xff]  ;;  %1677 = vrot.lane.b32.xlu0 %v1583_v30, %s4882_s16 }
 0x233   : > { %v1630_v51 = vpop.permute.xlu1 %1629  ;;  %1679 = vrot.lane.b32.xlu1 %v1584_v38, %s4882_s16 }
 0x234   : > { %1720 = vst.msk [vmem:[#allocation3 + $0x30] sm:$0xff] %vm1713_vm9, %v1630_v51  ;;  %v1825_v31 = vpop.permute.xlu0 %1824 }
 0x235   : > { %1914 = vst.msk [vmem:[#allocation3 + $0x38] sm:$0xff] %vm1906_vm11, %v1825_v31  ;;  %v1977_v52 = vld [vmem:[#allocation3 + $0x28] sm:$0xff] }
 0x236   : > { %1947 = vst.msk [vmem:[#allocation3 + $0x38] sm:$0xff] %vm1939_vm10, %v7448_v46 }
 0x237   : > { %v1823_v54 = vpop.permute.xlu1 %1822 }
 0x238   : > { %1913 = vst.msk [vmem:[#allocation3 + $0x30] sm:$0xff] %vm1906_vm11, %v1823_v54  ;;  %v1976_v57 = vld [vmem:[#allocation3 + $0x20] sm:$0xff]  ;;  %v1636_v55 = vpop.permute.xlu0 %1635 }
 0x239   : > { %1946 = vst.msk [vmem:[#allocation3 + $0x30] sm:$0xff] %vm1939_vm10, %v7448_v46  ;;  %4571 = vmatprep.mubr.f32.mxu0 %v1976_v57 }
 0x23a   : > { %1723 = vst.msk [vmem:[#allocation3 + $0x48] sm:$0xff] %vm1713_vm9, %v1636_v55  ;;  %4572 = vmatmul.mubr.f32.gmra.mrb[4].mxu0 %v1977_v52 }
 0x23b   : > { %v1634_v59 = vpop.permute.xlu1 %1633 }
 0x23c   : > { %1722 = vst.msk [vmem:[#allocation3 + $0x40] sm:$0xff] %vm1713_vm9, %v1634_v59  ;;  %v1829_v58 = vpop.permute.xlu0 %1828  ;;  %v1776_v59 = vld [vmem:[#allocation2 + $0x229] sm:$0xff] }
 0x23d   : > { %1916 = vst.msk [vmem:[#allocation3 + $0x48] sm:$0xff] %vm1906_vm11, %v1829_v58  ;;  %v1979_v60 = vld [vmem:[#allocation3 + $0x38] sm:$0xff]  ;;  %1870 = vrot.lane.b32.xlu0 %v1776_v59, %s4883_s17 }
 0x23e   : > { %1949 = vst.msk [vmem:[#allocation3 + $0x48] sm:$0xff] %vm1939_vm10, %v7448_v46  ;;  %v1777_v58 = vld [vmem:[#allocation2 + $0x231] sm:$0xff] }
 0x23f   : > { %v1827_v61 = vpop.permute.xlu1 %1826  ;;  %1872 = vrot.lane.b32.xlu1 %v1777_v58, %s4883_s17 }
 0x240   : > { %1915 = vst.msk [vmem:[#allocation3 + $0x40] sm:$0xff] %vm1906_vm11, %v1827_v61  ;;  %v1978_v1 = vld [vmem:[#allocation3 + $0x30] sm:$0xff]  ;;  %v1640_v62 = vpop.permute.xlu0 %1639 }
 0x241   : > { %1948 = vst.msk [vmem:[#allocation3 + $0x40] sm:$0xff] %vm1939_vm10, %v7448_v46  ;;  %4574 = vmatprep.mubr.f32.mxu0 %v1978_v1 }
 0x242   : > { %1725 = vst.msk [vmem:[#allocation3 + $0x58] sm:$0xff] %vm1713_vm9, %v1640_v62  ;;  %4575 = vmatmul.mubr.f32.gmra.mrb[6].mxu0 %v1979_v60 }
 0x243   : > { %v1638_v3 = vpop.permute.xlu1 %1637 }
 0x244   : > { %1724 = vst.msk [vmem:[#allocation3 + $0x50] sm:$0xff] %vm1713_vm9, %v1638_v3  ;;  %v1833_v2 = vpop.permute.xlu0 %1832 }
 0x245   : > { %1918 = vst.msk [vmem:[#allocation3 + $0x58] sm:$0xff] %vm1906_vm11, %v1833_v2  ;;  %v1981_v4 = vld [vmem:[#allocation3 + $0x48] sm:$0xff] }
 0x246   : > { %1951 = vst.msk [vmem:[#allocation3 + $0x58] sm:$0xff] %vm1939_vm10, %v7448_v46  ;;  %v2423_v2 = vld [vmem:[#allocation4 + $0x8] sm:$0xff] }
 0x247   : > { %v1831_v5 = vpop.permute.xlu1 %1830  ;;  %2487 = vrot.lane.b32.xlu0 %v2423_v2, %s4877_s11 }
 0x248   : > { %1917 = vst.msk [vmem:[#allocation3 + $0x50] sm:$0xff] %vm1906_vm11, %v1831_v5  ;;  %v1980_v7 = vld [vmem:[#allocation3 + $0x40] sm:$0xff]  ;;  %v1644_v6 = vpop.permute.xlu0 %1643 }
 0x249   : > { %1950 = vst.msk [vmem:[#allocation3 + $0x50] sm:$0xff] %vm1939_vm10, %v7448_v46  ;;  %4577 = vmatprep.mubr.f32.mxu0 %v1980_v7 }
 0x24a   : > { %1727 = vst.msk [vmem:[#allocation3 + $0x68] sm:$0xff] %vm1713_vm9, %v1644_v6  ;;  %4578 = vmatmul.mubr.f32.gmra.mrb[8].mxu0 %v1981_v4  ;;  %v2424_v4 = vld [vmem:[#allocation4 + $0x10] sm:$0xff]  ;;  %v6248_v6 = vld [vmem:[%s7350_s2] ss:$0 sm:$0xff] }
 0x24b   : > { %v1642_v9 = vpop.permute.xlu1 %1641  ;;  %2489 = vrot.lane.b32.xlu1 %v2424_v4, %s4877_s11 }
 0x24c   : > { %1726 = vst.msk [vmem:[#allocation3 + $0x60] sm:$0xff] %vm1713_vm9, %v1642_v9  ;;  %v1837_v8 = vpop.permute.xlu0 %1836 }
 0x24d   : > { %1920 = vst.msk [vmem:[#allocation3 + $0x68] sm:$0xff] %vm1906_vm11, %v1837_v8  ;;  %v1983_v10 = vld [vmem:[#allocation3 + $0x58] sm:$0xff] }
 0x24e   : > { %1953 = vst.msk [vmem:[#allocation3 + $0x68] sm:$0xff] %vm1939_vm10, %v7448_v46 }
 0x24f   : > { %v1835_v12 = vpop.permute.xlu1 %1834 }
 0x250   : > { %1919 = vst.msk [vmem:[#allocation3 + $0x60] sm:$0xff] %vm1906_vm11, %v1835_v12  ;;  %v1982_v16 = vld [vmem:[#allocation3 + $0x50] sm:$0xff]  ;;  %v1648_v13 = vpop.permute.xlu0 %1647 }
 0x251   : > { %1952 = vst.msk [vmem:[#allocation3 + $0x60] sm:$0xff] %vm1939_vm10, %v7448_v46  ;;  %4580 = vmatprep.mubr.f32.mxu0 %v1982_v16 }
 0x252   : > { %1729 = vst.msk [vmem:[#allocation3 + $0x78] sm:$0xff] %vm1713_vm9, %v1648_v13  ;;  %4581 = vmatmul.mubr.f32.gmra.mrb[10].mxu0 %v1983_v10 }
 0x253   : > { %v1646_v20 = vpop.permute.xlu1 %1645 }
 0x254   : > { %1728 = vst.msk [vmem:[#allocation3 + $0x70] sm:$0xff] %vm1713_vm9, %v1646_v20  ;;  %v1841_v17 = vpop.permute.xlu0 %1840 }
 0x255   : > { %1922 = vst.msk [vmem:[#allocation3 + $0x78] sm:$0xff] %vm1906_vm11, %v1841_v17  ;;  %v1985_v24 = vld [vmem:[#allocation3 + $0x68] sm:$0xff] }
 0x256   : > { %1955 = vst.msk [vmem:[#allocation3 + $0x78] sm:$0xff] %vm1939_vm10, %v7448_v46 }
 0x257   : > { %v1839_v32 = vpop.permute.xlu1 %1838 }
 0x258   : > { %1921 = vst.msk [vmem:[#allocation3 + $0x70] sm:$0xff] %vm1906_vm11, %v1839_v32  ;;  %v1984_v39 = vld [vmem:[#allocation3 + $0x60] sm:$0xff]  ;;  %v1652_v21 = vpop.permute.xlu0 %1651 }
 0x259   : > { %1954 = vst.msk [vmem:[#allocation3 + $0x70] sm:$0xff] %vm1939_vm10, %v7448_v46  ;;  %4583 = vmatprep.mubr.f32.mxu0 %v1984_v39 }
 0x25a   : > { %1731 = vst.msk [vmem:[#allocation3 + $0x88] sm:$0xff] %vm1713_vm9, %v1652_v21  ;;  %4584 = vmatmul.mubr.f32.gmra.mrb[12].mxu0 %v1985_v24 }
 0x25b   : > { %v1650_v0 = vpop.permute.xlu1 %1649 }
 0x25c   : > { %1730 = vst.msk [vmem:[#allocation3 + $0x80] sm:$0xff] %vm1713_vm9, %v1650_v0  ;;  %v1845_v40 = vpop.permute.xlu0 %1844 }
 0x25d   : > { %1924 = vst.msk [vmem:[#allocation3 + $0x88] sm:$0xff] %vm1906_vm11, %v1845_v40  ;;  %v1987_v28 = vld [vmem:[#allocation3 + $0x78] sm:$0xff] }
 0x25e   : > { %1957 = vst.msk [vmem:[#allocation3 + $0x88] sm:$0xff] %vm1939_vm10, %v7448_v46 }
 0x25f   : > { %v1843_v41 = vpop.permute.xlu1 %1842 }
 0x260   : > { %1923 = vst.msk [vmem:[#allocation3 + $0x80] sm:$0xff] %vm1906_vm11, %v1843_v41  ;;  %v1986_v42 = vld [vmem:[#allocation3 + $0x70] sm:$0xff]  ;;  %v1656_v43 = vpop.permute.xlu0 %1655 }
 0x261   : > { %1956 = vst.msk [vmem:[#allocation3 + $0x80] sm:$0xff] %vm1939_vm10, %v7448_v46  ;;  %4586 = vmatprep.mubr.f32.mxu0 %v1986_v42 }
 0x262   : > { %1733 = vst.msk [vmem:[#allocation3 + $0x98] sm:$0xff] %vm1713_vm9, %v1656_v43  ;;  %4587 = vmatmul.mubr.f32.gmra.mrb[14].mxu0 %v1987_v28 }
 0x263   : > { %v1654_v44 = vpop.permute.xlu1 %1653 }
 0x264   : > { %1732 = vst.msk [vmem:[#allocation3 + $0x90] sm:$0xff] %vm1713_vm9, %v1654_v44  ;;  %v1849_v47 = vpop.permute.xlu0 %1848 }
 0x265   : > { %1926 = vst.msk [vmem:[#allocation3 + $0x98] sm:$0xff] %vm1906_vm11, %v1849_v47  ;;  %v1989_v53 = vld [vmem:[#allocation3 + $0x88] sm:$0xff] }
 0x266   : > { %1959 = vst.msk [vmem:[#allocation3 + $0x98] sm:$0xff] %vm1939_vm10, %v7448_v46 }
 0x267   : > { %v1847_v50 = vpop.permute.xlu1 %1846 }
 0x268   : > { %1925 = vst.msk [vmem:[#allocation3 + $0x90] sm:$0xff] %vm1906_vm11, %v1847_v50  ;;  %v1988_v56 = vld [vmem:[#allocation3 + $0x80] sm:$0xff]  ;;  %v1660_v63 = vpop.permute.xlu0 %1659 }
 0x269   : > { %1958 = vst.msk [vmem:[#allocation3 + $0x90] sm:$0xff] %vm1939_vm10, %v7448_v46  ;;  %4589 = vmatprep.mubr.f32.mxu0 %v1988_v56 }
 0x26a   : > { %1735 = vst.msk [vmem:[#allocation3 + $0xa8] sm:$0xff] %vm1713_vm9, %v1660_v63  ;;  %4590 = vmatmul.mubr.f32.gmra.mrb[16].mxu0 %v1989_v53 }
 0x26b   : > { %v1658_v11 = vpop.permute.xlu1 %1657 }
 0x26c   : > { %1734 = vst.msk [vmem:[#allocation3 + $0xa0] sm:$0xff] %vm1713_vm9, %v1658_v11  ;;  %v1853_v14 = vpop.permute.xlu0 %1852 }
 0x26d   : > { %1928 = vst.msk [vmem:[#allocation3 + $0xa8] sm:$0xff] %vm1906_vm11, %v1853_v14  ;;  %v1991_v18 = vld [vmem:[#allocation3 + $0x98] sm:$0xff] }
 0x26e   : > { %1961 = vst.msk [vmem:[#allocation3 + $0xa8] sm:$0xff] %vm1939_vm10, %v7448_v46 }
 0x26f   : > { %v1851_v15 = vpop.permute.xlu1 %1850 }
 0x270   : > { %1927 = vst.msk [vmem:[#allocation3 + $0xa0] sm:$0xff] %vm1906_vm11, %v1851_v15  ;;  %v1990_v29 = vld [vmem:[#allocation3 + $0x90] sm:$0xff]  ;;  %v1664_v19 = vpop.permute.xlu0 %1663 }
 0x271   : > { %1960 = vst.msk [vmem:[#allocation3 + $0xa0] sm:$0xff] %vm1939_vm10, %v7448_v46  ;;  %4592 = vmatprep.mubr.f32.mxu0 %v1990_v29 }
 0x272   : > { %1737 = vst.msk [vmem:[#allocation3 + $0xb8] sm:$0xff] %vm1713_vm9, %v1664_v19  ;;  %4593 = vmatmul.mubr.f32.gmra.mrb[18].mxu0 %v1991_v18 }
 0x273   : > { %v1662_v22 = vpop.permute.xlu1 %1661 }
 0x274   : > { %1736 = vst.msk [vmem:[#allocation3 + $0xb0] sm:$0xff] %vm1713_vm9, %v1662_v22  ;;  %v1857_v26 = vpop.permute.xlu0 %1856 }
 0x275   : > { %1930 = vst.msk [vmem:[#allocation3 + $0xb8] sm:$0xff] %vm1906_vm11, %v1857_v26  ;;  %v1993_v23 = vld [vmem:[#allocation3 + $0xa8] sm:$0xff] }
 0x276   : > { %1963 = vst.msk [vmem:[#allocation3 + $0xb8] sm:$0xff] %vm1939_vm10, %v7448_v46 }
 0x277   : > { %v1855_v48 = vpop.permute.xlu1 %1854 }
 0x278   : > { %1929 = vst.msk [vmem:[#allocation3 + $0xb0] sm:$0xff] %vm1906_vm11, %v1855_v48  ;;  %v1992_v35 = vld [vmem:[#allocation3 + $0xa0] sm:$0xff]  ;;  %v1668_v49 = vpop.permute.xlu0 %1667 }
 0x279   : > { %1962 = vst.msk [vmem:[#allocation3 + $0xb0] sm:$0xff] %vm1939_vm10, %v7448_v46  ;;  %4595 = vmatprep.mubr.f32.mxu0 %v1992_v35 }
 0x27a   : > { %1739 = vst.msk [vmem:[#allocation3 + $0xc8] sm:$0xff] %vm1713_vm9, %v1668_v49  ;;  %4596 = vmatmul.mubr.f32.gmra.mrb[20].mxu0 %v1993_v23 }
 0x27b   : > { %v1666_v33 = vpop.permute.xlu1 %1665 }
 0x27c   : > { %1738 = vst.msk [vmem:[#allocation3 + $0xc0] sm:$0xff] %vm1713_vm9, %v1666_v33  ;;  %v1861_v34 = vpop.permute.xlu0 %1860 }
 0x27d   : > { %1932 = vst.msk [vmem:[#allocation3 + $0xc8] sm:$0xff] %vm1906_vm11, %v1861_v34  ;;  %v1995_v25 = vld [vmem:[#allocation3 + $0xb8] sm:$0xff] }
 0x27e   : > { %1965 = vst.msk [vmem:[#allocation3 + $0xc8] sm:$0xff] %vm1939_vm10, %v7448_v46 }
 0x27f   : > { %v1859_v36 = vpop.permute.xlu1 %1858 }
 0x280   : > { %1931 = vst.msk [vmem:[#allocation3 + $0xc0] sm:$0xff] %vm1906_vm11, %v1859_v36  ;;  %v1994_v37 = vld [vmem:[#allocation3 + $0xb0] sm:$0xff]  ;;  %v1672_v27 = vpop.permute.xlu0 %1671 }
 0x281   : > { %1964 = vst.msk [vmem:[#allocation3 + $0xc0] sm:$0xff] %vm1939_vm10, %v7448_v46  ;;  %4598 = vmatprep.mubr.f32.mxu0 %v1994_v37 }
 0x282   : > { %1741 = vst.msk [vmem:[#allocation3 + $0xd8] sm:$0xff] %vm1713_vm9, %v1672_v27  ;;  %4599 = vmatmul.mubr.f32.gmra.mrb[22].mxu0 %v1995_v25 }
 0x283   : > { %v1670_v45 = vpop.permute.xlu1 %1669 }
 0x284   : > { %1740 = vst.msk [vmem:[#allocation3 + $0xd0] sm:$0xff] %vm1713_vm9, %v1670_v45  ;;  %v1865_v51 = vpop.permute.xlu0 %1864 }
 0x285   : > { %1934 = vst.msk [vmem:[#allocation3 + $0xd8] sm:$0xff] %vm1906_vm11, %v1865_v51  ;;  %v1997_v54 = vld [vmem:[#allocation3 + $0xc8] sm:$0xff] }
 0x286   : > { %1967 = vst.msk [vmem:[#allocation3 + $0xd8] sm:$0xff] %vm1939_vm10, %v7448_v46 }
 0x287   : > { %v1863_v31 = vpop.permute.xlu1 %1862 }
 0x288   : > { %1933 = vst.msk [vmem:[#allocation3 + $0xd0] sm:$0xff] %vm1906_vm11, %v1863_v31  ;;  %v1996_v52 = vld [vmem:[#allocation3 + $0xc0] sm:$0xff]  ;;  %v1674_v57 = vpop.permute.xlu0 %1673 }
 0x289   : > { %1966 = vst.msk [vmem:[#allocation3 + $0xd0] sm:$0xff] %vm1939_vm10, %v7448_v46  ;;  %4601 = vmatprep.mubr.f32.mxu0 %v1996_v52 }
 0x28a   : > { %1742 = vst.msk [vmem:[#allocation3 + $0xe0] sm:$0xff] %vm1713_vm9, %v1674_v57  ;;  %4602 = vmatmul.mubr.f32.gmra.mrb[24].mxu0 %v1997_v54 }
 0x28b   : > { %v1483_v55 = vpop.permute.xlu1 %1482 }
 0x28c   : > { %1550 = vst.msk [vmem:[#allocation3 + $0xe8] sm:$0xff] %vm1520_vm8, %v1483_v55  ;;  %v1867_v61 = vpop.permute.xlu0 %1866 }
 0x28d   : > { %1935 = vst.msk [vmem:[#allocation3 + $0xe0] sm:$0xff] %vm1906_vm11, %v1867_v61  ;;  %v1999_v1 = vld [vmem:[#allocation3 + $0xd8] sm:$0xff] }
 0x28e   : > { %1968 = vst.msk [vmem:[#allocation3 + $0xe0] sm:$0xff] %vm1939_vm10, %v7448_v46 }
 0x28f   : > { %v1676_v60 = vpop.permute.xlu1 %1675 }
 0x290   : > { %1743 = vst.msk [vmem:[#allocation3 + $0xe8] sm:$0xff] %vm1713_vm9, %v1676_v60  ;;  %v1998_v62 = vld [vmem:[#allocation3 + $0xd0] sm:$0xff]  ;;  %v1485_v57 = vpop.permute.xlu0 %1484 }
 0x291   : > { %4604 = vmatprep.mubr.f32.mxu0 %v1998_v62  ;;  %1551 = vst.msk [vmem:[#allocation3 + $0xf0] sm:$0xff] %vm1520_vm8, %v1485_v57 }
 0x292   : > { %4605 = vmatmul.mubr.f32.gmra.mrb[26].mxu0 %v1999_v1 }
 0x293   : > { %v1869_v3 = vpop.permute.xlu1 %1868 }
 0x294   : > { %1936 = vst.msk [vmem:[#allocation3 + $0xe8] sm:$0xff] %vm1906_vm11, %v1869_v3 }
 0x295   : > { %1969 = vst.msk [vmem:[#allocation3 + $0xe8] sm:$0xff] %vm1939_vm10, %v7448_v46  ;;  %v2000_v5 = vld [vmem:[#allocation3 + $0xe0] sm:$0xff] }
 0x296   : > { %4607 = vmatprep.mubr.f32.mxu0 %v2000_v5 }
 0x297   : > { %v1487_v59 = vpop.permute.xlu1 %1486 }
 0x298   : > { %1552 = vst.msk [vmem:[#allocation3 + $0xf8] sm:$0xff] %vm1520_vm8, %v1487_v59 }
 0x29c   : > { %v2001_v7 = vld [vmem:[#allocation3 + $0xe8] sm:$0xff] }
 0x29d   : > { %4608 = vmatmul.mubr.f32.gmra.mrb[28].mxu0 %v2001_v7 }
 0x2a4   : > { %v1678_v62 = vpop.permute.xlu0 %1677 }
 0x2a5   : > { %1744 = vst.msk [vmem:[#allocation3 + $0xf0] sm:$0xff] %vm1713_vm9, %v1678_v62  ;;  %v1680_v2 = vpop.permute.xlu1 %1679 }
 0x2a6   : > { %1745 = vst.msk [vmem:[#allocation3 + $0xf8] sm:$0xff] %vm1713_vm9, %v1680_v2 }
 0x2fd   : > { %v4567_v9 = vpop.f32.mrb[0].mxu0 }
 0x2fe   : > { %v2099_v8 = vadd.f32 %v4567_v9, %v6248_v6  ;;  %v2093_v12 = vpop.f32.mrb[1].mxu0 }
 0x2ff   : > { %v2094_v10 = vadd.f32 %v6248_v6, %v2093_v12 }
 0x300   : > { %v2253_v16 = vmax.f32 %v2099_v8, 0.0  ;;  %v1871_v8 = vpop.permute.xlu0 %1870 }
 0x301   : > { %v2252_v13 = vmax.f32 %v2094_v10, 0.0  ;;  %1937 = vst.msk [vmem:[#allocation3 + $0xf0] sm:$0xff] %vm1906_vm11, %v1871_v8  ;;  %v1873_v10 = vpop.permute.xlu1 %1872 }
 0x302   : > { %2287 = vst.msk [vmem:[#allocation4 + $0x30] sm:$0xff] %vm2285_vm12, %v2253_v16 }
 0x303   : > { %2286 = vst.msk [vmem:[#allocation4 + $0x28] sm:$0xff] %vm2285_vm12, %v2252_v13 }
 0x304   : > { %1970 = vst.msk [vmem:[#allocation3 + $0xf0] sm:$0xff] %vm1939_vm10, %v7448_v46 }
 0x305   : > { %v4570_v20 = vpop.f32.mrb[2].mxu0  ;;  %1938 = vst.msk [vmem:[#allocation3 + $0xf8] sm:$0xff] %vm1906_vm11, %v1873_v10 }
 0x306   : > { %v2109_v17 = vadd.f32 %v4570_v20, %v6248_v6  ;;  %v2103_v32 = vpop.f32.mrb[3].mxu0  ;;  %1971 = vst.msk [vmem:[#allocation3 + $0xf8] sm:$0xff] %vm1939_vm10, %v7448_v46 }
 0x307   : > { %v2104_v24 = vadd.f32 %v6248_v6, %v2103_v32  ;;  %v2359_v32 = vld [vmem:[#allocation4 + $0x7] sm:$0xff] }
 0x308   : > { %v2255_v39 = vmax.f32 %v2109_v17, 0.0  ;;  %2391 = vst.msk [vmem:[#allocation5] sm:$0xff] %vm2285_vm12, %v2359_v32 }
 0x309   : > { %v2254_v21 = vmax.f32 %v2104_v24, 0.0  ;;  %v6256_v0 = vld [vmem:[#allocation4 + $0x30] sm:$0xff]  ;;  %v2488_v24 = vpop.permute.xlu0 %2487 }
 0x30a   : > { %2289 = vst.msk [vmem:[#allocation4 + $0x50] sm:$0xff] %vm2285_vm12, %v2255_v39  ;;  %2493 = vrot.lane.b32.xlu1 %v6256_v0, %s4877_s11  ;;  %v6261_v40 = vld [vmem:[#allocation4 + $0x28] sm:$0xff] }
 0x30b   : > { %v6263_v41 = vld [vmem:[#allocation4 + $0x27] sm:$0xff]  ;;  %2288 = vst.msk [vmem:[#allocation4 + $0x48] sm:$0xff] %vm2285_vm12, %v2254_v21  ;;  %2491 = vrot.lane.b32.xlu0 %v6261_v40, %s4877_s11  ;;  %v6270_v28 = vld [vmem:[#allocation4 + $0x2f] sm:$0xff] }
 0x30c   : > { %2393 = vst.msk [vmem:[#allocation5 + $0x10] sm:$0xff] %vm2285_vm12, %v6263_v41  ;;  %2394 = vst.msk [vmem:[#allocation5 + $0x18] sm:$0xff] %vm2285_vm12, %v6270_v28  ;;  %v2360_v39 = vld [vmem:[#allocation4 + $0xf] sm:$0xff] }
 0x30d   : > { %v4573_v42 = vpop.f32.mrb[4].mxu0  ;;  %2584 = vst.msk [vmem:[#allocation5] sm:$0xff] %vm2583_vm15, %v2488_v24 }
 0x30e   : > { %v2119_v43 = vadd.f32 %v4573_v42, %v6248_v6  ;;  %v2113_v44 = vpop.f32.mrb[5].mxu0  ;;  %2392 = vst.msk [vmem:[#allocation5 + $0x8] sm:$0xff] %vm2285_vm12, %v2360_v39 }
 0x30f   : > { %v2114_v47 = vadd.f32 %v6248_v6, %v2113_v44 }
 0x310   : > { %v2257_v50 = vmax.f32 %v2119_v43, 0.0  ;;  %v2490_v43 = vpop.permute.xlu1 %2489 }
 0x311   : > { %v2256_v53 = vmax.f32 %v2114_v47, 0.0  ;;  %v6276_v56 = vld [vmem:[#allocation4 + $0x50] sm:$0xff]  ;;  %2585 = vst.msk [vmem:[#allocation5 + $0x8] sm:$0xff] %vm2583_vm15, %v2490_v43 }
 0x312   : > { %2291 = vst.msk [vmem:[#allocation4 + $0x70] sm:$0xff] %vm2285_vm12, %v2257_v50  ;;  %2497 = vrot.lane.b32.xlu1 %v6276_v56, %s4877_s11  ;;  %v6281_v63 = vld [vmem:[#allocation4 + $0x48] sm:$0xff] }
 0x313   : > { %v6283_v11 = vld [vmem:[#allocation4 + $0x4f] sm:$0xff]  ;;  %2290 = vst.msk [vmem:[#allocation4 + $0x68] sm:$0xff] %vm2285_vm12, %v2256_v53  ;;  %2495 = vrot.lane.b32.xlu0 %v6281_v63, %s4877_s11  ;;  %v6290_v14 = vld [vmem:[#allocation4 + $0x47] sm:$0xff] }
 0x314   : > { %2396 = vst.msk [vmem:[#allocation5 + $0x28] sm:$0xff] %vm2285_vm12, %v6283_v11  ;;  %2395 = vst.msk [vmem:[#allocation5 + $0x20] sm:$0xff] %vm2285_vm12, %v6290_v14 }
 0x315   : > { %v4576_v15 = vpop.f32.mrb[6].mxu0 }
 0x316   : > { %v2129_v18 = vadd.f32 %v4576_v15, %v6248_v6  ;;  %v2123_v29 = vpop.f32.mrb[7].mxu0 }
 0x317   : > { %v2124_v19 = vadd.f32 %v6248_v6, %v2123_v29 }
 0x318   : > { %v2259_v22 = vmax.f32 %v2129_v18, 0.0 }
 0x319   : > { %v2258_v26 = vmax.f32 %v2124_v19, 0.0  ;;  %v6296_v48 = vld [vmem:[#allocation4 + $0x70] sm:$0xff] }
 0x31a   : > { %2293 = vst.msk [vmem:[#allocation4 + $0x90] sm:$0xff] %vm2285_vm12, %v2259_v22  ;;  %2501 = vrot.lane.b32.xlu1 %v6296_v48, %s4877_s11  ;;  %v6301_v23 = vld [vmem:[#allocation4 + $0x68] sm:$0xff] }
 0x31b   : > { %v6303_v35 = vld [vmem:[#allocation4 + $0x6f] sm:$0xff]  ;;  %2292 = vst.msk [vmem:[#allocation4 + $0x88] sm:$0xff] %vm2285_vm12, %v2258_v26  ;;  %2499 = vrot.lane.b32.xlu0 %v6301_v23, %s4877_s11  ;;  %v6310_v49 = vld [vmem:[#allocation4 + $0x67] sm:$0xff] }
 0x31c   : > { %2398 = vst.msk [vmem:[#allocation5 + $0x38] sm:$0xff] %vm2285_vm12, %v6303_v35  ;;  %2397 = vst.msk [vmem:[#allocation5 + $0x30] sm:$0xff] %vm2285_vm12, %v6310_v49 }
 0x31d   : > { %v4579_v33 = vpop.f32.mrb[8].mxu0 }
 0x31e   : > { %v2139_v34 = vadd.f32 %v4579_v33, %v6248_v6  ;;  %v2133_v36 = vpop.f32.mrb[9].mxu0 }
 0x31f   : > { %v2134_v25 = vadd.f32 %v6248_v6, %v2133_v36 }
 0x320   : > { %v2261_v37 = vmax.f32 %v2139_v34, 0.0 }
 0x321   : > { %v2260_v27 = vmax.f32 %v2134_v25, 0.0  ;;  %v6316_v45 = vld [vmem:[#allocation4 + $0x90] sm:$0xff] }
 0x322   : > { %2295 = vst.msk [vmem:[#allocation4 + $0xb0] sm:$0xff] %vm2285_vm12, %v2261_v37  ;;  %2505 = vrot.lane.b32.xlu1 %v6316_v45, %s4877_s11  ;;  %v6321_v30 = vld [vmem:[#allocation4 + $0x88] sm:$0xff] }
 0x323   : > { %v6323_v38 = vld [vmem:[#allocation4 + $0x8f] sm:$0xff]  ;;  %2294 = vst.msk [vmem:[#allocation4 + $0xa8] sm:$0xff] %vm2285_vm12, %v2260_v27  ;;  %2503 = vrot.lane.b32.xlu0 %v6321_v30, %s4877_s11  ;;  %v6330_v51 = vld [vmem:[#allocation4 + $0x87] sm:$0xff] }
 0x324   : > { %2400 = vst.msk [vmem:[#allocation5 + $0x48] sm:$0xff] %vm2285_vm12, %v6323_v38  ;;  %2399 = vst.msk [vmem:[#allocation5 + $0x40] sm:$0xff] %vm2285_vm12, %v6330_v51 }
 0x325   : > { %v4582_v31 = vpop.f32.mrb[10].mxu0 }
 0x326   : > { %v2149_v54 = vadd.f32 %v4582_v31, %v6248_v6  ;;  %v2143_v52 = vpop.f32.mrb[11].mxu0 }
 0x327   : > { %v2144_v55 = vadd.f32 %v6248_v6, %v2143_v52 }
 0x328   : > { %v2263_v58 = vmax.f32 %v2149_v54, 0.0 }
 0x329   : > { %v2262_v61 = vmax.f32 %v2144_v55, 0.0  ;;  %v2434_v60 = vld [vmem:[#allocation4 + $0xb0] sm:$0xff] }
 0x32a   : > { %2297 = vst.msk [vmem:[#allocation4 + $0xd0] sm:$0xff] %vm2285_vm12, %v2263_v58  ;;  %2509 = vrot.lane.b32.xlu1 %v2434_v60, %s4877_s11  ;;  %v6340_v1 = vld [vmem:[#allocation4 + $0xa8] sm:$0xff] }
 0x32b   : > { %v6342_v3 = vld [vmem:[#allocation4 + $0xaf] sm:$0xff]  ;;  %2296 = vst.msk [vmem:[#allocation4 + $0xc8] sm:$0xff] %vm2285_vm12, %v2262_v61  ;;  %2507 = vrot.lane.b32.xlu0 %v6340_v1, %s4877_s11  ;;  %v6350_v5 = vld [vmem:[#allocation4 + $0xa7] sm:$0xff] }
 0x32c   : > { %2402 = vst.msk [vmem:[#allocation5 + $0x58] sm:$0xff] %vm2285_vm12, %v6342_v3  ;;  %2401 = vst.msk [vmem:[#allocation5 + $0x50] sm:$0xff] %vm2285_vm12, %v6350_v5 }
 0x32d   : > { %v4585_v4 = vpop.f32.mrb[12].mxu0 }
 0x32e   : > { %v2159_v7 = vadd.f32 %v4585_v4, %v6248_v6  ;;  %v2153_v9 = vpop.f32.mrb[13].mxu0 }
 0x32f   : > { %v2154_v12 = vadd.f32 %v6248_v6, %v2153_v9 }
 0x330   : > { %v2265_v16 = vmax.f32 %v2159_v7, 0.0 }
 0x331   : > { %v2264_v13 = vmax.f32 %v2154_v12, 0.0  ;;  %v2436_v20 = vld [vmem:[#allocation4 + $0xd0] sm:$0xff] }
 0x332   : > { %2299 = vst.msk [vmem:[#allocation4 + $0xf0] sm:$0xff] %vm2285_vm12, %v2265_v16  ;;  %2513 = vrot.lane.b32.xlu1 %v2436_v20, %s4877_s11  ;;  %v2435_v17 = vld [vmem:[#allocation4 + $0xc8] sm:$0xff] }
 0x333   : > { %2298 = vst.msk [vmem:[#allocation4 + $0xe8] sm:$0xff] %vm2285_vm12, %v2264_v13  ;;  %2511 = vrot.lane.b32.xlu0 %v2435_v17, %s4877_s11  ;;  %v6368_v21 = vld [vmem:[#allocation4 + $0xcf] sm:$0xff]  ;;  %v6370_v42 = vld [vmem:[#allocation4 + $0xc7] sm:$0xff] }
 0x334   : > { %2404 = vst.msk [vmem:[#allocation5 + $0x68] sm:$0xff] %vm2285_vm12, %v6368_v21  ;;  %2403 = vst.msk [vmem:[#allocation5 + $0x60] sm:$0xff] %vm2285_vm12, %v6370_v42 }
 0x335   : > { %v4588_v44 = vpop.f32.mrb[14].mxu0 }
 0x336   : > { %v2169_v47 = vadd.f32 %v4588_v44, %v6248_v6  ;;  %v2163_v50 = vpop.f32.mrb[15].mxu0 }
 0x337   : > { %v2164_v53 = vadd.f32 %v6248_v6, %v2163_v50 }
 0x338   : > { %v2267_v15 = vmax.f32 %v2169_v47, 0.0 }
 0x339   : > { %v2266_v18 = vmax.f32 %v2164_v53, 0.0  ;;  %v2438_v29 = vld [vmem:[#allocation4 + $0xf0] sm:$0xff] }
 0x33a   : > { %2301 = vst.msk [vmem:[#allocation4 + $0x110] sm:$0xff] %vm2285_vm12, %v2267_v15  ;;  %2517 = vrot.lane.b32.xlu1 %v2438_v29, %s4877_s11  ;;  %v2437_v19 = vld [vmem:[#allocation4 + $0xe8] sm:$0xff] }
 0x33b   : > { %v6383_v22 = vld [vmem:[#allocation4 + $0xef] sm:$0xff]  ;;  %2300 = vst.msk [vmem:[#allocation4 + $0x108] sm:$0xff] %vm2285_vm12, %v2266_v18  ;;  %2515 = vrot.lane.b32.xlu0 %v2437_v19, %s4877_s11  ;;  %v6389_v26 = vld [vmem:[#allocation4 + $0xe7] sm:$0xff] }
 0x33c   : > { %2406 = vst.msk [vmem:[#allocation5 + $0x78] sm:$0xff] %vm2285_vm12, %v6383_v22  ;;  %2405 = vst.msk [vmem:[#allocation5 + $0x70] sm:$0xff] %vm2285_vm12, %v6389_v26 }
 0x33d   : > { %v4591_v33 = vpop.f32.mrb[16].mxu0 }
 0x33e   : > { %v2179_v34 = vadd.f32 %v4591_v33, %v6248_v6  ;;  %v2173_v36 = vpop.f32.mrb[17].mxu0 }
 0x33f   : > { %v2174_v25 = vadd.f32 %v6248_v6, %v2173_v36 }
 0x340   : > { %v2269_v37 = vmax.f32 %v2179_v34, 0.0 }
 0x341   : > { %v2268_v27 = vmax.f32 %v2174_v25, 0.0  ;;  %v2440_v31 = vld [vmem:[#allocation4 + $0x110] sm:$0xff] }
 0x342   : > { %2303 = vst.msk [vmem:[#allocation4 + $0x130] sm:$0xff] %vm2285_vm12, %v2269_v37  ;;  %2521 = vrot.lane.b32.xlu1 %v2440_v31, %s4877_s11  ;;  %v2439_v54 = vld [vmem:[#allocation4 + $0x108] sm:$0xff] }
 0x343   : > { %v6397_v52 = vld [vmem:[#allocation4 + $0x10f] sm:$0xff]  ;;  %2302 = vst.msk [vmem:[#allocation4 + $0x128] sm:$0xff] %vm2285_vm12, %v2268_v27  ;;  %2519 = vrot.lane.b32.xlu0 %v2439_v54, %s4877_s11  ;;  %v6403_v57 = vld [vmem:[#allocation4 + $0x107] sm:$0xff] }
 0x344   : > { %2408 = vst.msk [vmem:[#allocation5 + $0x88] sm:$0xff] %vm2285_vm12, %v6397_v52  ;;  %2407 = vst.msk [vmem:[#allocation5 + $0x80] sm:$0xff] %vm2285_vm12, %v6403_v57 }
 0x345   : > { %v4594_v55 = vpop.f32.mrb[18].mxu0 }
 0x346   : > { %v2189_v59 = vadd.f32 %v4594_v55, %v6248_v6  ;;  %v2183_v58 = vpop.f32.mrb[19].mxu0 }
 0x347   : > { %v2184_v61 = vadd.f32 %v6248_v6, %v2183_v58 }
 0x348   : > { %v2271_v60 = vmax.f32 %v2189_v59, 0.0 }
 0x349   : > { %v2270_v62 = vmax.f32 %v2184_v61, 0.0  ;;  %v2442_v2 = vld [vmem:[#allocation4 + $0x130] sm:$0xff] }
 0x34a   : > { %2305 = vst.msk [vmem:[#allocation4 + $0x150] sm:$0xff] %vm2285_vm12, %v2271_v60  ;;  %2525 = vrot.lane.b32.xlu1 %v2442_v2, %s4877_s11  ;;  %v2441_v4 = vld [vmem:[#allocation4 + $0x128] sm:$0xff] }
 0x34b   : > { %v6411_v7 = vld [vmem:[#allocation4 + $0x12f] sm:$0xff]  ;;  %2304 = vst.msk [vmem:[#allocation4 + $0x148] sm:$0xff] %vm2285_vm12, %v2270_v62  ;;  %2523 = vrot.lane.b32.xlu0 %v2441_v4, %s4877_s11  ;;  %v6417_v9 = vld [vmem:[#allocation4 + $0x127] sm:$0xff] }
 0x34c   : > { %2410 = vst.msk [vmem:[#allocation5 + $0x98] sm:$0xff] %vm2285_vm12, %v6411_v7  ;;  %2409 = vst.msk [vmem:[#allocation5 + $0x90] sm:$0xff] %vm2285_vm12, %v6417_v9 }
 0x34d   : > { %v4597_v8 = vpop.f32.mrb[20].mxu0 }
 0x34e   : > { %v2199_v12 = vadd.f32 %v4597_v8, %v6248_v6  ;;  %v2193_v10 = vpop.f32.mrb[21].mxu0 }
 0x34f   : > { %v2194_v16 = vadd.f32 %v6248_v6, %v2193_v10 }
 0x350   : > { %v2273_v13 = vmax.f32 %v2199_v12, 0.0 }
 0x351   : > { %v2272_v20 = vmax.f32 %v2194_v16, 0.0  ;;  %v2444_v17 = vld [vmem:[#allocation4 + $0x150] sm:$0xff] }
 0x352   : > { %2307 = vst.msk [vmem:[#allocation4 + $0x170] sm:$0xff] %vm2285_vm12, %v2273_v13  ;;  %2529 = vrot.lane.b32.xlu1 %v2444_v17, %s4877_s11  ;;  %v2443_v32 = vld [vmem:[#allocation4 + $0x148] sm:$0xff] }
 0x353   : > { %v6425_v24 = vld [vmem:[#allocation4 + $0x14f] sm:$0xff]  ;;  %2306 = vst.msk [vmem:[#allocation4 + $0x168] sm:$0xff] %vm2285_vm12, %v2272_v20  ;;  %2527 = vrot.lane.b32.xlu0 %v2443_v32, %s4877_s11  ;;  %v6431_v39 = vld [vmem:[#allocation4 + $0x147] sm:$0xff] }
 0x354   : > { %2412 = vst.msk [vmem:[#allocation5 + $0xa8] sm:$0xff] %vm2285_vm12, %v6425_v24  ;;  %2411 = vst.msk [vmem:[#allocation5 + $0xa0] sm:$0xff] %vm2285_vm12, %v6431_v39 }
 0x355   : > { %v4600_v43 = vpop.f32.mrb[22].mxu0 }
 0x356   : > { %v2209_v44 = vadd.f32 %v4600_v43, %v6248_v6  ;;  %v2203_v47 = vpop.f32.mrb[23].mxu0 }
 0x357   : > { %v2204_v50 = vadd.f32 %v6248_v6, %v2203_v47 }
 0x358   : > { %v2275_v53 = vmax.f32 %v2209_v44, 0.0 }
 0x359   : > { %v2274_v15 = vmax.f32 %v2204_v50, 0.0  ;;  %v2446_v18 = vld [vmem:[#allocation4 + $0x170] sm:$0xff] }
 0x35a   : > { %2309 = vst.msk [vmem:[#allocation4 + $0x190] sm:$0xff] %vm2285_vm12, %v2275_v53  ;;  %2533 = vrot.lane.b32.xlu1 %v2446_v18, %s4877_s11  ;;  %v2445_v29 = vld [vmem:[#allocation4 + $0x168] sm:$0xff] }
 0x35b   : > { %v6439_v19 = vld [vmem:[#allocation4 + $0x16f] sm:$0xff]  ;;  %2308 = vst.msk [vmem:[#allocation4 + $0x188] sm:$0xff] %vm2285_vm12, %v2274_v15  ;;  %2531 = vrot.lane.b32.xlu0 %v2445_v29, %s4877_s11  ;;  %v6445_v33 = vld [vmem:[#allocation4 + $0x167] sm:$0xff] }
 0x35c   : > { %2414 = vst.msk [vmem:[#allocation5 + $0xb8] sm:$0xff] %vm2285_vm12, %v6439_v19  ;;  %2413 = vst.msk [vmem:[#allocation5 + $0xb0] sm:$0xff] %vm2285_vm12, %v6445_v33 }
 0x35d   : > { %v4603_v34 = vpop.f32.mrb[24].mxu0 }
 0x35e   : > { %v2219_v36 = vadd.f32 %v4603_v34, %v6248_v6  ;;  %v2213_v25 = vpop.f32.mrb[25].mxu0 }
 0x35f   : > { %v2214_v37 = vadd.f32 %v6248_v6, %v2213_v25 }
 0x360   : > { %v2277_v27 = vmax.f32 %v2219_v36, 0.0 }
 0x361   : > { %v2276_v31 = vmax.f32 %v2214_v37, 0.0  ;;  %v2448_v54 = vld [vmem:[#allocation4 + $0x190] sm:$0xff] }
 0x362   : > { %2311 = vst.msk [vmem:[#allocation4 + $0x1b0] sm:$0xff] %vm2285_vm12, %v2277_v27  ;;  %2537 = vrot.lane.b32.xlu1 %v2448_v54, %s4877_s11  ;;  %v2447_v55 = vld [vmem:[#allocation4 + $0x188] sm:$0xff]  ;;  %v2617_v37 = vld [vmem:[#allocation4 + $0x11] sm:$0xff] }
 0x363   : > { %v6453_v59 = vld [vmem:[#allocation4 + $0x18f] sm:$0xff]  ;;  %2310 = vst.msk [vmem:[#allocation4 + $0x1a8] sm:$0xff] %vm2285_vm12, %v2276_v31  ;;  %2535 = vrot.lane.b32.xlu0 %v2447_v55, %s4877_s11  ;;  %v6459_v58 = vld [vmem:[#allocation4 + $0x187] sm:$0xff] }
 0x364   : > { %2416 = vst.msk [vmem:[#allocation5 + $0xc8] sm:$0xff] %vm2285_vm12, %v6453_v59  ;;  %2415 = vst.msk [vmem:[#allocation5 + $0xc0] sm:$0xff] %vm2285_vm12, %v6459_v58  ;;  %v2616_v31 = vld [vmem:[#allocation4 + $0x9] sm:$0xff]  ;;  %v6490_v54 = vld [vmem:[#allocation4 + $0x31] sm:$0xff] }
 0x365   : > { %v4606_v61 = vpop.f32.mrb[26].mxu0 }
 0x366   : > { %v2229_v60 = vadd.f32 %v4606_v61, %v6248_v6  ;;  %v2223_v62 = vpop.f32.mrb[27].mxu0  ;;  %v6494_v61 = vld [vmem:[#allocation4 + $0x29] sm:$0xff] }
 0x367   : > { %v2224_v2 = vadd.f32 %v6248_v6, %v2223_v62  ;;  %v6500_v62 = vld [vmem:[#allocation4 + $0x51] sm:$0xff] }
 0x368   : > { %v2279_v4 = vmax.f32 %v2229_v60, 0.0 }
 0x369   : > { %v2278_v8 = vmax.f32 %v2224_v2, 0.0  ;;  %v2450_v12 = vld [vmem:[#allocation4 + $0x1b0] sm:$0xff] }
 0x36a   : > { %2313 = vst.msk [vmem:[#allocation4 + $0x1d0] sm:$0xff] %vm2285_vm12, %v2279_v4  ;;  %2541 = vrot.lane.b32.xlu1 %v2450_v12, %s4877_s11  ;;  %v2449_v10 = vld [vmem:[#allocation4 + $0x1a8] sm:$0xff]  ;;  %v6508_v4 = vld [vmem:[#allocation4 + $0x71] sm:$0xff] }
 0x36b   : > { %v2386_v16 = vld [vmem:[#allocation4 + $0x1af] sm:$0xff]  ;;  %2312 = vst.msk [vmem:[#allocation4 + $0x1c8] sm:$0xff] %vm2285_vm12, %v2278_v8  ;;  %2539 = vrot.lane.b32.xlu0 %v2449_v10, %s4877_s11  ;;  %v6470_v13 = vld [vmem:[#allocation4 + $0x1a7] sm:$0xff] }
 0x36c   : > { %2418 = vst.msk [vmem:[#allocation5 + $0xd8] sm:$0xff] %vm2285_vm12, %v2386_v16  ;;  %2417 = vst.msk [vmem:[#allocation5 + $0xd0] sm:$0xff] %vm2285_vm12, %v6470_v13  ;;  %v6504_v2 = vld [vmem:[#allocation4 + $0x49] sm:$0xff]  ;;  %v6518_v16 = vld [vmem:[#allocation4 + $0x91] sm:$0xff] }
 0x36d   : > { %v6512_v12 = vld [vmem:[#allocation4 + $0x69] sm:$0xff] }
 0x370   : > { %v4609_v20 = vpop.f32.mrb[28].mxu0 }
 0x371   : > { %v2239_v17 = vadd.f32 %v4609_v20, %v6248_v6  ;;  %v2233_v32 = vpop.f32.mrb[29].mxu0  ;;  %v2452_v43 = vld [vmem:[#allocation4 + $0x1d0] sm:$0xff] }
 0x372   : > { %v2234_v44 = vadd.f32 %v6248_v6, %v2233_v32  ;;  %2545 = vrot.lane.b32.xlu1 %v2452_v43, %s4877_s11  ;;  %v2451_v47 = vld [vmem:[#allocation4 + $0x1c8] sm:$0xff] }
 0x373   : > { %v2388_v50 = vld [vmem:[#allocation4 + $0x1cf] sm:$0xff]  ;;  %v2281_v53 = vmax.f32 %v2239_v17, 0.0  ;;  %2543 = vrot.lane.b32.xlu0 %v2451_v47, %s4877_s11  ;;  %v2387_v15 = vld [vmem:[#allocation4 + $0x1c7] sm:$0xff] }
 0x374   : > { %2420 = vst.msk [vmem:[#allocation5 + $0xe8] sm:$0xff] %vm2285_vm12, %v2388_v50  ;;  %v2280_v18 = vmax.f32 %v2234_v44, 0.0  ;;  %2419 = vst.msk [vmem:[#allocation5 + $0xe0] sm:$0xff] %vm2285_vm12, %v2387_v15  ;;  %v6522_v20 = vld [vmem:[#allocation4 + $0x89] sm:$0xff]  ;;  %v6526_v17 = vld [vmem:[#allocation4 + $0xb1] sm:$0xff] }
 0x375   : > { %2315 = vst.msk [vmem:[#allocation4 + $0x1f0] sm:$0xff] %vm2285_vm12, %v2281_v53  ;;  %v6530_v43 = vld [vmem:[#allocation4 + $0xa9] sm:$0xff]  ;;  %v6536_v47 = vld [vmem:[#allocation4 + $0xd1] sm:$0xff] }
 0x376   : > { %2314 = vst.msk [vmem:[#allocation4 + $0x1e8] sm:$0xff] %vm2285_vm12, %v2280_v18  ;;  %v6540_v50 = vld [vmem:[#allocation4 + $0xc9] sm:$0xff]  ;;  %v6544_v53 = vld [vmem:[#allocation4 + $0xf1] sm:$0xff] }
 0x377   : > { %v6548_v18 = vld [vmem:[#allocation4 + $0xe9] sm:$0xff] }
 0x37c   : > { %v2454_v29 = vld [vmem:[#allocation4 + $0x1f0] sm:$0xff]  ;;  %v2494_v34 = vpop.permute.xlu1 %2493 }
 0x37d   : > { %2549 = vrot.lane.b32.xlu1 %v2454_v29, %s4877_s11  ;;  %v2453_v6 = vld [vmem:[#allocation4 + $0x1e8] sm:$0xff]  ;;  %v2492_v36 = vpop.permute.xlu0 %2491  ;;  %2587 = vst.msk [vmem:[#allocation5 + $0x18] sm:$0xff] %vm2583_vm15, %v2494_v34  ;;  %v6554_v34 = vld [vmem:[#allocation4 + $0x111] sm:$0xff] }
 0x37e   : > { %v2390_v25 = vld [vmem:[#allocation4 + $0x1ef] sm:$0xff]  ;;  %2547 = vrot.lane.b32.xlu0 %v2453_v6, %s4877_s11  ;;  %2586 = vst.msk [vmem:[#allocation5 + $0x10] sm:$0xff] %vm2583_vm15, %v2492_v36  ;;  %v2389_v27 = vld [vmem:[#allocation4 + $0x1e7] sm:$0xff] }
 0x37f   : > { %2422 = vst.msk [vmem:[#allocation5 + $0xf8] sm:$0xff] %vm2285_vm12, %v2390_v25  ;;  %2421 = vst.msk [vmem:[#allocation5 + $0xf0] sm:$0xff] %vm2285_vm12, %v2389_v27  ;;  %v6558_v6 = vld [vmem:[#allocation4 + $0x109] sm:$0xff]  ;;  %v2635_v36 = vld [vmem:[#allocation4 + $0x131] sm:$0xff] }
 0x381   : > { %2682 = vrot.lane.b32.xlu1 %v2617_v37, %s4879_s13  ;;  %v2634_v37 = vld [vmem:[#allocation4 + $0x129] sm:$0xff] }
 0x382   : > { %2680 = vrot.lane.b32.xlu0 %v2616_v31, %s4879_s13  ;;  %v2637_v31 = vld [vmem:[#allocation4 + $0x151] sm:$0xff] }
 0x384   : > { %v2498_v55 = vpop.permute.xlu1 %2497 }
 0x385   : > { %2686 = vrot.lane.b32.xlu1 %v6490_v54, %s4879_s13  ;;  %2589 = vst.msk [vmem:[#allocation5 + $0x28] sm:$0xff] %vm2583_vm15, %v2498_v55  ;;  %v2496_v60 = vpop.permute.xlu0 %2495  ;;  %v2636_v55 = vld [vmem:[#allocation4 + $0x149] sm:$0xff] }
 0x386   : > { %2684 = vrot.lane.b32.xlu0 %v6494_v61, %s4879_s13  ;;  %2588 = vst.msk [vmem:[#allocation5 + $0x20] sm:$0xff] %vm2583_vm15, %v2496_v60  ;;  %v2639_v60 = vld [vmem:[#allocation4 + $0x171] sm:$0xff] }
 0x389   : > { %2690 = vrot.lane.b32.xlu1 %v6500_v62, %s4879_s13 }
 0x38a   : > { %2688 = vrot.lane.b32.xlu0 %v6504_v2, %s4879_s13 }
 0x38c   : > { %v2502_v8 = vpop.permute.xlu1 %2501 }
 0x38d   : > { %2694 = vrot.lane.b32.xlu1 %v6508_v4, %s4879_s13  ;;  %2591 = vst.msk [vmem:[#allocation5 + $0x38] sm:$0xff] %vm2583_vm15, %v2502_v8  ;;  %v2500_v10 = vpop.permute.xlu0 %2499 }
 0x38e   : > { %2692 = vrot.lane.b32.xlu0 %v6512_v12, %s4879_s13  ;;  %2590 = vst.msk [vmem:[#allocation5 + $0x30] sm:$0xff] %vm2583_vm15, %v2500_v10  ;;  %v2638_v10 = vld [vmem:[#allocation4 + $0x169] sm:$0xff] }
 0x391   : > { %2698 = vrot.lane.b32.xlu1 %v6518_v16, %s4879_s13 }
 0x392   : > { %2696 = vrot.lane.b32.xlu0 %v6522_v20, %s4879_s13 }
 0x394   : > { %v2506_v32 = vpop.permute.xlu1 %2505 }
 0x395   : > { %2702 = vrot.lane.b32.xlu1 %v6526_v17, %s4879_s13  ;;  %2593 = vst.msk [vmem:[#allocation5 + $0x48] sm:$0xff] %vm2583_vm15, %v2506_v32  ;;  %v2504_v44 = vpop.permute.xlu0 %2503 }
 0x396   : > { %2700 = vrot.lane.b32.xlu0 %v6530_v43, %s4879_s13  ;;  %2592 = vst.msk [vmem:[#allocation5 + $0x40] sm:$0xff] %vm2583_vm15, %v2504_v44  ;;  %v2641_v44 = vld [vmem:[#allocation4 + $0x191] sm:$0xff] }
 0x399   : > { %2706 = vrot.lane.b32.xlu1 %v6536_v47, %s4879_s13 }
 0x39a   : > { %2704 = vrot.lane.b32.xlu0 %v6540_v50, %s4879_s13 }
 0x39c   : > { %v2510_v15 = vpop.permute.xlu1 %2509 }
 0x39d   : > { %2710 = vrot.lane.b32.xlu1 %v6544_v53, %s4879_s13  ;;  %2595 = vst.msk [vmem:[#allocation5 + $0x58] sm:$0xff] %vm2583_vm15, %v2510_v15  ;;  %v2508_v29 = vpop.permute.xlu0 %2507  ;;  %v2640_v15 = vld [vmem:[#allocation4 + $0x189] sm:$0xff] }
 0x39e   : > { %2708 = vrot.lane.b32.xlu0 %v6548_v18, %s4879_s13  ;;  %2594 = vst.msk [vmem:[#allocation5 + $0x50] sm:$0xff] %vm2583_vm15, %v2508_v29  ;;  %v2643_v29 = vld [vmem:[#allocation4 + $0x1b1] sm:$0xff] }
 0x3a1   : > { %2714 = vrot.lane.b32.xlu1 %v6554_v34, %s4879_s13 }
 0x3a2   : > { %2712 = vrot.lane.b32.xlu0 %v6558_v6, %s4879_s13 }
 0x3a4   : > { %v2514_v25 = vpop.permute.xlu1 %2513 }
 0x3a5   : > { %2718 = vrot.lane.b32.xlu1 %v2635_v36, %s4879_s13  ;;  %2597 = vst.msk [vmem:[#allocation5 + $0x68] sm:$0xff] %vm2583_vm15, %v2514_v25  ;;  %v2512_v27 = vpop.permute.xlu0 %2511  ;;  %v2642_v25 = vld [vmem:[#allocation4 + $0x1a9] sm:$0xff] }
 0x3a6   : > { %2716 = vrot.lane.b32.xlu0 %v2634_v37, %s4879_s13  ;;  %2596 = vst.msk [vmem:[#allocation5 + $0x60] sm:$0xff] %vm2583_vm15, %v2512_v27  ;;  %v2645_v27 = vld [vmem:[#allocation4 + $0x1d1] sm:$0xff] }
 0x3a9   : > { %2722 = vrot.lane.b32.xlu1 %v2637_v31, %s4879_s13  ;;  %v2644_v31 = vld [vmem:[#allocation4 + $0x1c9] sm:$0xff] }
 0x3aa   : > { %2720 = vrot.lane.b32.xlu0 %v2636_v55, %s4879_s13  ;;  %v2002_v55 = vld [vmem:[#allocation3 + $0xf0] sm:$0xff] }
 0x3ab   : > { %4610 = vmatprep.mubr.f32.mxu0 %v2002_v55 }
 0x3ac   : > { %v2518_v8 = vpop.permute.xlu1 %2517 }
 0x3ad   : > { %2726 = vrot.lane.b32.xlu1 %v2639_v60, %s4879_s13  ;;  %2599 = vst.msk [vmem:[#allocation5 + $0x78] sm:$0xff] %vm2583_vm15, %v2518_v8  ;;  %v2516_v32 = vpop.permute.xlu0 %2515  ;;  %v2647_v60 = vld [vmem:[#allocation4 + $0x1f1] sm:$0xff] }
 0x3ae   : > { %2724 = vrot.lane.b32.xlu0 %v2638_v10, %s4879_s13  ;;  %2598 = vst.msk [vmem:[#allocation5 + $0x70] sm:$0xff] %vm2583_vm15, %v2516_v32  ;;  %v2003_v10 = vld [vmem:[#allocation3 + $0xf8] sm:$0xff]  ;;  %v2646_v32 = vld [vmem:[#allocation4 + $0x1e9] sm:$0xff] }
 0x3af   : > { %4611 = vmatmul.mubr.f32.gmra.mrb[30].mxu0 %v2003_v10 }
 0x3b1   : > { %2730 = vrot.lane.b32.xlu1 %v2641_v44, %s4879_s13 }
 0x3b2   : > { %2728 = vrot.lane.b32.xlu0 %v2640_v15, %s4879_s13 }
 0x3b4   : > { %v2522_v36 = vpop.permute.xlu1 %2521 }
 0x3b5   : > { %2734 = vrot.lane.b32.xlu1 %v2643_v29, %s4879_s13  ;;  %2601 = vst.msk [vmem:[#allocation5 + $0x88] sm:$0xff] %vm2583_vm15, %v2522_v36  ;;  %v2520_v37 = vpop.permute.xlu0 %2519 }
 0x3b6   : > { %2732 = vrot.lane.b32.xlu0 %v2642_v25, %s4879_s13  ;;  %2600 = vst.msk [vmem:[#allocation5 + $0x80] sm:$0xff] %vm2583_vm15, %v2520_v37 }
 0x3b9   : > { %2738 = vrot.lane.b32.xlu1 %v2645_v27, %s4879_s13 }
 0x3ba   : > { %2736 = vrot.lane.b32.xlu0 %v2644_v31, %s4879_s13 }
 0x3bc   : > { %v2526_v8 = vpop.permute.xlu1 %2525 }
 0x3bd   : > { %2742 = vrot.lane.b32.xlu1 %v2647_v60, %s4879_s13  ;;  %2603 = vst.msk [vmem:[#allocation5 + $0x98] sm:$0xff] %vm2583_vm15, %v2526_v8  ;;  %v2524_v44 = vpop.permute.xlu0 %2523 }
 0x3be   : > { %2740 = vrot.lane.b32.xlu0 %v2646_v32, %s4879_s13  ;;  %2602 = vst.msk [vmem:[#allocation5 + $0x90] sm:$0xff] %vm2583_vm15, %v2524_v44  ;;  %s4884_s13 = smov 40  }
 0x3c1   : > { %2875 = vrot.lane.b32.xlu1 %v6270_v28, %s4881_s15 }
 0x3c2   : > { %2873 = vrot.lane.b32.xlu0 %v6263_v41, %s4881_s15 }
 0x3c4   : > { %v2530_v15 = vpop.permute.xlu1 %2529 }
 0x3c5   : > { %2879 = vrot.lane.b32.xlu1 %v6283_v11, %s4881_s15  ;;  %2605 = vst.msk [vmem:[#allocation5 + $0xa8] sm:$0xff] %vm2583_vm15, %v2530_v15  ;;  %v2528_v29 = vpop.permute.xlu0 %2527 }
 0x3c6   : > { %2877 = vrot.lane.b32.xlu0 %v6290_v14, %s4881_s15  ;;  %2604 = vst.msk [vmem:[#allocation5 + $0xa0] sm:$0xff] %vm2583_vm15, %v2528_v29 }
 0x3c9   : > { %2883 = vrot.lane.b32.xlu1 %v6303_v35, %s4881_s15 }
 0x3ca   : > { %2881 = vrot.lane.b32.xlu0 %v6310_v49, %s4881_s15 }
 0x3cc   : > { %v2534_v28 = vpop.permute.xlu1 %2533 }
 0x3cd   : > { %2887 = vrot.lane.b32.xlu1 %v6323_v38, %s4881_s15  ;;  %2607 = vst.msk [vmem:[#allocation5 + $0xb8] sm:$0xff] %vm2583_vm15, %v2534_v28  ;;  %v2532_v41 = vpop.permute.xlu0 %2531 }
 0x3ce   : > { %2885 = vrot.lane.b32.xlu0 %v6330_v51, %s4881_s15  ;;  %2606 = vst.msk [vmem:[#allocation5 + $0xb0] sm:$0xff] %vm2583_vm15, %v2532_v41 }
 0x3d1   : > { %2891 = vrot.lane.b32.xlu1 %v6342_v3, %s4881_s15 }
 0x3d2   : > { %2889 = vrot.lane.b32.xlu0 %v6350_v5, %s4881_s15 }
 0x3d4   : > { %v2538_v36 = vpop.permute.xlu1 %2537 }
 0x3d5   : > { %2895 = vrot.lane.b32.xlu1 %v6368_v21, %s4881_s15  ;;  %2609 = vst.msk [vmem:[#allocation5 + $0xc8] sm:$0xff] %vm2583_vm15, %v2538_v36  ;;  %v2536_v25 = vpop.permute.xlu0 %2535 }
 0x3d6   : > { %2893 = vrot.lane.b32.xlu0 %v6370_v42, %s4881_s15  ;;  %2608 = vst.msk [vmem:[#allocation5 + $0xc0] sm:$0xff] %vm2583_vm15, %v2536_v25 }
 0x3d9   : > { %2899 = vrot.lane.b32.xlu1 %v6383_v22, %s4881_s15 }
 0x3da   : > { %2897 = vrot.lane.b32.xlu0 %v6389_v26, %s4881_s15 }
 0x3dc   : > { %v2542_v37 = vpop.permute.xlu1 %2541 }
 0x3dd   : > { %2903 = vrot.lane.b32.xlu1 %v6397_v52, %s4881_s15  ;;  %2611 = vst.msk [vmem:[#allocation5 + $0xd8] sm:$0xff] %vm2583_vm15, %v2542_v37  ;;  %v2540_v27 = vpop.permute.xlu0 %2539 }
 0x3de   : > { %2901 = vrot.lane.b32.xlu0 %v6403_v57, %s4881_s15  ;;  %2610 = vst.msk [vmem:[#allocation5 + $0xd0] sm:$0xff] %vm2583_vm15, %v2540_v27 }
 0x3e1   : > { %3066 = vrot.lane.b32.xlu1 %v6261_v40, %s4883_s17 }
 0x3e2   : > { %2905 = vrot.lane.b32.xlu0 %v6417_v9, %s4881_s15 }
 0x3e4   : > { %v2546_v31 = vpop.permute.xlu1 %2545 }
 0x3e5   : > { %3259 = vrot.lane.b32.xlu1 %v6494_v61, %s4884_s13  ;;  %2613 = vst.msk [vmem:[#allocation5 + $0xe8] sm:$0xff] %vm2583_vm15, %v2546_v31  ;;  %v2544_v55 = vpop.permute.xlu0 %2543 }
 0x3e6   : > { %3068 = vrot.lane.b32.xlu0 %v6256_v0, %s4883_s17  ;;  %2612 = vst.msk [vmem:[#allocation5 + $0xe0] sm:$0xff] %vm2583_vm15, %v2544_v55 }
 0x3e9   : > { %3453 = vrot.lane.b32.xlu1 %v6290_v14, %s4885_s23 }
 0x3ea   : > { %3261 = vrot.lane.b32.xlu0 %v6490_v54, %s4884_s13 }
 0x3ed   : > { %3646 = vrot.lane.b32.xlu1 %v6281_v63, %s4886_s25 }
 0x3ee   : > { %3455 = vrot.lane.b32.xlu0 %v6283_v11, %s4885_s23 }
 0x3ef   : > { %v2550_v40 = vpop.permute.xlu1 %2549 }
 0x3f0   : > { %2615 = vst.msk [vmem:[#allocation5 + $0xf8] sm:$0xff] %vm2583_vm15, %v2550_v40  ;;  %v2548_v0 = vpop.permute.xlu0 %2547 }
 0x3f1   : > { %2614 = vst.msk [vmem:[#allocation5 + $0xf0] sm:$0xff] %vm2583_vm15, %v2548_v0  ;;  %3648 = vrot.lane.b32.xlu1 %v6276_v56, %s4886_s25 }
 0x3f2   : > { %3070 = vrot.lane.b32.xlu0 %v6281_v63, %s4883_s17 }
 0x3f3   : > { %v2683_v14 = vpop.permute.xlu1 %2682 }
 0x3f4   : > { %2778 = vst.msk [vmem:[#allocation5 + $0x8] sm:$0xff] %vm2776_vm0, %v2683_v14  ;;  %v2681_v54 = vpop.permute.xlu0 %2680  ;;  %v3590_v14 = vld [vmem:[#allocation4 + $0xc8] sm:$0xff] }
 0x3f5   : > { %2777 = vst.msk [vmem:[#allocation5] sm:$0xff] %vm2776_vm0, %v2681_v54  ;;  %3072 = vrot.lane.b32.xlu1 %v6276_v56, %s4883_s17 }
 0x3f6   : > { %3839 = vrot.lane.b32.xlu0 %v6504_v2, %s4887_s26 }
 0x3f7   : > { %v2687_v11 = vpop.permute.xlu1 %2686 }
 0x3f8   : > { %2780 = vst.msk [vmem:[#allocation5 + $0x18] sm:$0xff] %vm2776_vm0, %v2687_v11  ;;  %v2685_v61 = vpop.permute.xlu0 %2684 }
 0x3f9   : > { %2779 = vst.msk [vmem:[#allocation5 + $0x10] sm:$0xff] %vm2776_vm0, %v2685_v61  ;;  %3841 = vrot.lane.b32.xlu1 %v6500_v62, %s4887_s26 }
 0x3fa   : > { %3263 = vrot.lane.b32.xlu0 %v6504_v2, %s4884_s13 }
 0x3fb   : > { %v2691_v63 = vpop.permute.xlu1 %2690 }
 0x3fc   : > { %2782 = vst.msk [vmem:[#allocation5 + $0x28] sm:$0xff] %vm2776_vm0, %v2691_v63  ;;  %v2689_v56 = vpop.permute.xlu0 %2688 }
 0x3fd   : > { %2781 = vst.msk [vmem:[#allocation5 + $0x20] sm:$0xff] %vm2776_vm0, %v2689_v56  ;;  %3457 = vrot.lane.b32.xlu1 %v6310_v49, %s4885_s23 }
 0x3fe   : > { %3265 = vrot.lane.b32.xlu0 %v6500_v62, %s4884_s13 }
 0x3ff   : > { %v2695_v60 = vpop.permute.xlu1 %2694 }
 0x400   : > { %2784 = vst.msk [vmem:[#allocation5 + $0x38] sm:$0xff] %vm2776_vm0, %v2695_v60  ;;  %v2693_v8 = vpop.permute.xlu0 %2692 }
 0x401   : > { %2783 = vst.msk [vmem:[#allocation5 + $0x30] sm:$0xff] %vm2776_vm0, %v2693_v8  ;;  %3650 = vrot.lane.b32.xlu1 %v6301_v23, %s4886_s25 }
 0x402   : > { %3459 = vrot.lane.b32.xlu0 %v6303_v35, %s4885_s23 }
 0x403   : > { %v2699_v2 = vpop.permute.xlu1 %2698 }
 0x404   : > { %2786 = vst.msk [vmem:[#allocation5 + $0x48] sm:$0xff] %vm2776_vm0, %v2699_v2  ;;  %v2697_v10 = vpop.permute.xlu0 %2696  ;;  %v3592_v2 = vld [vmem:[#allocation4 + $0xe8] sm:$0xff] }
 0x405   : > { %2785 = vst.msk [vmem:[#allocation5 + $0x40] sm:$0xff] %vm2776_vm0, %v2697_v10  ;;  %3652 = vrot.lane.b32.xlu1 %v6296_v48, %s4886_s25  ;;  %v3593_v10 = vld [vmem:[#allocation4 + $0xf0] sm:$0xff] }
 0x406   : > { %3074 = vrot.lane.b32.xlu0 %v6301_v23, %s4883_s17 }
 0x407   : > { %v2703_v49 = vpop.permute.xlu1 %2702 }
 0x408   : > { %2788 = vst.msk [vmem:[#allocation5 + $0x58] sm:$0xff] %vm2776_vm0, %v2703_v49  ;;  %v2701_v62 = vpop.permute.xlu0 %2700 }
 0x409   : > { %2787 = vst.msk [vmem:[#allocation5 + $0x50] sm:$0xff] %vm2776_vm0, %v2701_v62  ;;  %3076 = vrot.lane.b32.xlu1 %v6296_v48, %s4883_s17 }
 0x40a   : > { %3843 = vrot.lane.b32.xlu0 %v6512_v12, %s4887_s26 }
 0x40b   : > { %v2707_v35 = vpop.permute.xlu1 %2706 }
 0x40c   : > { %2790 = vst.msk [vmem:[#allocation5 + $0x68] sm:$0xff] %vm2776_vm0, %v2707_v35  ;;  %v2705_v32 = vpop.permute.xlu0 %2704 }
 0x40d   : > { %2789 = vst.msk [vmem:[#allocation5 + $0x60] sm:$0xff] %vm2776_vm0, %v2705_v32  ;;  %3845 = vrot.lane.b32.xlu1 %v6508_v4, %s4887_s26 }
 0x40e   : > { %3267 = vrot.lane.b32.xlu0 %v6512_v12, %s4884_s13 }
 0x40f   : > { %v2711_v23 = vpop.permute.xlu1 %2710 }
 0x410   : > { %2792 = vst.msk [vmem:[#allocation5 + $0x78] sm:$0xff] %vm2776_vm0, %v2711_v23  ;;  %v2709_v44 = vpop.permute.xlu0 %2708 }
 0x411   : > { %2791 = vst.msk [vmem:[#allocation5 + $0x70] sm:$0xff] %vm2776_vm0, %v2709_v44  ;;  %3461 = vrot.lane.b32.xlu1 %v6330_v51, %s4885_s23 }
 0x412   : > { %3269 = vrot.lane.b32.xlu0 %v6508_v4, %s4884_s13 }
 0x413   : > { %v2715_v48 = vpop.permute.xlu1 %2714 }
 0x414   : > { %2794 = vst.msk [vmem:[#allocation5 + $0x88] sm:$0xff] %vm2776_vm0, %v2715_v48  ;;  %v2713_v15 = vpop.permute.xlu0 %2712  ;;  %v3594_v48 = vld [vmem:[#allocation4 + $0x108] sm:$0xff] }
 0x415   : > { %2793 = vst.msk [vmem:[#allocation5 + $0x80] sm:$0xff] %vm2776_vm0, %v2713_v15  ;;  %3654 = vrot.lane.b32.xlu1 %v6321_v30, %s4886_s25  ;;  %v3595_v15 = vld [vmem:[#allocation4 + $0x110] sm:$0xff] }
 0x416   : > { %3463 = vrot.lane.b32.xlu0 %v6323_v38, %s4885_s23 }
 0x417   : > { %v2719_v12 = vpop.permute.xlu1 %2718 }
 0x418   : > { %2796 = vst.msk [vmem:[#allocation5 + $0x98] sm:$0xff] %vm2776_vm0, %v2719_v12  ;;  %v2717_v29 = vpop.permute.xlu0 %2716 }
 0x419   : > { %2795 = vst.msk [vmem:[#allocation5 + $0x90] sm:$0xff] %vm2776_vm0, %v2717_v29  ;;  %3656 = vrot.lane.b32.xlu1 %v6316_v45, %s4886_s25 }
 0x41a   : > { %3078 = vrot.lane.b32.xlu0 %v6321_v30, %s4883_s17 }
 0x41b   : > { %v2723_v51 = vpop.permute.xlu1 %2722 }
 0x41c   : > { %2798 = vst.msk [vmem:[#allocation5 + $0xa8] sm:$0xff] %vm2776_vm0, %v2723_v51  ;;  %v2721_v4 = vpop.permute.xlu0 %2720 }
 0x41d   : > { %2797 = vst.msk [vmem:[#allocation5 + $0xa0] sm:$0xff] %vm2776_vm0, %v2721_v4  ;;  %3080 = vrot.lane.b32.xlu1 %v6316_v45, %s4883_s17 }
 0x41e   : > { %3847 = vrot.lane.b32.xlu0 %v6522_v20, %s4887_s26 }
 0x41f   : > { %v2727_v38 = vpop.permute.xlu1 %2726 }
 0x420   : > { %2800 = vst.msk [vmem:[#allocation5 + $0xb8] sm:$0xff] %vm2776_vm0, %v2727_v38  ;;  %v2725_v28 = vpop.permute.xlu0 %2724 }
 0x421   : > { %2799 = vst.msk [vmem:[#allocation5 + $0xb0] sm:$0xff] %vm2776_vm0, %v2725_v28  ;;  %3849 = vrot.lane.b32.xlu1 %v6518_v16, %s4887_s26 }
 0x422   : > { %3271 = vrot.lane.b32.xlu0 %v6522_v20, %s4884_s13 }
 0x423   : > { %v2731_v30 = vpop.permute.xlu1 %2730 }
 0x424   : > { %2802 = vst.msk [vmem:[#allocation5 + $0xc8] sm:$0xff] %vm2776_vm0, %v2731_v30  ;;  %v2729_v41 = vpop.permute.xlu0 %2728  ;;  %v3596_v30 = vld [vmem:[#allocation4 + $0x128] sm:$0xff] }
 0x425   : > { %2801 = vst.msk [vmem:[#allocation5 + $0xc0] sm:$0xff] %vm2776_vm0, %v2729_v41  ;;  %3465 = vrot.lane.b32.xlu1 %v6350_v5, %s4885_s23  ;;  %v3589_v5 = vld [vmem:[#allocation4 + $0xb0] sm:$0xff] }
 0x426   : > { %3273 = vrot.lane.b32.xlu0 %v6518_v16, %s4884_s13  ;;  %v3010_v16 = vld [vmem:[#allocation4 + $0xa8] sm:$0xff] }
 0x427   : > { %v2735_v45 = vpop.permute.xlu1 %2734 }
 0x428   : > { %2804 = vst.msk [vmem:[#allocation5 + $0xd8] sm:$0xff] %vm2776_vm0, %v2735_v45  ;;  %v2733_v36 = vpop.permute.xlu0 %2732  ;;  %v3789_v45 = vld [vmem:[#allocation4 + $0x129] sm:$0xff] }
 0x429   : > { %2803 = vst.msk [vmem:[#allocation5 + $0xd0] sm:$0xff] %vm2776_vm0, %v2733_v36  ;;  %3658 = vrot.lane.b32.xlu1 %v6340_v1, %s4886_s25  ;;  %v3597_v36 = vld [vmem:[#allocation4 + $0x130] sm:$0xff] }
 0x42a   : > { %3467 = vrot.lane.b32.xlu0 %v6342_v3, %s4885_s23 }
 0x42b   : > { %v2739_v20 = vpop.permute.xlu1 %2738 }
 0x42c   : > { %2806 = vst.msk [vmem:[#allocation5 + $0xe8] sm:$0xff] %vm2776_vm0, %v2739_v20  ;;  %v2737_v25 = vpop.permute.xlu0 %2736 }
 0x42d   : > { %2805 = vst.msk [vmem:[#allocation5 + $0xe0] sm:$0xff] %vm2776_vm0, %v2737_v25  ;;  %3660 = vrot.lane.b32.xlu1 %v3589_v5, %s4886_s25 }
 0x42e   : > { %3082 = vrot.lane.b32.xlu0 %v3010_v16, %s4883_s17  ;;  %v3212_v16 = vld [vmem:[#allocation4 + $0x131] sm:$0xff] }
 0x42f   : > { %v2743_v37 = vpop.permute.xlu1 %2742 }
 0x430   : > { %2808 = vst.msk [vmem:[#allocation5 + $0xf8] sm:$0xff] %vm2776_vm0, %v2743_v37  ;;  %v2741_v27 = vpop.permute.xlu0 %2740 }
 0x431   : > { %2807 = vst.msk [vmem:[#allocation5 + $0xf0] sm:$0xff] %vm2776_vm0, %v2741_v27  ;;  %3084 = vrot.lane.b32.xlu1 %v3589_v5, %s4883_s17 }
 0x432   : > { %3851 = vrot.lane.b32.xlu0 %v6530_v43, %s4887_s26 }
 0x433   : > { %v2876_v1 = vpop.permute.xlu1 %2875 }
 0x434   : > { %2971 = vst.msk [vmem:[#allocation5 + $0x8] sm:$0xff] %vm2969_vm1, %v2876_v1  ;;  %v2874_v3 = vpop.permute.xlu0 %2873 }
 0x435   : > { %2970 = vst.msk [vmem:[#allocation5] sm:$0xff] %vm2969_vm1, %v2874_v3  ;;  %3853 = vrot.lane.b32.xlu1 %v6526_v17, %s4887_s26 }
 0x436   : > { %3275 = vrot.lane.b32.xlu0 %v6530_v43, %s4884_s13 }
 0x437   : > { %v2880_v31 = vpop.permute.xlu1 %2879 }
 0x438   : > { %2973 = vst.msk [vmem:[#allocation5 + $0x18] sm:$0xff] %vm2969_vm1, %v2880_v31  ;;  %v2878_v55 = vpop.permute.xlu0 %2877  ;;  %v3598_v31 = vld [vmem:[#allocation4 + $0x148] sm:$0xff] }
 0x439   : > { %2972 = vst.msk [vmem:[#allocation5 + $0x10] sm:$0xff] %vm2969_vm1, %v2878_v55  ;;  %3469 = vrot.lane.b32.xlu1 %v6370_v42, %s4885_s23  ;;  %v3591_v42 = vld [vmem:[#allocation4 + $0xd0] sm:$0xff] }
 0x43a   : > { %3277 = vrot.lane.b32.xlu0 %v6526_v17, %s4884_s13 }
 0x43b   : > { %v2884_v40 = vpop.permute.xlu1 %2883 }
 0x43c   : > { %2975 = vst.msk [vmem:[#allocation5 + $0x28] sm:$0xff] %vm2969_vm1, %v2884_v40  ;;  %v2882_v0 = vpop.permute.xlu0 %2881  ;;  %v4810_v40 = vld [vmem:[%s7350_s2] ss:$0 sm:$0xff] }
 0x43d   : > { %2974 = vst.msk [vmem:[#allocation5 + $0x20] sm:$0xff] %vm2969_vm1, %v2882_v0  ;;  %3662 = vrot.lane.b32.xlu1 %v3590_v14, %s4886_s25 }
 0x43e   : > { %3471 = vrot.lane.b32.xlu0 %v6368_v21, %s4885_s23 }
 0x43f   : > { %v2888_v43 = vpop.permute.xlu1 %2887 }
 0x440   : > { %2977 = vst.msk [vmem:[#allocation5 + $0x38] sm:$0xff] %vm2969_vm1, %v2888_v43  ;;  %v2886_v54 = vpop.permute.xlu0 %2885 }
 0x441   : > { %2976 = vst.msk [vmem:[#allocation5 + $0x30] sm:$0xff] %vm2969_vm1, %v2886_v54  ;;  %3664 = vrot.lane.b32.xlu1 %v3591_v42, %s4886_s25 }
 0x442   : > { %3086 = vrot.lane.b32.xlu0 %v3590_v14, %s4883_s17 }
 0x443   : > { %v2892_v17 = vpop.permute.xlu1 %2891 }
 0x444   : > { %2979 = vst.msk [vmem:[#allocation5 + $0x48] sm:$0xff] %vm2969_vm1, %v2892_v17  ;;  %v2890_v11 = vpop.permute.xlu0 %2889 }
 0x445   : > { %2978 = vst.msk [vmem:[#allocation5 + $0x40] sm:$0xff] %vm2969_vm1, %v2890_v11  ;;  %3088 = vrot.lane.b32.xlu1 %v3591_v42, %s4883_s17 }
 0x446   : > { %3855 = vrot.lane.b32.xlu0 %v6540_v50, %s4887_s26 }
 0x447   : > { %v2896_v21 = vpop.permute.xlu1 %2895 }
 0x448   : > { %2981 = vst.msk [vmem:[#allocation5 + $0x58] sm:$0xff] %vm2969_vm1, %v2896_v21  ;;  %v2894_v61 = vpop.permute.xlu0 %2893 }
 0x449   : > { %2980 = vst.msk [vmem:[#allocation5 + $0x50] sm:$0xff] %vm2969_vm1, %v2894_v61  ;;  %3857 = vrot.lane.b32.xlu1 %v6536_v47, %s4887_s26  ;;  %v3791_v61 = vld [vmem:[#allocation4 + $0x149] sm:$0xff] }
 0x44a   : > { %3279 = vrot.lane.b32.xlu0 %v6540_v50, %s4884_s13 }
 0x44b   : > { %v2900_v63 = vpop.permute.xlu1 %2899 }
 0x44c   : > { %2983 = vst.msk [vmem:[#allocation5 + $0x68] sm:$0xff] %vm2969_vm1, %v2900_v63  ;;  %v2898_v56 = vpop.permute.xlu0 %2897  ;;  %v3599_v63 = vld [vmem:[#allocation4 + $0x150] sm:$0xff] }
 0x44d   : > { %2982 = vst.msk [vmem:[#allocation5 + $0x60] sm:$0xff] %vm2969_vm1, %v2898_v56  ;;  %3473 = vrot.lane.b32.xlu1 %v6389_v26, %s4885_s23 }
 0x44e   : > { %3281 = vrot.lane.b32.xlu0 %v6536_v47, %s4884_s13 }
 0x44f   : > { %v2904_v60 = vpop.permute.xlu1 %2903 }
 0x450   : > { %2985 = vst.msk [vmem:[#allocation5 + $0x78] sm:$0xff] %vm2969_vm1, %v2904_v60  ;;  %v2902_v8 = vpop.permute.xlu0 %2901 }
 0x451   : > { %2984 = vst.msk [vmem:[#allocation5 + $0x70] sm:$0xff] %vm2969_vm1, %v2902_v8  ;;  %3666 = vrot.lane.b32.xlu1 %v3592_v2, %s4886_s25 }
 0x452   : > { %3475 = vrot.lane.b32.xlu0 %v6383_v22, %s4885_s23 }
 0x453   : > { %v3067_v50 = vpop.permute.xlu1 %3066 }
 0x454   : > { %3163 = vst.msk [vmem:[#allocation5] sm:$0xff] %vm3162_vm2, %v3067_v50  ;;  %v2906_v26 = vpop.permute.xlu0 %2905 }
 0x455   : > { %2986 = vst.msk [vmem:[#allocation5 + $0x80] sm:$0xff] %vm2969_vm1, %v2906_v26  ;;  %3668 = vrot.lane.b32.xlu1 %v3593_v10, %s4886_s25 }
 0x456   : > { %3090 = vrot.lane.b32.xlu0 %v3592_v2, %s4883_s17  ;;  %v3214_v2 = vld [vmem:[#allocation4 + $0x151] sm:$0xff] }
 0x457   : > { %v3260_v47 = vpop.permute.xlu1 %3259 }
 0x458   : > { %3356 = vst.msk [vmem:[#allocation5] sm:$0xff] %vm3355_vm3, %v3260_v47  ;;  %v3069_v49 = vpop.permute.xlu0 %3068 }
 0x459   : > { %3164 = vst.msk [vmem:[#allocation5 + $0x8] sm:$0xff] %vm3162_vm2, %v3069_v49  ;;  %3092 = vrot.lane.b32.xlu1 %v3593_v10, %s4883_s17  ;;  %v3600_v49 = vld [vmem:[#allocation4 + $0x168] sm:$0xff] }
 0x45a   : > { %3859 = vrot.lane.b32.xlu0 %v6548_v18, %s4887_s26 }
 0x45b   : > { %v3454_v22 = vpop.permute.xlu1 %3453 }
 0x45c   : > { %3550 = vst.msk [vmem:[#allocation5] sm:$0xff] %vm3549_vm4, %v3454_v22  ;;  %v3262_v62 = vpop.permute.xlu0 %3261 }
 0x45d   : > { %3357 = vst.msk [vmem:[#allocation5 + $0x8] sm:$0xff] %vm3355_vm3, %v3262_v62  ;;  %3861 = vrot.lane.b32.xlu1 %v6544_v53, %s4887_s26 }
 0x45e   : > { %3283 = vrot.lane.b32.xlu0 %v6548_v18, %s4884_s13 }
 0x45f   : > { %v3647_v35 = vpop.permute.xlu1 %3646 }
 0x460   : > { %3743 = vst.msk [vmem:[#allocation5] sm:$0xff] %vm3742_vm5, %v3647_v35  ;;  %v3456_v32 = vpop.permute.xlu0 %3455 }
 0x461   : > { %3551 = vst.msk [vmem:[#allocation5 + $0x8] sm:$0xff] %vm3549_vm4, %v3456_v32  ;;  %3477 = vrot.lane.b32.xlu1 %v6403_v57, %s4885_s23  ;;  %v3793_v32 = vld [vmem:[#allocation4 + $0x169] sm:$0xff] }
 0x462   : > { %3285 = vrot.lane.b32.xlu0 %v6544_v53, %s4884_s13 }
 0x463   : > { %v3649_v23 = vpop.permute.xlu1 %3648 }
 0x464   : > { %3744 = vst.msk [vmem:[#allocation5 + $0x8] sm:$0xff] %vm3742_vm5, %v3649_v23  ;;  %v3071_v44 = vpop.permute.xlu0 %3070  ;;  %v3601_v23 = vld [vmem:[#allocation4 + $0x170] sm:$0xff] }
 0x465   : > { %3165 = vst.msk [vmem:[#allocation5 + $0x10] sm:$0xff] %vm3162_vm2, %v3071_v44  ;;  %3670 = vrot.lane.b32.xlu1 %v3594_v48, %s4886_s25 }
 0x466   : > { %3479 = vrot.lane.b32.xlu0 %v6397_v52, %s4885_s23 }
 0x467   : > { %v3073_v18 = vpop.permute.xlu1 %3072 }
 0x468   : > { %3166 = vst.msk [vmem:[#allocation5 + $0x18] sm:$0xff] %vm3162_vm2, %v3073_v18  ;;  %v3840_v57 = vpop.permute.xlu0 %3839 }
 0x469   : > { %3936 = vst.msk [vmem:[#allocation5] sm:$0xff] %vm3935_vm6, %v3840_v57  ;;  %3672 = vrot.lane.b32.xlu1 %v3595_v15, %s4886_s25  ;;  %v3216_v57 = vld [vmem:[#allocation4 + $0x171] sm:$0xff] }
 0x46a   : > { %3969 = vst.msk [vmem:[#allocation5] sm:$0xff] %vm3968_vm7, %v7448_v46  ;;  %3094 = vrot.lane.b32.xlu0 %v3594_v48, %s4883_s17 }
 0x46b   : > { %v3842_v53 = vpop.permute.xlu1 %3841 }
 0x46c   : > { %3937 = vst.msk [vmem:[#allocation5 + $0x8] sm:$0xff] %vm3935_vm6, %v3842_v53  ;;  %v3264_v52 = vpop.permute.xlu0 %3263 }
 0x46d   : > { %3970 = vst.msk [vmem:[#allocation5 + $0x8] sm:$0xff] %vm3968_vm7, %v7448_v46  ;;  %3096 = vrot.lane.b32.xlu1 %v3595_v15, %s4883_s17 }
 0x46e   : > { %3358 = vst.msk [vmem:[#allocation5 + $0x10] sm:$0xff] %vm3355_vm3, %v3264_v52  ;;  %3863 = vrot.lane.b32.xlu0 %v6558_v6, %s4887_s26 }
 0x46f   : > { %v3458_v12 = vpop.permute.xlu1 %3457 }
 0x470   : > { %3552 = vst.msk [vmem:[#allocation5 + $0x10] sm:$0xff] %vm3549_vm4, %v3458_v12  ;;  %v3266_v29 = vpop.permute.xlu0 %3265 }
 0x471   : > { %3359 = vst.msk [vmem:[#allocation5 + $0x18] sm:$0xff] %vm3355_vm3, %v3266_v29  ;;  %3865 = vrot.lane.b32.xlu1 %v6554_v34, %s4887_s26  ;;  %v3602_v29 = vld [vmem:[#allocation4 + $0x188] sm:$0xff] }
 0x472   : > { %3287 = vrot.lane.b32.xlu0 %v6558_v6, %s4884_s13 }
 0x473   : > { %v3651_v51 = vpop.permute.xlu1 %3650 }
 0x474   : > { %3745 = vst.msk [vmem:[#allocation5 + $0x10] sm:$0xff] %vm3742_vm5, %v3651_v51  ;;  %v3460_v4 = vpop.permute.xlu0 %3459 }
 0x475   : > { %3553 = vst.msk [vmem:[#allocation5 + $0x18] sm:$0xff] %vm3549_vm4, %v3460_v4  ;;  %3481 = vrot.lane.b32.xlu1 %v6417_v9, %s4885_s23 }
 0x476   : > { %3289 = vrot.lane.b32.xlu0 %v6554_v34, %s4884_s13 }
 0x477   : > { %v3653_v38 = vpop.permute.xlu1 %3652 }
 0x478   : > { %3746 = vst.msk [vmem:[#allocation5 + $0x18] sm:$0xff] %vm3742_vm5, %v3653_v38  ;;  %v3075_v28 = vpop.permute.xlu0 %3074 }
 0x479   : > { %3167 = vst.msk [vmem:[#allocation5 + $0x20] sm:$0xff] %vm3162_vm2, %v3075_v28  ;;  %3674 = vrot.lane.b32.xlu1 %v3596_v30, %s4886_s25  ;;  %v3795_v28 = vld [vmem:[#allocation4 + $0x189] sm:$0xff] }
 0x47a   : > { %3483 = vrot.lane.b32.xlu0 %v6411_v7, %s4885_s23 }
 0x47b   : > { %v3077_v6 = vpop.permute.xlu1 %3076 }
 0x47c   : > { %3168 = vst.msk [vmem:[#allocation5 + $0x28] sm:$0xff] %vm3162_vm2, %v3077_v6  ;;  %v3844_v41 = vpop.permute.xlu0 %3843 }
 0x47d   : > { %3938 = vst.msk [vmem:[#allocation5 + $0x10] sm:$0xff] %vm3935_vm6, %v3844_v41  ;;  %3098 = vrot.lane.b32.xlu1 %v3596_v30, %s4883_s17  ;;  %v3603_v30 = vld [vmem:[#allocation4 + $0x190] sm:$0xff] }
 0x47e   : > { %3971 = vst.msk [vmem:[#allocation5 + $0x10] sm:$0xff] %vm3968_vm7, %v7448_v46  ;;  %2907 = vrot.lane.b32.xlu0 %v6411_v7, %s4881_s15 }
 0x47f   : > { %v3846_v9 = vpop.permute.xlu1 %3845 }
 0x480   : > { %3939 = vst.msk [vmem:[#allocation5 + $0x18] sm:$0xff] %vm3935_vm6, %v3846_v9  ;;  %v3268_v34 = vpop.permute.xlu0 %3267 }
 0x481   : > { %3972 = vst.msk [vmem:[#allocation5 + $0x18] sm:$0xff] %vm3968_vm7, %v7448_v46  ;;  %3867 = vrot.lane.b32.xlu1 %v3789_v45, %s4887_s26 }
 0x482   : > { %3360 = vst.msk [vmem:[#allocation5 + $0x20] sm:$0xff] %vm3355_vm3, %v3268_v34  ;;  %3676 = vrot.lane.b32.xlu0 %v3597_v36, %s4886_s25  ;;  %v4612_v55 = vpop.f32.mrb[30].mxu0  ;;  %v3218_v34 = vld [vmem:[#allocation4 + $0x191] sm:$0xff] }
 0x483   : > { %v3462_v20 = vpop.permute.xlu1 %3461  ;;  %v2249_v0 = vadd.f32 %v4810_v40, %v4612_v55  ;;  %v2243_v14 = vpop.f32.mrb[31].mxu0 }
 0x484   : > { %3554 = vst.msk [vmem:[#allocation5 + $0x20] sm:$0xff] %vm3549_vm4, %v3462_v20  ;;  %v3270_v25 = vpop.permute.xlu0 %3269  ;;  %v3411_v20 = vld [vmem:[#allocation4 + $0x1a7] sm:$0xff] }
 0x485   : > { %3361 = vst.msk [vmem:[#allocation5 + $0x28] sm:$0xff] %vm3355_vm3, %v3270_v25  ;;  %3291 = vrot.lane.b32.xlu1 %v3789_v45, %s4884_s13  ;;  %v2283_v54 = vmax.f32 %v2249_v0, 0.0  ;;  %v3605_v0 = vld [vmem:[#allocation4 + $0x1b0] sm:$0xff] }
 0x486   : > { %3100 = vrot.lane.b32.xlu0 %v3597_v36, %s4883_s17 }
 0x487   : > { %v3655_v7 = vpop.permute.xlu1 %3654  ;;  %2317 = vst.msk [vmem:[#allocation4 + $0x210] sm:$0xff] %vm2285_vm12, %v2283_v54 }
 0x488   : > { %3747 = vst.msk [vmem:[#allocation5 + $0x20] sm:$0xff] %vm3742_vm5, %v3655_v7  ;;  %v3464_v5 = vpop.permute.xlu0 %3463 }
 0x489   : > { %3555 = vst.msk [vmem:[#allocation5 + $0x28] sm:$0xff] %vm3549_vm4, %v3464_v5  ;;  %3293 = vrot.lane.b32.xlu1 %v3212_v16, %s4884_s13  ;;  %v3604_v5 = vld [vmem:[#allocation4 + $0x1a8] sm:$0xff] }
 0x48a   : > { %3869 = vrot.lane.b32.xlu0 %v3212_v16, %s4887_s26  ;;  %v3412_v16 = vld [vmem:[#allocation4 + $0x1af] sm:$0xff] }
 0x48b   : > { %v3657_v37 = vpop.permute.xlu1 %3656 }
 0x48c   : > { %3748 = vst.msk [vmem:[#allocation5 + $0x28] sm:$0xff] %vm3742_vm5, %v3657_v37  ;;  %v3079_v27 = vpop.permute.xlu0 %3078 }
 0x48d   : > { %3169 = vst.msk [vmem:[#allocation5 + $0x30] sm:$0xff] %vm3162_vm2, %v3079_v27  ;;  %2909 = vrot.lane.b32.xlu1 %v6431_v39, %s4881_s15 }
 0x48e   : > { %3485 = vrot.lane.b32.xlu0 %v6431_v39, %s4885_s23  ;;  %v2244_v39 = vadd.f32 %v4810_v40, %v2243_v14  ;;  %v3797_v40 = vld [vmem:[#allocation4 + $0x1a9] sm:$0xff] }
 0x48f   : > { %v3081_v1 = vpop.permute.xlu1 %3080  ;;  %v4035_v14 = vld [vmem:[%s7351_s3 + $0x10] sm:$0xff] }
 0x490   : > { %3170 = vst.msk [vmem:[#allocation5 + $0x38] sm:$0xff] %vm3162_vm2, %v3081_v1  ;;  %v3848_v3 = vpop.permute.xlu0 %3847  ;;  %v2282_v17 = vmax.f32 %v2244_v39, 0.0  ;;  %v4034_v1 = vld [vmem:[%s7351_s3 + $0x8] sm:$0xff]  ;;  %v4036_v39 = vld [vmem:[%s7351_s3 + $0x18] sm:$0xff] }
 0x491   : > { %3940 = vst.msk [vmem:[#allocation5 + $0x20] sm:$0xff] %vm3935_vm6, %v3848_v3  ;;  %3678 = vrot.lane.b32.xlu1 %v3598_v31, %s4886_s25 }
 0x492   : > { %3973 = vst.msk [vmem:[#allocation5 + $0x20] sm:$0xff] %vm3968_vm7, %v7448_v46  ;;  %3487 = vrot.lane.b32.xlu0 %v6425_v24, %s4885_s23 }
 0x493   : > { %v3850_v43 = vpop.permute.xlu1 %3849  ;;  %2316 = vst.msk [vmem:[#allocation4 + $0x208] sm:$0xff] %vm2285_vm12, %v2282_v17  ;;  %v4037_v17 = vld [vmem:[%s7351_s3 + $0x20] sm:$0xff] }
 0x494   : > { %3941 = vst.msk [vmem:[#allocation5 + $0x28] sm:$0xff] %vm3935_vm6, %v3850_v43  ;;  %v3272_v42 = vpop.permute.xlu0 %3271  ;;  %v4729_v43 = vpack.c.bf16 %v4036_v39, %v4035_v14 }
 0x495   : > { %3974 = vst.msk [vmem:[#allocation5 + $0x28] sm:$0xff] %vm3968_vm7, %v7448_v46  ;;  %3102 = vrot.lane.b32.xlu1 %v3598_v31, %s4883_s17 }
 0x496   : > { %3362 = vst.msk [vmem:[#allocation5 + $0x30] sm:$0xff] %vm3355_vm3, %v3272_v42  ;;  %2911 = vrot.lane.b32.xlu0 %v6425_v24, %s4881_s15 }
 0x497   : > { %v3466_v11 = vpop.permute.xlu1 %3465 }
 0x498   : > { %3556 = vst.msk [vmem:[#allocation5 + $0x30] sm:$0xff] %vm3549_vm4, %v3466_v11  ;;  %v3274_v21 = vpop.permute.xlu0 %3273  ;;  %v4038_v11 = vld [vmem:[%s7351_s3 + $0x28] sm:$0xff] }
 0x499   : > { %3363 = vst.msk [vmem:[#allocation5 + $0x38] sm:$0xff] %vm3355_vm3, %v3274_v21  ;;  %3871 = vrot.lane.b32.xlu1 %v3791_v61, %s4887_s26  ;;  %v4733_v21 = vpack.c.bf16 %v4038_v11, %v4037_v17 }
 0x49a   : > { %3680 = vrot.lane.b32.xlu0 %v3599_v63, %s4886_s25 }
 0x49b   : > { %v3659_v56 = vpop.permute.xlu1 %3658 }
 0x49c   : > { %3749 = vst.msk [vmem:[#allocation5 + $0x30] sm:$0xff] %vm3742_vm5, %v3659_v56  ;;  %v3468_v60 = vpop.permute.xlu0 %3467  ;;  %v3220_v56 = vld [vmem:[#allocation4 + $0x1b1] sm:$0xff] }
 0x49d   : > { %3557 = vst.msk [vmem:[#allocation5 + $0x38] sm:$0xff] %vm3549_vm4, %v3468_v60  ;;  %3295 = vrot.lane.b32.xlu1 %v3791_v61, %s4884_s13  ;;  %v4039_v60 = vld [vmem:[%s7351_s3 + $0x30] sm:$0xff] }
 0x49e   : > { %3104 = vrot.lane.b32.xlu0 %v3599_v63, %s4883_s17 }
 0x49f   : > { %v3661_v24 = vpop.permute.xlu1 %3660 }
 0x4a0   : > { %3750 = vst.msk [vmem:[#allocation5 + $0x38] sm:$0xff] %vm3742_vm5, %v3661_v24  ;;  %v3083_v8 = vpop.permute.xlu0 %3082  ;;  %v4040_v24 = vld [vmem:[%s7351_s3 + $0x38] sm:$0xff] }
 0x4a1   : > { %3171 = vst.msk [vmem:[#allocation5 + $0x40] sm:$0xff] %vm3162_vm2, %v3083_v8  ;;  %3297 = vrot.lane.b32.xlu1 %v3214_v2, %s4884_s13  ;;  %v4737_v8 = vpack.c.bf16 %v4040_v24, %v4039_v60  ;;  %v3224_v24 = vld [vmem:[#allocation4 + $0x1f1] sm:$0xff] }
 0x4a2   : > { %3873 = vrot.lane.b32.xlu0 %v3214_v2, %s4887_s26 }
 0x4a3   : > { %v3085_v50 = vpop.permute.xlu1 %3084 }
 0x4a4   : > { %3172 = vst.msk [vmem:[#allocation5 + $0x48] sm:$0xff] %vm3162_vm2, %v3085_v50  ;;  %v3852_v26 = vpop.permute.xlu0 %3851 }
 0x4a5   : > { %3942 = vst.msk [vmem:[#allocation5 + $0x30] sm:$0xff] %vm3935_vm6, %v3852_v26  ;;  %2913 = vrot.lane.b32.xlu1 %v6445_v33, %s4881_s15  ;;  %v2835_v26 = vld [vmem:[#allocation4 + $0x1c7] sm:$0xff] }
 0x4a6   : > { %3975 = vst.msk [vmem:[#allocation5 + $0x30] sm:$0xff] %vm3968_vm7, %v7448_v46  ;;  %3489 = vrot.lane.b32.xlu0 %v6445_v33, %s4885_s23 }
 0x4a7   : > { %v3854_v10 = vpop.permute.xlu1 %3853 }
 0x4a8   : > { %3943 = vst.msk [vmem:[#allocation5 + $0x38] sm:$0xff] %vm3935_vm6, %v3854_v10  ;;  %v3276_v47 = vpop.permute.xlu0 %3275  ;;  %v4041_v10 = vld [vmem:[%s7351_s3 + $0x40] sm:$0xff] }
 0x4a9   : > { %3976 = vst.msk [vmem:[#allocation5 + $0x38] sm:$0xff] %vm3968_vm7, %v7448_v46  ;;  %3682 = vrot.lane.b32.xlu1 %v3600_v49, %s4886_s25 }
 0x4aa   : > { %3364 = vst.msk [vmem:[#allocation5 + $0x40] sm:$0xff] %vm3355_vm3, %v3276_v47  ;;  %3491 = vrot.lane.b32.xlu0 %v6439_v19, %s4885_s23  ;;  %v4042_v47 = vld [vmem:[%s7351_s3 + $0x48] sm:$0xff] }
 0x4ab   : > { %v3470_v22 = vpop.permute.xlu1 %3469 }
 0x4ac   : > { %3558 = vst.msk [vmem:[#allocation5 + $0x40] sm:$0xff] %vm3549_vm4, %v3470_v22  ;;  %v3278_v62 = vpop.permute.xlu0 %3277 }
 0x4ad   : > { %3365 = vst.msk [vmem:[#allocation5 + $0x48] sm:$0xff] %vm3355_vm3, %v3278_v62  ;;  %3106 = vrot.lane.b32.xlu1 %v3600_v49, %s4883_s17  ;;  %v4741_v49 = vpack.c.bf16 %v4042_v47, %v4041_v10 }
 0x4ae   : > { %2915 = vrot.lane.b32.xlu0 %v6439_v19, %s4881_s15 }
 0x4af   : > { %v3663_v33 = vpop.permute.xlu1 %3662 }
 0x4b0   : > { %3751 = vst.msk [vmem:[#allocation5 + $0x40] sm:$0xff] %vm3742_vm5, %v3663_v33  ;;  %v3472_v35 = vpop.permute.xlu0 %3471  ;;  %v3606_v33 = vld [vmem:[#allocation4 + $0x1c8] sm:$0xff] }
 0x4b1   : > { %3559 = vst.msk [vmem:[#allocation5 + $0x48] sm:$0xff] %vm3549_vm4, %v3472_v35  ;;  %3875 = vrot.lane.b32.xlu1 %v3793_v32, %s4887_s26  ;;  %v3414_v35 = vld [vmem:[#allocation4 + $0x1cf] sm:$0xff] }
 0x4b2   : > { %3684 = vrot.lane.b32.xlu0 %v3601_v23, %s4886_s25 }
 0x4b3   : > { %v3665_v44 = vpop.permute.xlu1 %3664 }
 0x4b4   : > { %3752 = vst.msk [vmem:[#allocation5 + $0x48] sm:$0xff] %vm3742_vm5, %v3665_v44  ;;  %v3087_v48 = vpop.permute.xlu0 %3086 }
 0x4b5   : > { %3173 = vst.msk [vmem:[#allocation5 + $0x50] sm:$0xff] %vm3162_vm2, %v3087_v48  ;;  %3299 = vrot.lane.b32.xlu1 %v3793_v32, %s4884_s13  ;;  %v4043_v32 = vld [vmem:[%s7351_s3 + $0x50] sm:$0xff] }
 0x4b6   : > { %3108 = vrot.lane.b32.xlu0 %v3601_v23, %s4883_s17  ;;  %v4044_v23 = vld [vmem:[%s7351_s3 + $0x58] sm:$0xff] }
 0x4b7   : > { %v3089_v19 = vpop.permute.xlu1 %3088  ;;  %v4745_v44 = vpack.c.bf16 %v4044_v23, %v4043_v32 }
 0x4b8   : > { %3174 = vst.msk [vmem:[#allocation5 + $0x58] sm:$0xff] %vm3162_vm2, %v3089_v19  ;;  %v3856_v18 = vpop.permute.xlu0 %3855 }
 0x4b9   : > { %3944 = vst.msk [vmem:[#allocation5 + $0x40] sm:$0xff] %vm3935_vm6, %v3856_v18  ;;  %3301 = vrot.lane.b32.xlu1 %v3216_v57, %s4884_s13  ;;  %v4045_v18 = vld [vmem:[%s7351_s3 + $0x60] sm:$0xff] }
 0x4ba   : > { %3977 = vst.msk [vmem:[#allocation5 + $0x40] sm:$0xff] %vm3968_vm7, %v7448_v46  ;;  %3877 = vrot.lane.b32.xlu0 %v3216_v57, %s4887_s26  ;;  %v4046_v57 = vld [vmem:[%s7351_s3 + $0x68] sm:$0xff] }
 0x4bb   : > { %v3858_v15 = vpop.permute.xlu1 %3857 }
 0x4bc   : > { %3945 = vst.msk [vmem:[#allocation5 + $0x48] sm:$0xff] %vm3935_vm6, %v3858_v15  ;;  %v3280_v53 = vpop.permute.xlu0 %3279 }
 0x4bd   : > { %3978 = vst.msk [vmem:[#allocation5 + $0x48] sm:$0xff] %vm3968_vm7, %v7448_v46  ;;  %2917 = vrot.lane.b32.xlu1 %v6459_v58, %s4881_s15 }
 0x4be   : > { %3366 = vst.msk [vmem:[#allocation5 + $0x50] sm:$0xff] %vm3355_vm3, %v3280_v53  ;;  %3493 = vrot.lane.b32.xlu0 %v6459_v58, %s4885_s23  ;;  %v4749_v53 = vpack.c.bf16 %v4046_v57, %v4045_v18  ;;  %v3611_v18 = vld [vmem:[#allocation4 + $0x210] sm:$0xff] }
 0x4bf   : > { %v3474_v52 = vpop.permute.xlu1 %3473 }
 0x4c0   : > { %3560 = vst.msk [vmem:[#allocation5 + $0x50] sm:$0xff] %vm3549_vm4, %v3474_v52  ;;  %v3282_v12 = vpop.permute.xlu0 %3281 }
 0x4c1   : > { %3367 = vst.msk [vmem:[#allocation5 + $0x58] sm:$0xff] %vm3355_vm3, %v3282_v12  ;;  %3686 = vrot.lane.b32.xlu1 %v3602_v29, %s4886_s25  ;;  %v3799_v12 = vld [vmem:[#allocation4 + $0x1c9] sm:$0xff] }
 0x4c2   : > { %3495 = vrot.lane.b32.xlu0 %v6453_v59, %s4885_s23 }
 0x4c3   : > { %v3667_v51 = vpop.permute.xlu1 %3666 }
 0x4c4   : > { %3753 = vst.msk [vmem:[#allocation5 + $0x50] sm:$0xff] %vm3742_vm5, %v3667_v51  ;;  %v3476_v4 = vpop.permute.xlu0 %3475  ;;  %v4047_v51 = vld [vmem:[%s7351_s3 + $0x70] sm:$0xff] }
 0x4c5   : > { %3561 = vst.msk [vmem:[#allocation5 + $0x58] sm:$0xff] %vm3549_vm4, %v3476_v4  ;;  %3110 = vrot.lane.b32.xlu1 %v3602_v29, %s4883_s17  ;;  %v3607_v29 = vld [vmem:[#allocation4 + $0x1d0] sm:$0xff]  ;;  %v4048_v4 = vld [vmem:[%s7351_s3 + $0x78] sm:$0xff] }
 0x4c6   : > { %2919 = vrot.lane.b32.xlu0 %v6453_v59, %s4881_s15 }
 0x4c7   : > { %v3669_v58 = vpop.permute.xlu1 %3668 }
 0x4c8   : > { %3754 = vst.msk [vmem:[#allocation5 + $0x58] sm:$0xff] %vm3742_vm5, %v3669_v58  ;;  %v3091_v38 = vpop.permute.xlu0 %3090  ;;  %v4753_v58 = vpack.c.bf16 %v4048_v4, %v4047_v51  ;;  %v3420_v51 = vld [vmem:[#allocation4 + $0x22f] sm:$0xff] }
 0x4c9   : > { %3175 = vst.msk [vmem:[#allocation5 + $0x60] sm:$0xff] %vm3162_vm2, %v3091_v38  ;;  %3879 = vrot.lane.b32.xlu1 %v3795_v28, %s4887_s26 }
 0x4ca   : > { %3688 = vrot.lane.b32.xlu0 %v3603_v30, %s4886_s25 }
 0x4cb   : > { %v3093_v6 = vpop.permute.xlu1 %3092 }
 0x4cc   : > { %3176 = vst.msk [vmem:[#allocation5 + $0x68] sm:$0xff] %vm3162_vm2, %v3093_v6  ;;  %v3860_v41 = vpop.permute.xlu0 %3859  ;;  %v4002_v6 = vld [vmem:[#allocation5 + $0x8] sm:$0xff] }
 0x4cd   : > { %3946 = vst.msk [vmem:[#allocation5 + $0x50] sm:$0xff] %vm3935_vm6, %v3860_v41  ;;  %3303 = vrot.lane.b32.xlu1 %v3795_v28, %s4884_s13 }
 0x4ce   : > { %3979 = vst.msk [vmem:[#allocation5 + $0x50] sm:$0xff] %vm3968_vm7, %v7448_v46  ;;  %3112 = vrot.lane.b32.xlu0 %v3603_v30, %s4883_s17  ;;  %v4001_v30 = vld [vmem:[#allocation5] sm:$0xff] }
 0x4cf   : > { %v3862_v59 = vpop.permute.xlu1 %3861  ;;  %4645 = vmatprep.mubr.f32.mxu1 %v4001_v30  ;;  %v3613_v30 = vld [vmem:[#allocation4 + $0x230] sm:$0xff] }
 0x4d0   : > { %3947 = vst.msk [vmem:[#allocation5 + $0x58] sm:$0xff] %vm3935_vm6, %v3862_v59  ;;  %v3284_v9 = vpop.permute.xlu0 %3283 }
 0x4d1   : > { %3980 = vst.msk [vmem:[#allocation5 + $0x58] sm:$0xff] %vm3968_vm7, %v7448_v46  ;;  %3305 = vrot.lane.b32.xlu1 %v3218_v34, %s4884_s13 }
 0x4d2   : > { %3368 = vst.msk [vmem:[#allocation5 + $0x60] sm:$0xff] %vm3355_vm3, %v3284_v9  ;;  %3881 = vrot.lane.b32.xlu0 %v3218_v34, %s4887_s26  ;;  %v3222_v9 = vld [vmem:[#allocation4 + $0x1d1] sm:$0xff] }
 0x4d3   : > { %v3478_v45 = vpop.permute.xlu1 %3477  ;;  %v4003_v34 = vld [vmem:[#allocation5 + $0x10] sm:$0xff] }
 0x4d4   : > { %3562 = vst.msk [vmem:[#allocation5 + $0x60] sm:$0xff] %vm3549_vm4, %v3478_v45  ;;  %v3286_v36 = vpop.permute.xlu0 %3285  ;;  %v4004_v45 = vld [vmem:[#allocation5 + $0x18] sm:$0xff] }
 0x4d5   : > { %3369 = vst.msk [vmem:[#allocation5 + $0x68] sm:$0xff] %vm3355_vm3, %v3286_v36  ;;  %2921 = vrot.lane.b32.xlu1 %v6470_v13, %s4881_s15  ;;  %v4033_v13 = vld [vmem:[%s7351_s3] sm:$0xff] }
 0x4d6   : > { %3497 = vrot.lane.b32.xlu0 %v3411_v20, %s4885_s23  ;;  %v4725_v31 = vpack.c.bf16 %v4034_v1, %v4033_v13  ;;  %v3416_v13 = vld [vmem:[#allocation4 + $0x1ef] sm:$0xff] }
 0x4d7   : > { %v3671_v25 = vpop.permute.xlu1 %3670  ;;  %v4007_v1 = vld [vmem:[#allocation5 + $0x30] sm:$0xff] }
 0x4d8   : > { %3755 = vst.msk [vmem:[#allocation5 + $0x60] sm:$0xff] %vm3742_vm5, %v3671_v25  ;;  %v3480_v7 = vpop.permute.xlu0 %3479  ;;  %4726 = vmatprep.subr.bf16.mxu1 %v4725_v31  ;;  %v2837_v25 = vld [vmem:[#allocation4 + $0x1e7] sm:$0xff]  ;;  %v4012_v17 = vld [vmem:[#allocation5 + $0x58] sm:$0xff] }
 0x4d9   : > { %3563 = vst.msk [vmem:[#allocation5 + $0x68] sm:$0xff] %vm3549_vm4, %v3480_v7  ;;  %3690 = vrot.lane.b32.xlu1 %v3604_v5, %s4886_s25  ;;  %4728 = vmatpush3.bf16.msra.mxu1 %v4725_v31  ;;  %v4005_v7 = vld [vmem:[#allocation5 + $0x20] sm:$0xff] }
 0x4da   : > { %3499 = vrot.lane.b32.xlu0 %v3412_v16, %s4885_s23  ;;  %4730 = vmatprep.subr.bf16.mxu1 %v4729_v43 }
 0x4db   : > { %v3673_v37 = vpop.permute.xlu1 %3672 }
 0x4dc   : > { %3756 = vst.msk [vmem:[#allocation5 + $0x68] sm:$0xff] %vm3742_vm5, %v3673_v37  ;;  %v3095_v27 = vpop.permute.xlu0 %3094 }
 0x4dd   : > { %3177 = vst.msk [vmem:[#allocation5 + $0x70] sm:$0xff] %vm3162_vm2, %v3095_v27  ;;  %3114 = vrot.lane.b32.xlu1 %v3604_v5, %s4883_s17  ;;  %4732 = vmatpush3.bf16.msra.mxu1 %v4729_v43  ;;  %v4006_v5 = vld [vmem:[#allocation5 + $0x28] sm:$0xff] }
 0x4de   : > { %2923 = vrot.lane.b32.xlu0 %v3412_v16, %s4881_s15  ;;  %4734 = vmatprep.subr.bf16.mxu1 %v4733_v21  ;;  %v3608_v27 = vld [vmem:[#allocation4 + $0x1e8] sm:$0xff] }
 0x4df   : > { %v3097_v3 = vpop.permute.xlu1 %3096  ;;  %v3801_v43 = vld [vmem:[#allocation4 + $0x1e9] sm:$0xff] }
 0x4e0   : > { %3178 = vst.msk [vmem:[#allocation5 + $0x78] sm:$0xff] %vm3162_vm2, %v3097_v3  ;;  %v3864_v55 = vpop.permute.xlu0 %3863  ;;  %v4008_v3 = vld [vmem:[#allocation5 + $0x38] sm:$0xff] }
 0x4e1   : > { %3948 = vst.msk [vmem:[#allocation5 + $0x60] sm:$0xff] %vm3935_vm6, %v3864_v55  ;;  %3883 = vrot.lane.b32.xlu1 %v3797_v40, %s4887_s26  ;;  %4736 = vmatpush3.bf16.msra.mxu1 %v4733_v21 }
 0x4e2   : > { %3981 = vst.msk [vmem:[#allocation5 + $0x60] sm:$0xff] %vm3968_vm7, %v7448_v46  ;;  %3692 = vrot.lane.b32.xlu0 %v3605_v0, %s4886_s25  ;;  %4738 = vmatprep.subr.bf16.mxu1 %v4737_v8 }
 0x4e3   : > { %v3866_v54 = vpop.permute.xlu1 %3865 }
 0x4e4   : > { %3949 = vst.msk [vmem:[#allocation5 + $0x68] sm:$0xff] %vm3935_vm6, %v3866_v54  ;;  %v3288_v42 = vpop.permute.xlu0 %3287  ;;  %v3609_v54 = vld [vmem:[#allocation4 + $0x1f0] sm:$0xff] }
 0x4e5   : > { %3982 = vst.msk [vmem:[#allocation5 + $0x68] sm:$0xff] %vm3968_vm7, %v7448_v46  ;;  %3307 = vrot.lane.b32.xlu1 %v3797_v40, %s4884_s13  ;;  %4740 = vmatpush3.bf16.msra.mxu1 %v4737_v8  ;;  %v4009_v40 = vld [vmem:[#allocation5 + $0x40] sm:$0xff] }
 0x4e6   : > { %3370 = vst.msk [vmem:[#allocation5 + $0x70] sm:$0xff] %vm3355_vm3, %v3288_v42  ;;  %3116 = vrot.lane.b32.xlu0 %v3605_v0, %s4883_s17  ;;  %4742 = vmatprep.subr.bf16.mxu1 %v4741_v49  ;;  %v4010_v0 = vld [vmem:[#allocation5 + $0x48] sm:$0xff]  ;;  %v4011_v42 = vld [vmem:[#allocation5 + $0x50] sm:$0xff] }
 0x4e7   : > { %v3482_v61 = vpop.permute.xlu1 %3481 }
 0x4e8   : > { %3564 = vst.msk [vmem:[#allocation5 + $0x70] sm:$0xff] %vm3549_vm4, %v3482_v61  ;;  %v3290_v63 = vpop.permute.xlu0 %3289 }
 0x4e9   : > { %3371 = vst.msk [vmem:[#allocation5 + $0x78] sm:$0xff] %vm3355_vm3, %v3290_v63  ;;  %3309 = vrot.lane.b32.xlu1 %v3220_v56, %s4884_s13  ;;  %4744 = vmatpush3.bf16.msra.mxu1 %v4741_v49  ;;  %v4013_v61 = vld [vmem:[#allocation5 + $0x60] sm:$0xff] }
 0x4ea   : > { %3885 = vrot.lane.b32.xlu0 %v3220_v56, %s4887_s26  ;;  %4746 = vmatprep.subr.bf16.mxu1 %v4745_v44 }
 0x4eb   : > { %v3675_v2 = vpop.permute.xlu1 %3674 }
 0x4ec   : > { %3757 = vst.msk [vmem:[#allocation5 + $0x70] sm:$0xff] %vm3742_vm5, %v3675_v2  ;;  %v3484_v50 = vpop.permute.xlu0 %3483  ;;  %v4014_v63 = vld [vmem:[#allocation5 + $0x68] sm:$0xff] }
 0x4ed   : > { %3565 = vst.msk [vmem:[#allocation5 + $0x78] sm:$0xff] %vm3549_vm4, %v3484_v50  ;;  %2925 = vrot.lane.b32.xlu1 %v2835_v26, %s4881_s15  ;;  %4748 = vmatpush3.bf16.msra.mxu1 %v4745_v44  ;;  %v2839_v2 = vld [vmem:[#allocation4 + $0x207] sm:$0xff] }
 0x4ee   : > { %3501 = vrot.lane.b32.xlu0 %v2835_v26, %s4885_s23  ;;  %4750 = vmatprep.subr.bf16.mxu1 %v4749_v53 }
 0x4ef   : > { %v3099_v22 = vpop.permute.xlu1 %3098 }
 0x4f0   : > { %3179 = vst.msk [vmem:[#allocation5 + $0x80] sm:$0xff] %vm3162_vm2, %v3099_v22  ;;  %v2908_v62 = vpop.permute.xlu0 %2907 }
 0x4f1   : > { %2987 = vst.msk [vmem:[#allocation5 + $0x88] sm:$0xff] %vm2969_vm1, %v2908_v62  ;;  %3694 = vrot.lane.b32.xlu1 %v3606_v33, %s4886_s25  ;;  %4752 = vmatpush3.bf16.msra.mxu1 %v4749_v53 }
 0x4f2   : > { %3503 = vrot.lane.b32.xlu0 %v3414_v35, %s4885_s23  ;;  %4754 = vmatprep.subr.bf16.mxu1 %v4753_v58 }
 0x4f3   : > { %v3868_v48 = vpop.permute.xlu1 %3867 }
 0x4f4   : > { %3950 = vst.msk [vmem:[#allocation5 + $0x70] sm:$0xff] %vm3935_vm6, %v3868_v48  ;;  %v3677_v19 = vpop.permute.xlu0 %3676 }
 0x4f5   : > { %3983 = vst.msk [vmem:[#allocation5 + $0x70] sm:$0xff] %vm3968_vm7, %v7448_v46  ;;  %3118 = vrot.lane.b32.xlu1 %v3606_v33, %s4883_s17  ;;  %4756 = vmatpush3.bf16.msra.mxu1 %v4753_v58  ;;  %v3610_v33 = vld [vmem:[#allocation4 + $0x208] sm:$0xff] }
 0x4f6   : > { %3758 = vst.msk [vmem:[#allocation5 + $0x78] sm:$0xff] %vm3742_vm5, %v3677_v19  ;;  %2927 = vrot.lane.b32.xlu0 %v3414_v35, %s4881_s15  ;;  %v3418_v35 = vld [vmem:[#allocation4 + $0x20f] sm:$0xff]  ;;  %v3419_v58 = vld [vmem:[#allocation4 + $0x227] sm:$0xff] }
 0x4f7   : > { %v3292_v15 = vpop.permute.xlu1 %3291  ;;  %v3803_v19 = vld [vmem:[#allocation4 + $0x209] sm:$0xff] }
 0x4f8   : > { %3372 = vst.msk [vmem:[#allocation5 + $0x80] sm:$0xff] %vm3355_vm3, %v3292_v15  ;;  %v3101_v52 = vpop.permute.xlu0 %3100  ;;  %4646 = vmatmul.mubr.f32.vlgmr.msra.gmra.mrb[0].mxu1 %v4002_v6 }
 0x4f9   : > { %3180 = vst.msk [vmem:[#allocation5 + $0x88] sm:$0xff] %vm3162_vm2, %v3101_v52  ;;  %3887 = vrot.lane.b32.xlu1 %v3799_v12, %s4887_s26  ;;  %4648 = vmatprep.mubr.f32.mxu1 %v4003_v34 }
 0x4fa   : > { %3696 = vrot.lane.b32.xlu0 %v3607_v29, %s4886_s25 }
 0x4fb   : > { %v3294_v38 = vpop.permute.xlu1 %3293 }
 0x4fc   : > { %3373 = vst.msk [vmem:[#allocation5 + $0x88] sm:$0xff] %vm3355_vm3, %v3294_v38  ;;  %v3870_v28 = vpop.permute.xlu0 %3869  ;;  %4649 = vmatmul.mubr.f32.gmra.mrb[2].mxu1 %v4004_v45  ;;  %v4015_v8 = vld [vmem:[#allocation5 + $0x70] sm:$0xff] }
 0x4fd   : > { %3951 = vst.msk [vmem:[#allocation5 + $0x78] sm:$0xff] %vm3935_vm6, %v3870_v28  ;;  %3311 = vrot.lane.b32.xlu1 %v3799_v12, %s4884_s13  ;;  %4651 = vmatprep.mubr.f32.mxu1 %v4005_v7  ;;  %v3805_v45 = vld [vmem:[#allocation4 + $0x229] sm:$0xff] }
 0x4fe   : > { %3984 = vst.msk [vmem:[#allocation5 + $0x78] sm:$0xff] %vm3968_vm7, %v7448_v46  ;;  %3120 = vrot.lane.b32.xlu0 %v3607_v29, %s4883_s17  ;;  %v3226_v29 = vld [vmem:[#allocation4 + $0x211] sm:$0xff] }
 0x4ff   : > { %v2910_v41 = vpop.permute.xlu1 %2909 }
 0x500   : > { %2988 = vst.msk [vmem:[#allocation5 + $0x90] sm:$0xff] %vm2969_vm1, %v2910_v41  ;;  %v3486_v59 = vpop.permute.xlu0 %3485  ;;  %4652 = vmatmul.mubr.f32.gmra.mrb[4].mxu1 %v4006_v5  ;;  %v3612_v41 = vld [vmem:[#allocation4 + $0x228] sm:$0xff] }
 0x501   : > { %3566 = vst.msk [vmem:[#allocation5 + $0x80] sm:$0xff] %vm3549_vm4, %v3486_v59  ;;  %3313 = vrot.lane.b32.xlu1 %v3222_v9, %s4884_s13  ;;  %4654 = vmatprep.mubr.f32.mxu1 %v4007_v1 }
 0x502   : > { %3889 = vrot.lane.b32.xlu0 %v3222_v9, %s4887_s26  ;;  %v3806_v9 = vld [vmem:[#allocation4 + $0x231] sm:$0xff] }
 0x503   : > { %v3679_v36 = vpop.permute.xlu1 %3678 }
 0x504   : > { %3759 = vst.msk [vmem:[#allocation5 + $0x80] sm:$0xff] %vm3742_vm5, %v3679_v36  ;;  %v3488_v20 = vpop.permute.xlu0 %3487  ;;  %4655 = vmatmul.mubr.f32.gmra.mrb[6].mxu1 %v4008_v3 }
 0x505   : > { %3567 = vst.msk [vmem:[#allocation5 + $0x88] sm:$0xff] %vm3549_vm4, %v3488_v20  ;;  %2929 = vrot.lane.b32.xlu1 %v2837_v25, %s4881_s15  ;;  %4657 = vmatprep.mubr.f32.mxu1 %v4009_v40  ;;  %v4016_v50 = vld [vmem:[#allocation5 + $0x78] sm:$0xff] }
 0x506   : > { %3505 = vrot.lane.b32.xlu0 %v2837_v25, %s4885_s23 }
 0x507   : > { %v3103_v16 = vpop.permute.xlu1 %3102 }
 0x508   : > { %3181 = vst.msk [vmem:[#allocation5 + $0x90] sm:$0xff] %vm3162_vm2, %v3103_v16  ;;  %v2912_v37 = vpop.permute.xlu0 %2911  ;;  %4658 = vmatmul.mubr.f32.gmra.mrb[8].mxu1 %v4010_v0 }
 0x509   : > { %2989 = vst.msk [vmem:[#allocation5 + $0x98] sm:$0xff] %vm2969_vm1, %v2912_v37  ;;  %3698 = vrot.lane.b32.xlu1 %v3608_v27, %s4886_s25  ;;  %4660 = vmatprep.mubr.f32.mxu1 %v4011_v42 }
 0x50a   : > { %3507 = vrot.lane.b32.xlu0 %v3416_v13, %s4885_s23 }
 0x50b   : > { %v3872_v31 = vpop.permute.xlu1 %3871 }
 0x50c   : > { %3952 = vst.msk [vmem:[#allocation5 + $0x80] sm:$0xff] %vm3935_vm6, %v3872_v31  ;;  %v3681_v55 = vpop.permute.xlu0 %3680  ;;  %4661 = vmatmul.mubr.f32.gmra.mrb[10].mxu1 %v4012_v17 }
 0x50d   : > { %3985 = vst.msk [vmem:[#allocation5 + $0x80] sm:$0xff] %vm3968_vm7, %v7448_v46  ;;  %3122 = vrot.lane.b32.xlu1 %v3608_v27, %s4883_s17  ;;  %4663 = vmatprep.mubr.f32.mxu1 %v4013_v61 }
 0x50e   : > { %3760 = vst.msk [vmem:[#allocation5 + $0x88] sm:$0xff] %vm3742_vm5, %v3681_v55  ;;  %2931 = vrot.lane.b32.xlu0 %v3416_v13, %s4881_s15 }
 0x50f   : > { %v3296_v14 = vpop.permute.xlu1 %3295 }
 0x510   : > { %3374 = vst.msk [vmem:[#allocation5 + $0x90] sm:$0xff] %vm3355_vm3, %v3296_v14  ;;  %v3105_v39 = vpop.permute.xlu0 %3104  ;;  %4664 = vmatmul.mubr.f32.gmra.mrb[12].mxu1 %v4014_v63 }
 0x511   : > { %3182 = vst.msk [vmem:[#allocation5 + $0x98] sm:$0xff] %vm3162_vm2, %v3105_v39  ;;  %3891 = vrot.lane.b32.xlu1 %v3801_v43, %s4887_s26  ;;  %4666 = vmatprep.mubr.f32.mxu1 %v4015_v8 }
 0x512   : > { %3700 = vrot.lane.b32.xlu0 %v3609_v54, %s4886_s25 }
 0x513   : > { %v3298_v11 = vpop.permute.xlu1 %3297 }
 0x514   : > { %3375 = vst.msk [vmem:[#allocation5 + $0x98] sm:$0xff] %vm3355_vm3, %v3298_v11  ;;  %v3874_v21 = vpop.permute.xlu0 %3873  ;;  %4667 = vmatmul.mubr.f32.gmra.mrb[14].mxu1 %v4016_v50  ;;  %v4017_v47 = vld [vmem:[#allocation5 + $0x80] sm:$0xff] }
 0x515   : > { %3953 = vst.msk [vmem:[#allocation5 + $0x88] sm:$0xff] %vm3935_vm6, %v3874_v21  ;;  %3315 = vrot.lane.b32.xlu1 %v3801_v43, %s4884_s13  ;;  %4669 = vmatprep.mubr.f32.mxu1 %v4017_v47 }
 0x516   : > { %3986 = vst.msk [vmem:[#allocation5 + $0x88] sm:$0xff] %vm3968_vm7, %v7448_v46  ;;  %3124 = vrot.lane.b32.xlu0 %v3609_v54, %s4883_s17 }
 0x517   : > { %v2914_v56 = vpop.permute.xlu1 %2913 }
 0x518   : > { %2990 = vst.msk [vmem:[#allocation5 + $0xa0] sm:$0xff] %vm2969_vm1, %v2914_v56  ;;  %v3490_v60 = vpop.permute.xlu0 %3489 }
 0x519   : > { %3568 = vst.msk [vmem:[#allocation5 + $0x90] sm:$0xff] %vm3549_vm4, %v3490_v60  ;;  %3317 = vrot.lane.b32.xlu1 %v3224_v24, %s4884_s13 }
 0x51a   : > { %3893 = vrot.lane.b32.xlu0 %v3224_v24, %s4887_s26 }
 0x51b   : > { %v3683_v26 = vpop.permute.xlu1 %3682 }
 0x51c   : > { %3761 = vst.msk [vmem:[#allocation5 + $0x90] sm:$0xff] %vm3742_vm5, %v3683_v26  ;;  %v3492_v10 = vpop.permute.xlu0 %3491 }
 0x51d   : > { %3569 = vst.msk [vmem:[#allocation5 + $0x98] sm:$0xff] %vm3549_vm4, %v3492_v10  ;;  %2933 = vrot.lane.b32.xlu1 %v2839_v2, %s4881_s15  ;;  %v4018_v49 = vld [vmem:[#allocation5 + $0x88] sm:$0xff] }
 0x51e   : > { %3509 = vrot.lane.b32.xlu0 %v2839_v2, %s4885_s23  ;;  %4670 = vmatmul.mubr.f32.gmra.mrb[16].mxu1 %v4018_v49 }
 0x51f   : > { %v3107_v22 = vpop.permute.xlu1 %3106 }
 0x520   : > { %3183 = vst.msk [vmem:[#allocation5 + $0xa0] sm:$0xff] %vm3162_vm2, %v3107_v22  ;;  %v2916_v62 = vpop.permute.xlu0 %2915 }
 0x521   : > { %2991 = vst.msk [vmem:[#allocation5 + $0xa8] sm:$0xff] %vm2969_vm1, %v2916_v62  ;;  %3702 = vrot.lane.b32.xlu1 %v3610_v33, %s4886_s25 }
 0x522   : > { %3511 = vrot.lane.b32.xlu0 %v3418_v35, %s4885_s23 }
 0x523   : > { %v3876_v32 = vpop.permute.xlu1 %3875 }
 0x524   : > { %3954 = vst.msk [vmem:[#allocation5 + $0x90] sm:$0xff] %vm3935_vm6, %v3876_v32  ;;  %v3685_v23 = vpop.permute.xlu0 %3684 }
 0x525   : > { %3987 = vst.msk [vmem:[#allocation5 + $0x90] sm:$0xff] %vm3968_vm7, %v7448_v46  ;;  %3126 = vrot.lane.b32.xlu1 %v3610_v33, %s4883_s17 }
 0x526   : > { %3762 = vst.msk [vmem:[#allocation5 + $0x98] sm:$0xff] %vm3742_vm5, %v3685_v23  ;;  %2935 = vrot.lane.b32.xlu0 %v3418_v35, %s4881_s15  ;;  %s215_s15 = sand.u32 1, %s4865_s19  }
 0x527   : > { %v3300_v44 = vpop.permute.xlu1 %3299 }
 0x528   : > { %3376 = vst.msk [vmem:[#allocation5 + $0xa0] sm:$0xff] %vm3355_vm3, %v3300_v44  ;;  %v3109_v48 = vpop.permute.xlu0 %3108 }
 0x529   : > { %3184 = vst.msk [vmem:[#allocation5 + $0xa8] sm:$0xff] %vm3162_vm2, %v3109_v48  ;;  %3895 = vrot.lane.b32.xlu1 %v3803_v19, %s4887_s26 }
 0x52a   : > { %3704 = vrot.lane.b32.xlu0 %v3611_v18, %s4886_s25 }
 0x52b   : > { %v3302_v57 = vpop.permute.xlu1 %3301 }
 0x52c   : > { %3377 = vst.msk [vmem:[#allocation5 + $0xa8] sm:$0xff] %vm3355_vm3, %v3302_v57  ;;  %v3878_v15 = vpop.permute.xlu0 %3877  ;;  %v4019_v53 = vld [vmem:[#allocation5 + $0x90] sm:$0xff] }
 0x52d   : > { %3955 = vst.msk [vmem:[#allocation5 + $0x98] sm:$0xff] %vm3935_vm6, %v3878_v15  ;;  %3319 = vrot.lane.b32.xlu1 %v3803_v19, %s4884_s13  ;;  %4672 = vmatprep.mubr.f32.mxu1 %v4019_v53 }
 0x52e   : > { %3988 = vst.msk [vmem:[#allocation5 + $0x98] sm:$0xff] %vm3968_vm7, %v7448_v46  ;;  %3128 = vrot.lane.b32.xlu0 %v3611_v18, %s4883_s17 }
 0x52f   : > { %v2918_v52 = vpop.permute.xlu1 %2917 }
 0x530   : > { %2992 = vst.msk [vmem:[#allocation5 + $0xb0] sm:$0xff] %vm2969_vm1, %v2918_v52  ;;  %v3494_v12 = vpop.permute.xlu0 %3493 }
 0x531   : > { %3570 = vst.msk [vmem:[#allocation5 + $0xa0] sm:$0xff] %vm3549_vm4, %v3494_v12  ;;  %3321 = vrot.lane.b32.xlu1 %v3226_v29, %s4884_s13 }
 0x532   : > { %3897 = vrot.lane.b32.xlu0 %v3226_v29, %s4887_s26 }
 0x533   : > { %v3687_v4 = vpop.permute.xlu1 %3686 }
 0x534   : > { %3763 = vst.msk [vmem:[#allocation5 + $0xa0] sm:$0xff] %vm3742_vm5, %v3687_v4  ;;  %v3496_v38 = vpop.permute.xlu0 %3495 }
 0x535   : > { %3571 = vst.msk [vmem:[#allocation5 + $0xa8] sm:$0xff] %vm3549_vm4, %v3496_v38  ;;  %3515 = vrot.lane.b32.xlu1 %v3420_v51, %s4885_s23  ;;  %v4020_v28 = vld [vmem:[#allocation5 + $0x98] sm:$0xff] }
 0x536   : > { %3513 = vrot.lane.b32.xlu0 %v3419_v58, %s4885_s23  ;;  %4673 = vmatmul.mubr.f32.gmra.mrb[18].mxu1 %v4020_v28  ;;  %s4425_s23 = sshll.u32 %s215_s15, 8 }
 0x537   : > { %v3111_v6 = vpop.permute.xlu1 %3110 }
 0x538   : > { %3185 = vst.msk [vmem:[#allocation5 + $0xb0] sm:$0xff] %vm3162_vm2, %v3111_v6  ;;  %v2920_v59 = vpop.permute.xlu0 %2919 }
 0x539   : > { %2993 = vst.msk [vmem:[#allocation5 + $0xb8] sm:$0xff] %vm2969_vm1, %v2920_v59  ;;  %3708 = vrot.lane.b32.xlu1 %v3613_v30, %s4886_s25 }
 0x53a   : > { %3706 = vrot.lane.b32.xlu0 %v3612_v41, %s4886_s25  ;;  %s7231_s25 = scalar_lea.vmem [#allocation6], %s4425_s23 }
 0x53b   : > { %v3880_v34 = vpop.permute.xlu1 %3879  ;;  %s4359_s16 = sshll.u32 %s7231_s25, 4  ;;  %s7300_s16 = int_to_ptr.vmem [resolvable:$true] %s4359_s16 }
 0x53c   : > { %3956 = vst.msk [vmem:[#allocation5 + $0xa0] sm:$0xff] %vm3935_vm6, %v3880_v34  ;;  %v3689_v36 = vpop.permute.xlu0 %3688  ;;  %s4811_s7 = scalar_lea.vmem %s7300_s16, 4096  ;;  %p4818_p0 = scmp.lt.s32.totalorder %s7300_s16, %s4816_s9 }
 0x53d   : > { %3989 = vst.msk [vmem:[#allocation5 + $0xa0] sm:$0xff] %vm3968_vm7, %v7448_v46  ;;  %3901 = vrot.lane.b32.xlu1 %v3806_v9, %s4887_s26  ;;  %p4812_p11 = scmp.ne.s32.totalorder %s7300_s16, %s4811_s7  ;;  %p4819_p1 = scmp.lt.s32.totalorder %s4817_s10, %s4811_s7 }
 0x53e   : > { %3764 = vst.msk [vmem:[#allocation5 + $0xa8] sm:$0xff] %vm3742_vm5, %v3689_v36  ;;  %3899 = vrot.lane.b32.xlu0 %v3805_v45, %s4887_s26  ;;  %s4436_s26 = sshll.u32 %s4941_s22, 12  ;;  %s7306_s22 = scalar_lea.sflag [#allocation7], %s215_s15 }
 0x53f   : > { %v3304_v20 = vpop.permute.xlu1 %3303  ;;  %s7298_s6 = scalar_lea.hbm %s7353_s5, %s4436_s26  ;;  %p4813_p12 = pnand %p4812_p11, %p4958_p5 }
 0x540   : > { %3378 = vst.msk [vmem:[#allocation5 + $0xb0] sm:$0xff] %vm3355_vm3, %v3304_v20  ;;  %v3113_v25 = vpop.permute.xlu0 %3112  ;;  %p4820_p2 = por %p4819_p1, %p4818_p0 }
 0x541   : > { %3186 = vst.msk [vmem:[#allocation5 + $0xb8] sm:$0xff] %vm3162_vm2, %v3113_v25  ;;  %p4814_p13 = pneg %p4813_p12 }
 0x543   : > { %v3306_v7 = vpop.permute.xlu1 %3305  ;;  %p4821_p3 = pnand %p4820_p2, %p4814_p13 }
 0x544   : > { %3379 = vst.msk [vmem:[#allocation5 + $0xb8] sm:$0xff] %vm3355_vm3, %v3306_v7  ;;  %v3882_v5 = vpop.permute.xlu0 %3881  ;;  %v4021_v16 = vld [vmem:[#allocation5 + $0xa0] sm:$0xff] }
 0x545   : > { %3957 = vst.msk [vmem:[#allocation5 + $0xa8] sm:$0xff] %vm3935_vm6, %v3882_v5  ;;  %4675 = vmatprep.mubr.f32.mxu1 %v4021_v16 }
 0x546   : > { %3990 = vst.msk [vmem:[#allocation5 + $0xa8] sm:$0xff] %vm3968_vm7, %v7448_v46 }
 0x547   : > { %v2922_v37 = vpop.permute.xlu1 %2921 }
 0x548   : > { %2994 = vst.msk [vmem:[#allocation5 + $0xc0] sm:$0xff] %vm2969_vm1, %v2922_v37  ;;  %v3498_v27 = vpop.permute.xlu0 %3497 }
 0x549   : > { %3572 = vst.msk [vmem:[#allocation5 + $0xb0] sm:$0xff] %vm3549_vm4, %v3498_v27 }
 0x54b   : > { %v3691_v13 = vpop.permute.xlu1 %3690 }
 0x54c   : > { %3765 = vst.msk [vmem:[#allocation5 + $0xb0] sm:$0xff] %vm3742_vm5, %v3691_v13  ;;  %v3500_v1 = vpop.permute.xlu0 %3499  ;;  %v7225_v13 = vld [vmem:[%s7352_s4] ss:$0 sm:$0xff] }
 0x54d   : > { %3573 = vst.msk [vmem:[#allocation5 + $0xb8] sm:$0xff] %vm3549_vm4, %v3500_v1  ;;  %v4022_v3 = vld [vmem:[#allocation5 + $0xa8] sm:$0xff] }
 0x54e   : > { %4676 = vmatmul.mubr.f32.gmra.mrb[20].mxu1 %v4022_v3 }
 0x54f   : > { %v3115_v31 = vpop.permute.xlu1 %3114 }
 0x550   : > { %3187 = vst.msk [vmem:[#allocation5 + $0xc0] sm:$0xff] %vm3162_vm2, %v3115_v31  ;;  %v2924_v55 = vpop.permute.xlu0 %2923 }
 0x551   : > { %2995 = vst.msk [vmem:[#allocation5 + $0xc8] sm:$0xff] %vm2969_vm1, %v2924_v55 }
 0x553   : > { %v3884_v40 = vpop.permute.xlu1 %3883 }
 0x554   : > { %3958 = vst.msk [vmem:[#allocation5 + $0xb0] sm:$0xff] %vm3935_vm6, %v3884_v40  ;;  %v3693_v0 = vpop.permute.xlu0 %3692 }
 0x555   : > { %3991 = vst.msk [vmem:[#allocation5 + $0xb0] sm:$0xff] %vm3968_vm7, %v7448_v46 }
 0x556   : > { %3766 = vst.msk [vmem:[#allocation5 + $0xb8] sm:$0xff] %vm3742_vm5, %v3693_v0 }
 0x557   : > { %v3308_v14 = vpop.permute.xlu1 %3307 }
 0x558   : > { %3380 = vst.msk [vmem:[#allocation5 + $0xc0] sm:$0xff] %vm3355_vm3, %v3308_v14  ;;  %v3117_v39 = vpop.permute.xlu0 %3116 }
 0x559   : > { %3188 = vst.msk [vmem:[#allocation5 + $0xc8] sm:$0xff] %vm3162_vm2, %v3117_v39 }
 0x55b   : > { %v3310_v43 = vpop.permute.xlu1 %3309 }
 0x55c   : > { %3381 = vst.msk [vmem:[#allocation5 + $0xc8] sm:$0xff] %vm3355_vm3, %v3310_v43  ;;  %v3886_v54 = vpop.permute.xlu0 %3885  ;;  %v4023_v42 = vld [vmem:[#allocation5 + $0xb0] sm:$0xff] }
 0x55d   : > { %3959 = vst.msk [vmem:[#allocation5 + $0xb8] sm:$0xff] %vm3935_vm6, %v3886_v54  ;;  %4678 = vmatprep.mubr.f32.mxu1 %v4023_v42 }
 0x55e   : > { %3992 = vst.msk [vmem:[#allocation5 + $0xb8] sm:$0xff] %vm3968_vm7, %v7448_v46 }
 0x55f   : > { %v2926_v17 = vpop.permute.xlu1 %2925 }
 0x560   : > { %2996 = vst.msk [vmem:[#allocation5 + $0xd0] sm:$0xff] %vm2969_vm1, %v2926_v17  ;;  %v3502_v11 = vpop.permute.xlu0 %3501 }
 0x561   : > { %3574 = vst.msk [vmem:[#allocation5 + $0xc0] sm:$0xff] %vm3549_vm4, %v3502_v11 }
 0x563   : > { %v3695_v21 = vpop.permute.xlu1 %3694 }
 0x564   : > { %3767 = vst.msk [vmem:[#allocation5 + $0xc0] sm:$0xff] %vm3742_vm5, %v3695_v21  ;;  %v3504_v61 = vpop.permute.xlu0 %3503 }
 0x565   : > { %3575 = vst.msk [vmem:[#allocation5 + $0xc8] sm:$0xff] %vm3549_vm4, %v3504_v61  ;;  %v4024_v63 = vld [vmem:[#allocation5 + $0xb8] sm:$0xff] }
 0x566   : > { %4679 = vmatmul.mubr.f32.gmra.mrb[22].mxu1 %v4024_v63 }
 0x567   : > { %v3119_v56 = vpop.permute.xlu1 %3118 }
 0x568   : > { %3189 = vst.msk [vmem:[#allocation5 + $0xd0] sm:$0xff] %vm3162_vm2, %v3119_v56  ;;  %v2928_v60 = vpop.permute.xlu0 %2927 }
 0x569   : > { %2997 = vst.msk [vmem:[#allocation5 + $0xd8] sm:$0xff] %vm2969_vm1, %v2928_v60 }
 0x56b   : > { %v3888_v24 = vpop.permute.xlu1 %3887 }
 0x56c   : > { %3960 = vst.msk [vmem:[#allocation5 + $0xc0] sm:$0xff] %vm3935_vm6, %v3888_v24  ;;  %v3697_v8 = vpop.permute.xlu0 %3696 }
 0x56d   : > { %3993 = vst.msk [vmem:[#allocation5 + $0xc0] sm:$0xff] %vm3968_vm7, %v7448_v46 }
 0x56e   : > { %3768 = vst.msk [vmem:[#allocation5 + $0xc8] sm:$0xff] %vm3742_vm5, %v3697_v8 }
 0x56f   : > { %v3312_v2 = vpop.permute.xlu1 %3311 }
 0x570   : > { %3382 = vst.msk [vmem:[#allocation5 + $0xd0] sm:$0xff] %vm3355_vm3, %v3312_v2  ;;  %v3121_v50 = vpop.permute.xlu0 %3120 }
 0x571   : > { %3190 = vst.msk [vmem:[#allocation5 + $0xd8] sm:$0xff] %vm3162_vm2, %v3121_v50 }
 0x573   : > { %v3314_v26 = vpop.permute.xlu1 %3313 }
 0x574   : > { %3383 = vst.msk [vmem:[#allocation5 + $0xd8] sm:$0xff] %vm3355_vm3, %v3314_v26  ;;  %v3890_v10 = vpop.permute.xlu0 %3889  ;;  %v4025_v47 = vld [vmem:[#allocation5 + $0xc0] sm:$0xff] }
 0x575   : > { %3961 = vst.msk [vmem:[#allocation5 + $0xc8] sm:$0xff] %vm3935_vm6, %v3890_v10  ;;  %4681 = vmatprep.mubr.f32.mxu1 %v4025_v47 }
 0x576   : > { %3994 = vst.msk [vmem:[#allocation5 + $0xc8] sm:$0xff] %vm3968_vm7, %v7448_v46 }
 0x577   : > { %v2930_v49 = vpop.permute.xlu1 %2929 }
 0x578   : > { %2998 = vst.msk [vmem:[#allocation5 + $0xe0] sm:$0xff] %vm2969_vm1, %v2930_v49  ;;  %v3506_v22 = vpop.permute.xlu0 %3505 }
 0x579   : > { %3576 = vst.msk [vmem:[#allocation5 + $0xd0] sm:$0xff] %vm3549_vm4, %v3506_v22 }
 0x57b   : > { %v3699_v62 = vpop.permute.xlu1 %3698 }
 0x57c   : > { %3769 = vst.msk [vmem:[#allocation5 + $0xd0] sm:$0xff] %vm3742_vm5, %v3699_v62  ;;  %v3508_v33 = vpop.permute.xlu0 %3507 }
 0x57d   : > { %3577 = vst.msk [vmem:[#allocation5 + $0xd8] sm:$0xff] %vm3549_vm4, %v3508_v33  ;;  %v4026_v35 = vld [vmem:[#allocation5 + $0xc8] sm:$0xff] }
 0x57e   : > { %4682 = vmatmul.mubr.f32.gmra.mrb[24].mxu1 %v4026_v35 }
 0x57f   : > { %v3123_v32 = vpop.permute.xlu1 %3122 }
 0x580   : > { %3191 = vst.msk [vmem:[#allocation5 + $0xe0] sm:$0xff] %vm3162_vm2, %v3123_v32  ;;  %v2932_v23 = vpop.permute.xlu0 %2931 }
 0x581   : > { %2999 = vst.msk [vmem:[#allocation5 + $0xe8] sm:$0xff] %vm2969_vm1, %v2932_v23 }
 0x583   : > { %v3892_v44 = vpop.permute.xlu1 %3891 }
 0x584   : > { %3962 = vst.msk [vmem:[#allocation5 + $0xd0] sm:$0xff] %vm3935_vm6, %v3892_v44  ;;  %v3701_v48 = vpop.permute.xlu0 %3700 }
 0x585   : > { %3995 = vst.msk [vmem:[#allocation5 + $0xd0] sm:$0xff] %vm3968_vm7, %v7448_v46 }
 0x586   : > { %3770 = vst.msk [vmem:[#allocation5 + $0xd8] sm:$0xff] %vm3742_vm5, %v3701_v48 }
 0x587   : > { %v3316_v19 = vpop.permute.xlu1 %3315 }
 0x588   : > { %3384 = vst.msk [vmem:[#allocation5 + $0xe0] sm:$0xff] %vm3355_vm3, %v3316_v19  ;;  %v3125_v18 = vpop.permute.xlu0 %3124 }
 0x589   : > { %3192 = vst.msk [vmem:[#allocation5 + $0xe8] sm:$0xff] %vm3162_vm2, %v3125_v18 }
 0x58b   : > { %v3318_v57 = vpop.permute.xlu1 %3317 }
 0x58c   : > { %3385 = vst.msk [vmem:[#allocation5 + $0xe8] sm:$0xff] %vm3355_vm3, %v3318_v57  ;;  %v3894_v15 = vpop.permute.xlu0 %3893  ;;  %v4027_v53 = vld [vmem:[#allocation5 + $0xd0] sm:$0xff] }
 0x58d   : > { %3963 = vst.msk [vmem:[#allocation5 + $0xd8] sm:$0xff] %vm3935_vm6, %v3894_v15  ;;  %4684 = vmatprep.mubr.f32.mxu1 %v4027_v53 }
 0x58e   : > { %3996 = vst.msk [vmem:[#allocation5 + $0xd8] sm:$0xff] %vm3968_vm7, %v7448_v46 }
 0x58f   : > { %v2934_v52 = vpop.permute.xlu1 %2933 }
 0x590   : > { %3000 = vst.msk [vmem:[#allocation5 + $0xf0] sm:$0xff] %vm2969_vm1, %v2934_v52  ;;  %v3510_v12 = vpop.permute.xlu0 %3509 }
 0x591   : > { %3578 = vst.msk [vmem:[#allocation5 + $0xe0] sm:$0xff] %vm3549_vm4, %v3510_v12 }
 0x593   : > { %v3703_v29 = vpop.permute.xlu1 %3702 }
 0x594   : > { %3771 = vst.msk [vmem:[#allocation5 + $0xe0] sm:$0xff] %vm3742_vm5, %v3703_v29  ;;  %v3512_v51 = vpop.permute.xlu0 %3511 }
 0x595   : > { %3579 = vst.msk [vmem:[#allocation5 + $0xe8] sm:$0xff] %vm3549_vm4, %v3512_v51  ;;  %v4028_v4 = vld [vmem:[#allocation5 + $0xd8] sm:$0xff] }
 0x596   : > { %4685 = vmatmul.mubr.f32.gmra.mrb[26].mxu1 %v4028_v4 }
 0x597   : > { %v3127_v58 = vpop.permute.xlu1 %3126 }
 0x598   : > { %3193 = vst.msk [vmem:[#allocation5 + $0xf0] sm:$0xff] %vm3162_vm2, %v3127_v58  ;;  %v2936_v38 = vpop.permute.xlu0 %2935 }
 0x599   : > { %3001 = vst.msk [vmem:[#allocation5 + $0xf8] sm:$0xff] %vm2969_vm1, %v2936_v38 }
 0x59b   : > { %v3896_v28 = vpop.permute.xlu1 %3895 }
 0x59c   : > { %3964 = vst.msk [vmem:[#allocation5 + $0xe0] sm:$0xff] %vm3935_vm6, %v3896_v28  ;;  %v3705_v30 = vpop.permute.xlu0 %3704 }
 0x59d   : > { %3997 = vst.msk [vmem:[#allocation5 + $0xe0] sm:$0xff] %vm3968_vm7, %v7448_v46 }
 0x59e   : > { %3772 = vst.msk [vmem:[#allocation5 + $0xe8] sm:$0xff] %vm3742_vm5, %v3705_v30 }
 0x59f   : > { %v3320_v6 = vpop.permute.xlu1 %3319 }
 0x5a0   : > { %3386 = vst.msk [vmem:[#allocation5 + $0xf0] sm:$0xff] %vm3355_vm3, %v3320_v6  ;;  %v3129_v41 = vpop.permute.xlu0 %3128 }
 0x5a1   : > { %3194 = vst.msk [vmem:[#allocation5 + $0xf8] sm:$0xff] %vm3162_vm2, %v3129_v41 }
 0x5a3   : > { %v3322_v59 = vpop.permute.xlu1 %3321 }
 0x5a4   : > { %3387 = vst.msk [vmem:[#allocation5 + $0xf8] sm:$0xff] %vm3355_vm3, %v3322_v59  ;;  %v3898_v9 = vpop.permute.xlu0 %3897  ;;  %v4029_v34 = vld [vmem:[#allocation5 + $0xe0] sm:$0xff] }
 0x5a5   : > { %3965 = vst.msk [vmem:[#allocation5 + $0xe8] sm:$0xff] %vm3935_vm6, %v3898_v9  ;;  %4687 = vmatprep.mubr.f32.mxu1 %v4029_v34 }
 0x5a6   : > { %3998 = vst.msk [vmem:[#allocation5 + $0xe8] sm:$0xff] %vm3968_vm7, %v7448_v46 }
 0x5a7   : > { %v3516_v45 = vpop.permute.xlu1 %3515 }
 0x5a8   : > { %v3514_v36 = vpop.permute.xlu0 %3513  ;;  %3581 = vst.msk [vmem:[#allocation5 + $0xf8] sm:$0xff] %vm3549_vm4, %v3516_v45 }
 0x5a9   : > { %3580 = vst.msk [vmem:[#allocation5 + $0xf0] sm:$0xff] %vm3549_vm4, %v3514_v36 }
 0x5ab   : > { %v3709_v20 = vpop.permute.xlu1 %3708 }
 0x5ac   : > { %v3707_v25 = vpop.permute.xlu0 %3706  ;;  %3774 = vst.msk [vmem:[#allocation5 + $0xf8] sm:$0xff] %vm3742_vm5, %v3709_v20 }
 0x5ad   : > { %3773 = vst.msk [vmem:[#allocation5 + $0xf0] sm:$0xff] %vm3742_vm5, %v3707_v25  ;;  %v4030_v7 = vld [vmem:[#allocation5 + $0xe8] sm:$0xff] }
 0x5ae   : > { %4688 = vmatmul.mubr.f32.gmra.mrb[28].mxu1 %v4030_v7 }
 0x5af   : > { %v3902_v5 = vpop.permute.xlu1 %3901 }
 0x5b0   : > { %v3900_v16 = vpop.permute.xlu0 %3899  ;;  %3967 = vst.msk [vmem:[#allocation5 + $0xf8] sm:$0xff] %vm3935_vm6, %v3902_v5 }
 0x5b1   : > { %3966 = vst.msk [vmem:[#allocation5 + $0xf0] sm:$0xff] %vm3935_vm6, %v3900_v16 }
 0x5b2   : > { %4000 = vst.msk [vmem:[#allocation5 + $0xf8] sm:$0xff] %vm3968_vm7, %v7448_v46  ;;  %3999 = vst.msk [vmem:[#allocation5 + $0xf0] sm:$0xff] %vm3968_vm7, %v7448_v46 }
 0x5b9   : > { %v4032_v37 = vld [vmem:[#allocation5 + $0xf8] sm:$0xff]  ;;  %v4031_v27 = vld [vmem:[#allocation5 + $0xf0] sm:$0xff] }
 0x5ba   : > { %4690 = vmatprep.mubr.f32.mxu1 %v4031_v27 }
 0x5bb   : > { %4691 = vmatmul.mubr.f32.gmra.mrb[30].mxu1 %v4032_v37 }
 0x5cb   : > { %v4647_v1 = vpop.f32.mrb[0].mxu1 }
 0x5cc   : > { %v4128_v3 = vadd.f32 %v4647_v1, %v7225_v13  ;;  %v4122_v31 = vpop.f32.mrb[1].mxu1 }
 0x5cd   : > { %v4123_v55 = vadd.f32 %v7225_v13, %v4122_v31 }
 0x5ce   : > { %v4282_v40 = vmax.f32 %v4128_v3, 0.0 }
 0x5cf   : > { %v4281_v46 = vmax.f32 %v4123_v55, 0.0  ;;  %v4650_v0 = vpop.f32.mrb[2].mxu1 }
 0x5d0   : > { %4314 = vst [vmem:[%s7231_s25 + $0x8] sm:$0xff] %v4282_v40  ;;  %v4138_v14 = vadd.f32 %v4650_v0, %v7225_v13  ;;  %v4132_v39 = vpop.f32.mrb[3].mxu1 }
 0x5d1   : > { %4313 = vst [vmem:[%s7231_s25] sm:$0xff] %v4281_v46  ;;  %v4133_v43 = vadd.f32 %v7225_v13, %v4132_v39 }
 0x5d2   : > { %v4284_v54 = vmax.f32 %v4138_v14, 0.0 }
 0x5d3   : > { %v4283_v42 = vmax.f32 %v4133_v43, 0.0  ;;  %v4653_v17 = vpop.f32.mrb[4].mxu1 }
 0x5d4   : > { %4316 = vst [vmem:[%s7231_s25 + $0x18] sm:$0xff] %v4284_v54  ;;  %v4148_v11 = vadd.f32 %v4653_v17, %v7225_v13  ;;  %v4142_v21 = vpop.f32.mrb[5].mxu1 }
 0x5d5   : > { %4315 = vst [vmem:[%s7231_s25 + $0x10] sm:$0xff] %v4283_v42  ;;  %v4143_v61 = vadd.f32 %v7225_v13, %v4142_v21 }
 0x5d6   : > { %v4286_v63 = vmax.f32 %v4148_v11, 0.0 }
 0x5d7   : > { %v4285_v56 = vmax.f32 %v4143_v61, 0.0  ;;  %v4656_v60 = vpop.f32.mrb[6].mxu1 }
 0x5d8   : > { %4318 = vst [vmem:[%s7231_s25 + $0x28] sm:$0xff] %v4286_v63  ;;  %v4158_v24 = vadd.f32 %v4656_v60, %v7225_v13  ;;  %v4152_v8 = vpop.f32.mrb[7].mxu1 }
 0x5d9   : > { %4317 = vst [vmem:[%s7231_s25 + $0x20] sm:$0xff] %v4285_v56  ;;  %v4153_v2 = vadd.f32 %v7225_v13, %v4152_v8 }
 0x5da   : > { %v4288_v50 = vmax.f32 %v4158_v24, 0.0 }
 0x5db   : > { %v4287_v26 = vmax.f32 %v4153_v2, 0.0  ;;  %v4659_v10 = vpop.f32.mrb[8].mxu1 }
 0x5dc   : > { %4320 = vst [vmem:[%s7231_s25 + $0x38] sm:$0xff] %v4288_v50  ;;  %v4168_v47 = vadd.f32 %v4659_v10, %v7225_v13  ;;  %v4162_v49 = vpop.f32.mrb[9].mxu1 }
 0x5dd   : > { %4319 = vst [vmem:[%s7231_s25 + $0x30] sm:$0xff] %v4287_v26  ;;  %v4163_v22 = vadd.f32 %v7225_v13, %v4162_v49 }
 0x5de   : > { %v4290_v62 = vmax.f32 %v4168_v47, 0.0 }
 0x5df   : > { %v4289_v33 = vmax.f32 %v4163_v22, 0.0  ;;  %v4662_v35 = vpop.f32.mrb[10].mxu1 }
 0x5e0   : > { %4322 = vst [vmem:[%s7231_s25 + $0x48] sm:$0xff] %v4290_v62  ;;  %v4178_v32 = vadd.f32 %v4662_v35, %v7225_v13  ;;  %v4172_v23 = vpop.f32.mrb[11].mxu1 }
 0x5e1   : > { %4321 = vst [vmem:[%s7231_s25 + $0x40] sm:$0xff] %v4289_v33  ;;  %v4173_v44 = vadd.f32 %v7225_v13, %v4172_v23 }
 0x5e2   : > { %v4292_v48 = vmax.f32 %v4178_v32, 0.0 }
 0x5e3   : > { %v4291_v19 = vmax.f32 %v4173_v44, 0.0  ;;  %v4665_v18 = vpop.f32.mrb[12].mxu1 }
 0x5e4   : > { %4324 = vst [vmem:[%s7231_s25 + $0x58] sm:$0xff] %v4292_v48  ;;  %v4188_v57 = vadd.f32 %v4665_v18, %v7225_v13  ;;  %v4182_v15 = vpop.f32.mrb[13].mxu1 }
 0x5e5   : > { %4323 = vst [vmem:[%s7231_s25 + $0x50] sm:$0xff] %v4291_v19  ;;  %v4183_v53 = vadd.f32 %v7225_v13, %v4182_v15 }
 0x5e6   : > { %v4294_v52 = vmax.f32 %v4188_v57, 0.0 }
 0x5e7   : > { %v4293_v12 = vmax.f32 %v4183_v53, 0.0  ;;  %v4668_v29 = vpop.f32.mrb[14].mxu1 }
 0x5e8   : > { %4326 = vst [vmem:[%s7231_s25 + $0x68] sm:$0xff] %v4294_v52  ;;  %v4198_v51 = vadd.f32 %v4668_v29, %v7225_v13  ;;  %v4192_v4 = vpop.f32.mrb[15].mxu1 }
 0x5e9   : > { %4325 = vst [vmem:[%s7231_s25 + $0x60] sm:$0xff] %v4293_v12  ;;  %v4193_v58 = vadd.f32 %v7225_v13, %v4192_v4 }
 0x5ea   : > { %v4296_v38 = vmax.f32 %v4198_v51, 0.0 }
 0x5eb   : > { %v4295_v28 = vmax.f32 %v4193_v58, 0.0 }
 0x5ec   : > { %4328 = vst [vmem:[%s7231_s25 + $0x78] sm:$0xff] %v4296_v38 }
 0x5ed   : > { %4327 = vst [vmem:[%s7231_s25 + $0x70] sm:$0xff] %v4295_v28 }
 0x5f1   : > { %v4671_v30 = vpop.f32.mrb[16].mxu1 }
 0x5f2   : > { %v4208_v6 = vadd.f32 %v4671_v30, %v7225_v13  ;;  %v4202_v41 = vpop.f32.mrb[17].mxu1 }
 0x5f3   : > { %v4203_v59 = vadd.f32 %v7225_v13, %v4202_v41 }
 0x5f4   : > { %v4298_v9 = vmax.f32 %v4208_v6, 0.0 }
 0x5f5   : > { %v4297_v34 = vmax.f32 %v4203_v59, 0.0 }
 0x5f6   : > { %4330 = vst [vmem:[%s7231_s25 + $0x88] sm:$0xff] %v4298_v9 }
 0x5f7   : > { %4329 = vst [vmem:[%s7231_s25 + $0x80] sm:$0xff] %v4297_v34 }
 0x609   : > { %v4674_v45 = vpop.f32.mrb[18].mxu1 }
 0x60a   : > { %v4218_v36 = vadd.f32 %v4674_v45, %v7225_v13  ;;  %v4212_v20 = vpop.f32.mrb[19].mxu1 }
 0x60b   : > { %v4213_v25 = vadd.f32 %v7225_v13, %v4212_v20 }
 0x60c   : > { %v4300_v7 = vmax.f32 %v4218_v36, 0.0 }
 0x60d   : > { %v4299_v5 = vmax.f32 %v4213_v25, 0.0 }
 0x60e   : > { %4332 = vst [vmem:[%s7231_s25 + $0x98] sm:$0xff] %v4300_v7 }
 0x60f   : > { %4331 = vst [vmem:[%s7231_s25 + $0x90] sm:$0xff] %v4299_v5 }
 0x621   : > { %v4677_v16 = vpop.f32.mrb[20].mxu1 }
 0x622   : > { %v4228_v37 = vadd.f32 %v4677_v16, %v7225_v13  ;;  %v4222_v27 = vpop.f32.mrb[21].mxu1 }
 0x623   : > { %v4223_v1 = vadd.f32 %v7225_v13, %v4222_v27 }
 0x624   : > { %v4302_v3 = vmax.f32 %v4228_v37, 0.0 }
 0x625   : > { %v4301_v31 = vmax.f32 %v4223_v1, 0.0 }
 0x626   : > { %4334 = vst [vmem:[%s7231_s25 + $0xa8] sm:$0xff] %v4302_v3 }
 0x627   : > { %4333 = vst [vmem:[%s7231_s25 + $0xa0] sm:$0xff] %v4301_v31 }
 0x639   : > { %v4680_v55 = vpop.f32.mrb[22].mxu1 }
 0x63a   : > { %v4238_v40 = vadd.f32 %v4680_v55, %v7225_v13  ;;  %v4232_v46 = vpop.f32.mrb[23].mxu1 }
 0x63b   : > { %v4233_v0 = vadd.f32 %v7225_v13, %v4232_v46 }
 0x63c   : > { %v4304_v14 = vmax.f32 %v4238_v40, 0.0 }
 0x63d   : > { %v4303_v39 = vmax.f32 %v4233_v0, 0.0 }
 0x63e   : > { %4336 = vst [vmem:[%s7231_s25 + $0xb8] sm:$0xff] %v4304_v14 }
 0x63f   : > { %4335 = vst [vmem:[%s7231_s25 + $0xb0] sm:$0xff] %v4303_v39 }
 0x651   : > { %v4683_v43 = vpop.f32.mrb[24].mxu1 }
 0x652   : > { %v4248_v54 = vadd.f32 %v4683_v43, %v7225_v13  ;;  %v4242_v42 = vpop.f32.mrb[25].mxu1 }
 0x653   : > { %v4243_v17 = vadd.f32 %v7225_v13, %v4242_v42 }
 0x654   : > { %v4306_v11 = vmax.f32 %v4248_v54, 0.0 }
 0x655   : > { %v4305_v21 = vmax.f32 %v4243_v17, 0.0 }
 0x656   : > { %4338 = vst [vmem:[%s7231_s25 + $0xc8] sm:$0xff] %v4306_v11 }
 0x657   : > { %4337 = vst [vmem:[%s7231_s25 + $0xc0] sm:$0xff] %v4305_v21 }
 0x669   : > { %v4686_v61 = vpop.f32.mrb[26].mxu1 }
 0x66a   : > { %v4258_v63 = vadd.f32 %v4686_v61, %v7225_v13  ;;  %v4252_v56 = vpop.f32.mrb[27].mxu1 }
 0x66b   : > { %v4253_v60 = vadd.f32 %v7225_v13, %v4252_v56 }
 0x66c   : > { %v4308_v24 = vmax.f32 %v4258_v63, 0.0 }
 0x66d   : > { %v4307_v8 = vmax.f32 %v4253_v60, 0.0 }
 0x66e   : > { %4340 = vst [vmem:[%s7231_s25 + $0xd8] sm:$0xff] %v4308_v24 }
 0x66f   : > { %4339 = vst [vmem:[%s7231_s25 + $0xd0] sm:$0xff] %v4307_v8 }
 0x681   : > { %v4689_v2 = vpop.f32.mrb[28].mxu1 }
 0x682   : > { %v4268_v50 = vadd.f32 %v4689_v2, %v7225_v13  ;;  %v4262_v26 = vpop.f32.mrb[29].mxu1 }
 0x683   : > { %v4263_v10 = vadd.f32 %v7225_v13, %v4262_v26 }
 0x684   : > { %v4310_v47 = vmax.f32 %v4268_v50, 0.0 }
 0x685   : > { %v4309_v49 = vmax.f32 %v4263_v10, 0.0 }
 0x686   : > { %4342 = vst [vmem:[%s7231_s25 + $0xe8] sm:$0xff] %v4310_v47 }
 0x687   : > { %4341 = vst [vmem:[%s7231_s25 + $0xe0] sm:$0xff] %v4309_v49 }
 0x68e   : > { %v4692_v22 = vpop.f32.mrb[30].mxu1 }
 0x68f   : > { %v4278_v62 = vadd.f32 %v4692_v22, %v7225_v13  ;;  %v4272_v33 = vpop.f32.mrb[31].mxu1 }
 0x690   : > { %v4273_v35 = vadd.f32 %v7225_v13, %v4272_v33 }
 0x691   : > { %v4312_v32 = vmax.f32 %v4278_v62, 0.0 }
 0x692   : > { %v4311_v23 = vmax.f32 %v4273_v35, 0.0 }
 0x693   : > { %4344 = vst [vmem:[%s7231_s25 + $0xf8] sm:$0xff] %v4312_v32 }
 0x694   : > { %4343 = vst [vmem:[%s7231_s25 + $0xf0] sm:$0xff] %v4311_v23 }
 0x695   : > { %4824 = shalt.err (!%p4821_p3)
}
 0x696   : > { %s4825_s12 = scalar_lea.hbm %s7298_s6, 4096  ;;  %s4829_s13 = scalar_lea.hbm %s7353_s5, 8192 }
 0x697   : > { %p4826_p4 = scmp.ne.s32.totalorder %s7298_s6, %s4825_s12  ;;  %p4830_p9 = scmp.lt.u32.totalorder %s7298_s6, %s7353_s5 }
 0x698   : > { %p4831_p10 = scmp.lt.u32.totalorder %s4829_s13, %s4825_s12  ;;  %p4833_p12 = scmp.lt.u32.totalorder %s4825_s12, %s7298_s6 }
 0x699   : > { %p4827_p7 = pnand %p4826_p4, %p4958_p5 }
 0x69a   : > { %p4832_p11 = por %p4831_p10, %p4830_p9 }
 0x69b   : > { %p4828_p8 = pneg %p4827_p7 }
 0x69c   : > { %p4834_p13 = por %p4833_p12, %p4832_p11 }
 0x69e   : > { %p4835_p0 = pnand %p4834_p13, %p4828_p8 }
 0x6a0   : > { %4838 = shalt.err (!%p4835_p0)
}
 0x6a1   : > { %s4889_s26 = smov 128  }
 0x6a2   : > { %4757 = dma.vmem_to_hbm [thread:$0]  (%p4958_p5), %s7300_s16, 4096, %s7298_s6, %s7306_s22, %s4889_s26, %s4889_s26, %s4877_s11  }
 0x6a3 PF: > { %p4763_p1 = scmp.ge.s32.totalorder %s4873_s21, 2  ;;  %s4374_s14 = sand.u32 1, %s4861_s18  }
 0x6a4   : > { %s4375_s30 = scalar_lea.sflag [#allocation7], %s4374_s14 }
 0x6a5   : > { %p4760_p2 = pnand %p4763_p1, %p4962_p6 }
 0x6a7   : > { %4856 = dma.done.wait (!%p4760_p2), %s4375_s30, 4096  }
 0x6a8   : > { %4858 = vsyncadd (!%p4760_p2), %s4375_s30, 4294963200  ;;  %p15_p3 = scmp.ge.s32.totalorder %s4945_s24, 4   ;;  %s7449_s18 = smov %s4865_s19 }
 0x6a9   : > { %s7450_s19 = smov %s4869_s20  ;;  %s7451_s20 = smov %s4956_s27 }
 0x6aa   : > { %s7452_s21 = smov %s4945_s24  ;;  %17 = sbr.rel (!%p15_p3) target bundleno = 3 (0x3), region = 81 }
 0x6b1   :  { %4380 = vsyncpa [#allocation7], 1 }
 0x6b2   :  { %4382 = vsyncpa [#allocation7 + $0x1], 1 }

</bundles_post_ra>
